<compile_context>
chip_gen: v7x
topology: tpu7x:2x2x1
jax: 0.10.0
libtpu: 0.0.40
codegen_flags: <defaults>
</compile_context>

<pallas_src>
import math
import jax
import jax.numpy as jnp
from jax import lax
from jax.experimental import pallas as pl
from jax.experimental.pallas import tpu as pltpu

# ---------------- small synthetic config (mirrors IDeaLGPTConfig structure) ----------------
B = 2            # batch
T = 8            # sequence_length
C = 32           # embed_dim
H = 4            # num_heads
HS = C // H      # interim head size
FF = 4 * C       # feedforward hidden = 128 (one full lane group)
V = 128          # vocab_size (small synthetic; chosen lane-dense = 128)
NBLK = 2         # num_blocks
EPS = 1e-5
INV_SQRT2 = 1.0 / math.sqrt(2.0)
NEG_INF = -1e30  # finite additive mask value (avoids exp(-inf) NaN hazard)

assert V == FF, "lm_head bias shares the (B*T, 128) vector slab with b1 (requires V == FF)"

# per-block row order inside the C-wide vector slab vecC (each pre-broadcast to B*T rows)
_LN1G, _LN1B, _BP, _LN2G, _LN2B, _B2 = range(6)
_NCVEC = 6


def _layernorm(x, g, b):
    mu = jnp.mean(x, axis=-1, keepdims=True)
    var = jnp.mean((x - mu) ** 2, axis=-1, keepdims=True)
    return (x - mu) * lax.rsqrt(var + EPS) * g + b


# --------------------------- the fused Pallas kernel ---------------------------

def gpt_kernel(x_ref, wA_ref, wB_ref, vecC_ref, vecF_ref, o_ref):
    """NBLK transformer blocks + final LN + lm_head for all B*T rows, one invocation."""
    x = x_ref[...]                                      # (B*T, C) f32, C on lanes

    # additive causal mask (0 keep / NEG_INF drop), built once; broadcasts over (B*H, T, T)
    row = lax.broadcasted_iota(jnp.int32, (T, T), 0)
    col = lax.broadcasted_iota(jnp.int32, (T, T), 1)
    mask = jnp.where(col <= row, 0.0, NEG_INF).astype(jnp.float32)

    for blk in range(NBLK):                             # static unroll; weights stay resident
        wqkv = wA_ref[2 * blk]                          # (C, 128) bf16: [Wk | Wq*scale | Wv | 0]
        w1 = wA_ref[2 * blk + 1]                        # (C, FF)  bf16
        wpw2 = wB_ref[blk]                              # (C+FF, C) bf16: [Wp ; W2]
        wp = wpw2[:C, :]                                # (C, C)
        w2 = wpw2[C:, :]                                # (FF, C)

        ln1g = vecC_ref[_NCVEC * blk + _LN1G]           # all (B*T, C) f32, pre-broadcast rows
        ln1b = vecC_ref[_NCVEC * blk + _LN1B]
        bp = vecC_ref[_NCVEC * blk + _BP]
        ln2g = vecC_ref[_NCVEC * blk + _LN2G]
        ln2b = vecC_ref[_NCVEC * blk + _LN2B]
        b2 = vecC_ref[_NCVEC * blk + _B2]
        b1 = vecF_ref[blk]                              # (B*T, FF) f32

        # ---- ln1 + multi-head causal self-attention (heads batched, one softmax) ----
        xln = _layernorm(x, ln1g, ln1b).astype(jnp.bfloat16)
        kqv = jnp.dot(xln, wqkv, preferred_element_type=jnp.float32)    # (B*T, 128) = [k|q|v|0]

        def split_heads(sect):
            # (B*T, C) lane slice -> (B*H, T, HS): move the head index to the batch axis
            a = kqv[:, sect * C:(sect + 1) * C].reshape(B, T, H, HS)
            return jnp.transpose(a, (0, 2, 1, 3)).reshape(B * H, T, HS).astype(jnp.bfloat16)

        k, q, v = split_heads(0), split_heads(1), split_heads(2)
        # reference quirks: scores = k @ q^T (k/q order), embed_dim**-0.5 scale folded into Wq
        wei = jnp.einsum('gtd,gsd->gts', k, q, preferred_element_type=jnp.float32)
        wei = wei + mask                                 # additive causal mask
        wei = jnp.exp(wei - jnp.max(wei, axis=-1, keepdims=True))
        wei = wei * pl.reciprocal(jnp.sum(wei, axis=-1, keepdims=True), approx=True)
        ah = jnp.einsum('gts,gsd->gtd', wei.astype(jnp.bfloat16), v,
                        preferred_element_type=jnp.float32)             # (B*H, T, HS) f32
        # reassemble head outputs to (B*T, C) and apply the projection as ONE K=C matmul
        att = jnp.transpose(ah.reshape(B, H, T, HS), (0, 2, 1, 3)).reshape(B * T, C)
        sa = jnp.dot(att.astype(jnp.bfloat16), wp, preferred_element_type=jnp.float32)
        x = x + sa + bp                                  # residual; dropout = identity (eval)

        # ---- ln2 + feedforward (exact erf GELU, matching torch nn.GELU default) ----
        x2 = _layernorm(x, ln2g, ln2b).astype(jnp.bfloat16)
        h1 = jnp.dot(x2, w1, preferred_element_type=jnp.float32) + b1
        g1 = 0.5 * h1 * (1.0 + lax.erf(h1 * INV_SQRT2))
        ff = jnp.dot(g1.astype(jnp.bfloat16), w2, preferred_element_type=jnp.float32) + b2
        x = x + ff                                       # residual; dropout = identity (eval)

    # ---- final LayerNorm + lm_head; (B*T, V) store is lane-dense (V = 128) ----
    fg = vecC_ref[_NCVEC * NBLK + 0]
    fb = vecC_ref[_NCVEC * NBLK + 1]
    blm = vecF_ref[NBLK]
    wlm = wA_ref[2 * NBLK]
    xf = _layernorm(x, fg, fb).astype(jnp.bfloat16)
    o_ref[...] = jnp.dot(xf, wlm, preferred_element_type=jnp.float32) + blm


# --------------------------- pallas_call wrapper ---------------------------

def _full_spec(a):
    nd = a.ndim
    return pl.BlockSpec(a.shape, lambda i, _nd=nd: (0,) * _nd)


def run_transformer(x_flat, packed):
    inputs = (x_flat,) + tuple(packed)
    return pl.pallas_call(
        gpt_kernel,
        out_shape=jax.ShapeDtypeStruct((B * T, V), jnp.float32),
        grid=(1,),   # single launch; all weights resident in VMEM
        in_specs=[_full_spec(a) for a in inputs],
        out_specs=pl.BlockSpec((B * T, V), lambda i: (0, 0)),
        compiler_params=pltpu.CompilerParams(dimension_semantics=("arbitrary",)),
    )(*inputs)


# --------------------------- parameters, packing & forward ---------------------------

def init_params(key):
    def nrm(k, shape, scale=0.02):
        return (scale * jax.random.normal(k, shape)).astype(jnp.float32)

    keys = iter(jax.random.split(key, 4 + NBLK * 16))
    params = {
        'tok_emb': nrm(next(keys), (V, C)),
        'pos_emb': nrm(next(keys), (T, C)),
        'fln_g': jnp.ones((1, C), jnp.float32),
        'fln_b': jnp.zeros((1, C), jnp.float32),
        'wlm': nrm(next(keys), (C, V)),
        'blm': nrm(next(keys), (1, V)),
        'blocks': [],
    }
    for _ in range(NBLK):
        blk = {
            'ln1_g': jnp.ones((1, C), jnp.float32),
            'ln1_b': jnp.zeros((1, C), jnp.float32),
            'wk': nrm(next(keys), (C, C)),      # per-head key weights concatenated on out axis
            'wq': nrm(next(keys), (C, C)),
            'wv': nrm(next(keys), (C, C)),
            'wp': nrm(next(keys), (C, C)),      # attention output projection
            'bp': nrm(next(keys), (1, C)),
            'ln2_g': jnp.ones((1, C), jnp.float32),
            'ln2_b': jnp.zeros((1, C), jnp.float32),
            'w1': nrm(next(keys), (C, FF)),     # FeedForward expand
            'b1': nrm(next(keys), (1, FF)),
            'w2': nrm(next(keys), (FF, C)),     # FeedForward contract
            'b2': nrm(next(keys), (1, C)),
        }
        params['blocks'].append(blk)
    return params


def pack_params(params):
    """Pack everything into 4 VMEM-friendly slabs (few DMAs, lane-dense, bf16 MXU operands).

      wA   (2*NBLK+1, C, 128) bf16 : per block [Wk | Wq*scale | Wv | 0] and W1, plus lm_head W.
      wB   (NBLK, C+FF, C)    bf16 : per block [Wp ; W2].
      vecC (6*NBLK+2, B*T, C) f32  : C-wide vector params pre-broadcast to all B*T rows.
      vecF (NBLK+1, B*T, FF)  f32  : b1 per block + lm_head bias (V == FF == 128).
    """
    blks = params['blocks']
    scale = C ** (-0.5)                                  # reference quirk: embed_dim ** -0.5
    zpad = jnp.zeros((C, FF - 3 * C), jnp.float32)

    wA_list = []
    for b in blks:
        wA_list.append(jnp.concatenate([b['wk'], b['wq'] * scale, b['wv'], zpad], axis=1))
        wA_list.append(b['w1'])
    wA_list.append(params['wlm'])
    wA = jnp.stack(wA_list).astype(jnp.bfloat16)         # (2*NBLK+1, C, 128)

    wB = jnp.stack([jnp.concatenate([b['wp'], b['w2']], axis=0) for b in blks]
                   ).astype(jnp.bfloat16)                # (NBLK, C+FF, C)

    def bc(v):                                           # (1, w) -> (B*T, w) host-side broadcast
        return jnp.broadcast_to(v.reshape(1, -1), (B * T, v.shape[-1]))

    vecC = jnp.stack(
        [bc(b[n]) for b in blks for n in ('ln1_g', 'ln1_b', 'bp', 'ln2_g', 'ln2_b', 'b2')]
        + [bc(params['fln_g']), bc(params['fln_b'])])    # (6*NBLK+2, B*T, C) f32
    vecF = jnp.stack([bc(b['b1']) for b in blks] + [bc(params['blm'])])  # (NBLK+1, B*T, FF) f32
    return wA, wB, vecC, vecF


def transformer_forward(ixs, tok_emb, pos_emb, packed):
    # Embedding lookups stay in plain JAX (gather glue); everything else is one Pallas kernel.
    x = tok_emb[ixs] + pos_emb[None, :T, :]               # (B, T, C)
    logits = run_transformer(x.reshape(B * T, C), packed)
    # TODO(synk): cross-entropy loss branch (targets is not None) not implemented; this mirrors
    # the targets=None inference path (loss = None).
    return logits.reshape(B, T, V)


if __name__ == "__main__":
    key = jax.random.PRNGKey(0)
    k_ix, k_par = jax.random.split(key)
    params = init_params(k_par)
    packed = pack_params(params)
    ixs = jax.random.randint(k_ix, (B, T), 0, V, dtype=jnp.int32)

    fwd = jax.jit(transformer_forward)
    logits = jax.block_until_ready(fwd(ixs, params['tok_emb'], params['pos_emb'], packed))

    assert logits.shape == (B, T, V), logits.shape
    assert bool(jnp.all(jnp.isfinite(logits)))
    print("KERNEL_OK")
</pallas_src>

<mosaic_0001>
module attributes {stable_mosaic.version = 11 : i64} {
  func.func @gpt_kernel(%arg0: i32, %arg1: memref<16x32xf32, #tpu.memory_space<vmem>>, %arg2: memref<5x32x128xbf16, #tpu.memory_space<vmem>>, %arg3: memref<2x160x32xbf16, #tpu.memory_space<vmem>>, %arg4: memref<14x16x32xf32, #tpu.memory_space<vmem>>, %arg5: memref<3x16x128xf32, #tpu.memory_space<vmem>>, %arg6: memref<16x128xf32, #tpu.memory_space<vmem>>) attributes {dimension_semantics = [#tpu.dimension_semantics<arbitrary>], iteration_bounds = array<i64: 1>, scalar_prefetch = 0 : i64, scratch_operands = 0 : i64, tpu.core_type = #tpu.core_type<tc>, window_params = [{pipeline_mode = #tpu.pipeline_mode<synchronous>, transform_indices = @transform_0, window_bounds = array<i64: 16, 32>}, {pipeline_mode = #tpu.pipeline_mode<synchronous>, transform_indices = @transform_1, window_bounds = array<i64: 5, 32, 128>}, {pipeline_mode = #tpu.pipeline_mode<synchronous>, transform_indices = @transform_2, window_bounds = array<i64: 2, 160, 32>}, {pipeline_mode = #tpu.pipeline_mode<synchronous>, transform_indices = @transform_3, window_bounds = array<i64: 14, 16, 32>}, {pipeline_mode = #tpu.pipeline_mode<synchronous>, transform_indices = @transform_4, window_bounds = array<i64: 3, 16, 128>}, {pipeline_mode = #tpu.pipeline_mode<synchronous>, transform_indices = @transform_5, window_bounds = array<i64: 16, 128>}]} {
    %c0 = arith.constant 0 : index
    %c0_0 = arith.constant 0 : index
    %0 = vector.load %arg1[%c0, %c0_0] : memref<16x32xf32, #tpu.memory_space<vmem>>, vector<16x32xf32>
    %1 = tpu.iota {dimensions = array<i32: 0>} : vector<8x8xi32>
    %2 = tpu.iota {dimensions = array<i32: 1>} : vector<8x8xi32>
    %3 = arith.cmpi sle, %2, %1 : vector<8x8xi32>
    %cst = arith.constant 0.000000e+00 : f32
    %cst_1 = arith.constant -1.000000e+30 : f32
    %4 = vector.broadcast %cst : f32 to vector<8x8xf32>
    %5 = vector.broadcast %cst_1 : f32 to vector<8x8xf32>
    %6 = arith.select %3, %4, %5 : vector<8x8xi1>, vector<8x8xf32>
    %c0_2 = arith.constant 0 : index
    %c0_3 = arith.constant 0 : index
    %c0_4 = arith.constant 0 : index
    %7 = vector.load %arg2[%c0_2, %c0_3, %c0_4] : memref<5x32x128xbf16, #tpu.memory_space<vmem>>, vector<1x32x128xbf16>
    %8 = vector.shape_cast %7 : vector<1x32x128xbf16> to vector<32x128xbf16>
    %c1 = arith.constant 1 : index
    %c0_5 = arith.constant 0 : index
    %c0_6 = arith.constant 0 : index
    %9 = vector.load %arg2[%c1, %c0_5, %c0_6] : memref<5x32x128xbf16, #tpu.memory_space<vmem>>, vector<1x32x128xbf16>
    %10 = vector.shape_cast %9 : vector<1x32x128xbf16> to vector<32x128xbf16>
    %c0_7 = arith.constant 0 : index
    %c0_8 = arith.constant 0 : index
    %c0_9 = arith.constant 0 : index
    %11 = vector.load %arg3[%c0_7, %c0_8, %c0_9] : memref<2x160x32xbf16, #tpu.memory_space<vmem>>, vector<1x160x32xbf16>
    %12 = vector.shape_cast %11 : vector<1x160x32xbf16> to vector<160x32xbf16>
    %13 = vector.extract_strided_slice %12 {offsets = [0, 0], sizes = [32, 32], strides = [1, 1]} : vector<160x32xbf16> to vector<32x32xbf16>
    %14 = vector.extract_strided_slice %12 {offsets = [32, 0], sizes = [128, 32], strides = [1, 1]} : vector<160x32xbf16> to vector<128x32xbf16>
    %c0_10 = arith.constant 0 : index
    %c0_11 = arith.constant 0 : index
    %c0_12 = arith.constant 0 : index
    %15 = vector.load %arg4[%c0_10, %c0_11, %c0_12] : memref<14x16x32xf32, #tpu.memory_space<vmem>>, vector<1x16x32xf32>
    %16 = vector.shape_cast %15 : vector<1x16x32xf32> to vector<16x32xf32>
    %c1_13 = arith.constant 1 : index
    %c0_14 = arith.constant 0 : index
    %c0_15 = arith.constant 0 : index
    %17 = vector.load %arg4[%c1_13, %c0_14, %c0_15] : memref<14x16x32xf32, #tpu.memory_space<vmem>>, vector<1x16x32xf32>
    %18 = vector.shape_cast %17 : vector<1x16x32xf32> to vector<16x32xf32>
    %c2 = arith.constant 2 : index
    %c0_16 = arith.constant 0 : index
    %c0_17 = arith.constant 0 : index
    %19 = vector.load %arg4[%c2, %c0_16, %c0_17] : memref<14x16x32xf32, #tpu.memory_space<vmem>>, vector<1x16x32xf32>
    %20 = vector.shape_cast %19 : vector<1x16x32xf32> to vector<16x32xf32>
    %c3 = arith.constant 3 : index
    %c0_18 = arith.constant 0 : index
    %c0_19 = arith.constant 0 : index
    %21 = vector.load %arg4[%c3, %c0_18, %c0_19] : memref<14x16x32xf32, #tpu.memory_space<vmem>>, vector<1x16x32xf32>
    %22 = vector.shape_cast %21 : vector<1x16x32xf32> to vector<16x32xf32>
    %c4 = arith.constant 4 : index
    %c0_20 = arith.constant 0 : index
    %c0_21 = arith.constant 0 : index
    %23 = vector.load %arg4[%c4, %c0_20, %c0_21] : memref<14x16x32xf32, #tpu.memory_space<vmem>>, vector<1x16x32xf32>
    %24 = vector.shape_cast %23 : vector<1x16x32xf32> to vector<16x32xf32>
    %c5 = arith.constant 5 : index
    %c0_22 = arith.constant 0 : index
    %c0_23 = arith.constant 0 : index
    %25 = vector.load %arg4[%c5, %c0_22, %c0_23] : memref<14x16x32xf32, #tpu.memory_space<vmem>>, vector<1x16x32xf32>
    %26 = vector.shape_cast %25 : vector<1x16x32xf32> to vector<16x32xf32>
    %c0_24 = arith.constant 0 : index
    %c0_25 = arith.constant 0 : index
    %c0_26 = arith.constant 0 : index
    %27 = vector.load %arg5[%c0_24, %c0_25, %c0_26] : memref<3x16x128xf32, #tpu.memory_space<vmem>>, vector<1x16x128xf32>
    %28 = vector.shape_cast %27 : vector<1x16x128xf32> to vector<16x128xf32>
    %cst_27 = arith.constant dense<0.000000e+00> : vector<16xf32>
    %29 = vector.multi_reduction <add>, %0, %cst_27 [1] : vector<16x32xf32> to vector<16xf32>
    %30 = vector.shape_cast %29 : vector<16xf32> to vector<16x1xf32>
    %cst_28 = arith.constant 3.200000e+01 : f32
    %31 = vector.broadcast %cst_28 : f32 to vector<16x1xf32>
    %32 = arith.divf %30, %31 : vector<16x1xf32>
    %33 = vector.broadcast %32 : vector<16x1xf32> to vector<16x32xf32>
    %34 = arith.subf %0, %33 : vector<16x32xf32>
    %35 = arith.mulf %34, %34 : vector<16x32xf32>
    %cst_29 = arith.constant dense<0.000000e+00> : vector<16xf32>
    %36 = vector.multi_reduction <add>, %35, %cst_29 [1] : vector<16x32xf32> to vector<16xf32>
    %37 = vector.shape_cast %36 : vector<16xf32> to vector<16x1xf32>
    %cst_30 = arith.constant 3.200000e+01 : f32
    %38 = vector.broadcast %cst_30 : f32 to vector<16x1xf32>
    %39 = arith.divf %37, %38 : vector<16x1xf32>
    %40 = vector.broadcast %32 : vector<16x1xf32> to vector<16x32xf32>
    %41 = arith.subf %0, %40 : vector<16x32xf32>
    %cst_31 = arith.constant 9.99999974E-6 : f32
    %42 = vector.broadcast %cst_31 : f32 to vector<16x1xf32>
    %43 = arith.addf %39, %42 : vector<16x1xf32>
    %44 = math.rsqrt %43 : vector<16x1xf32>
    %45 = vector.broadcast %44 : vector<16x1xf32> to vector<16x32xf32>
    %46 = arith.mulf %41, %45 : vector<16x32xf32>
    %47 = arith.mulf %46, %16 : vector<16x32xf32>
    %48 = arith.addf %47, %18 : vector<16x32xf32>
    %49 = arith.truncf %48 : vector<16x32xf32> to vector<16x32xbf16>
    %cst_32 = arith.constant dense<0.000000e+00> : vector<16x128xf32>
    %50 = tpu.matmul %49, %8, %cst_32 {dimension_numbers = #tpu.dot_dimension_numbers<[1], [0], [0], [1], [0, 0, 1, 1], [], []>} : vector<16x32xbf16>, vector<32x128xbf16>, vector<16x128xf32> -> vector<16x128xf32>
    %51 = vector.extract_strided_slice %50 {offsets = [0, 0], sizes = [16, 32], strides = [1, 1]} : vector<16x128xf32> to vector<16x32xf32>
    %52 = vector.shape_cast %51 : vector<16x32xf32> to vector<2x8x4x8xf32>
    %53 = tpu.transpose %52, [0, 2, 1, 3] : vector<2x8x4x8xf32> -> vector<2x4x8x8xf32>
    %54 = vector.shape_cast %53 : vector<2x4x8x8xf32> to vector<8x8x8xf32>
    %55 = arith.truncf %54 : vector<8x8x8xf32> to vector<8x8x8xbf16>
    %56 = vector.extract_strided_slice %50 {offsets = [0, 32], sizes = [16, 32], strides = [1, 1]} : vector<16x128xf32> to vector<16x32xf32>
    %57 = vector.shape_cast %56 : vector<16x32xf32> to vector<2x8x4x8xf32>
    %58 = tpu.transpose %57, [0, 2, 1, 3] : vector<2x8x4x8xf32> -> vector<2x4x8x8xf32>
    %59 = vector.shape_cast %58 : vector<2x4x8x8xf32> to vector<8x8x8xf32>
    %60 = arith.truncf %59 : vector<8x8x8xf32> to vector<8x8x8xbf16>
    %61 = vector.extract_strided_slice %50 {offsets = [0, 64], sizes = [16, 32], strides = [1, 1]} : vector<16x128xf32> to vector<16x32xf32>
    %62 = vector.shape_cast %61 : vector<16x32xf32> to vector<2x8x4x8xf32>
    %63 = tpu.transpose %62, [0, 2, 1, 3] : vector<2x8x4x8xf32> -> vector<2x4x8x8xf32>
    %64 = vector.shape_cast %63 : vector<2x4x8x8xf32> to vector<8x8x8xf32>
    %65 = arith.truncf %64 : vector<8x8x8xf32> to vector<8x8x8xbf16>
    "tpu.trace_start"() <{level = 10 : i32, message = "gtd,gsd->gts"}> : () -> ()
    %cst_33 = arith.constant dense<0.000000e+00> : vector<8x8x8xf32>
    %66 = tpu.matmul %55, %60, %cst_33 {dimension_numbers = #tpu.dot_dimension_numbers<[2], [2], [1], [1], [0, 0, 0, 1, 1, 1], [0], [0]>} : vector<8x8x8xbf16>, vector<8x8x8xbf16>, vector<8x8x8xf32> -> vector<8x8x8xf32>
    "tpu.trace_stop"() : () -> ()
    %67 = vector.shape_cast %6 : vector<8x8xf32> to vector<1x8x8xf32>
    %68 = vector.broadcast %67 : vector<1x8x8xf32> to vector<8x8x8xf32>
    %69 = arith.addf %66, %68 : vector<8x8x8xf32>
    %cst_34 = arith.constant dense<0xFF800000> : vector<8x8xf32>
    %70 = vector.multi_reduction <maximumf>, %69, %cst_34 [2] : vector<8x8x8xf32> to vector<8x8xf32>
    %71 = vector.shape_cast %70 : vector<8x8xf32> to vector<8x8x1xf32>
    %72 = vector.broadcast %71 : vector<8x8x1xf32> to vector<8x8x8xf32>
    %73 = arith.subf %69, %72 : vector<8x8x8xf32>
    %74 = math.exp %73 : vector<8x8x8xf32>
    %cst_35 = arith.constant dense<0.000000e+00> : vector<8x8xf32>
    %75 = vector.multi_reduction <add>, %74, %cst_35 [2] : vector<8x8x8xf32> to vector<8x8xf32>
    %76 = vector.shape_cast %75 : vector<8x8xf32> to vector<8x8x1xf32>
    %77 = tpu.reciprocal %76 {approx = true} : vector<8x8x1xf32> -> vector<8x8x1xf32>
    %78 = vector.broadcast %77 : vector<8x8x1xf32> to vector<8x8x8xf32>
    %79 = arith.mulf %74, %78 : vector<8x8x8xf32>
    %80 = arith.truncf %79 : vector<8x8x8xf32> to vector<8x8x8xbf16>
    "tpu.trace_start"() <{level = 10 : i32, message = "gts,gsd->gtd"}> : () -> ()
    %cst_36 = arith.constant dense<0.000000e+00> : vector<8x8x8xf32>
    %81 = tpu.matmul %80, %65, %cst_36 {dimension_numbers = #tpu.dot_dimension_numbers<[2], [1], [1], [2], [0, 0, 0, 1, 1, 2], [0], [0]>} : vector<8x8x8xbf16>, vector<8x8x8xbf16>, vector<8x8x8xf32> -> vector<8x8x8xf32>
    "tpu.trace_stop"() : () -> ()
    %82 = vector.shape_cast %81 : vector<8x8x8xf32> to vector<2x4x8x8xf32>
    %83 = tpu.transpose %82, [0, 2, 1, 3] : vector<2x4x8x8xf32> -> vector<2x8x4x8xf32>
    %84 = vector.shape_cast %83 : vector<2x8x4x8xf32> to vector<16x32xf32>
    %85 = arith.truncf %84 : vector<16x32xf32> to vector<16x32xbf16>
    %cst_37 = arith.constant dense<0.000000e+00> : vector<16x32xf32>
    %86 = tpu.matmul %85, %13, %cst_37 {dimension_numbers = #tpu.dot_dimension_numbers<[1], [0], [0], [1], [0, 0, 1, 1], [], []>} : vector<16x32xbf16>, vector<32x32xbf16>, vector<16x32xf32> -> vector<16x32xf32>
    %87 = arith.addf %0, %86 : vector<16x32xf32>
    %88 = arith.addf %87, %20 : vector<16x32xf32>
    %cst_38 = arith.constant dense<0.000000e+00> : vector<16xf32>
    %89 = vector.multi_reduction <add>, %88, %cst_38 [1] : vector<16x32xf32> to vector<16xf32>
    %90 = vector.shape_cast %89 : vector<16xf32> to vector<16x1xf32>
    %cst_39 = arith.constant 3.200000e+01 : f32
    %91 = vector.broadcast %cst_39 : f32 to vector<16x1xf32>
    %92 = arith.divf %90, %91 : vector<16x1xf32>
    %93 = vector.broadcast %92 : vector<16x1xf32> to vector<16x32xf32>
    %94 = arith.subf %88, %93 : vector<16x32xf32>
    %95 = arith.mulf %94, %94 : vector<16x32xf32>
    %cst_40 = arith.constant dense<0.000000e+00> : vector<16xf32>
    %96 = vector.multi_reduction <add>, %95, %cst_40 [1] : vector<16x32xf32> to vector<16xf32>
    %97 = vector.shape_cast %96 : vector<16xf32> to vector<16x1xf32>
    %cst_41 = arith.constant 3.200000e+01 : f32
    %98 = vector.broadcast %cst_41 : f32 to vector<16x1xf32>
    %99 = arith.divf %97, %98 : vector<16x1xf32>
    %100 = vector.broadcast %92 : vector<16x1xf32> to vector<16x32xf32>
    %101 = arith.subf %88, %100 : vector<16x32xf32>
    %cst_42 = arith.constant 9.99999974E-6 : f32
    %102 = vector.broadcast %cst_42 : f32 to vector<16x1xf32>
    %103 = arith.addf %99, %102 : vector<16x1xf32>
    %104 = math.rsqrt %103 : vector<16x1xf32>
    %105 = vector.broadcast %104 : vector<16x1xf32> to vector<16x32xf32>
    %106 = arith.mulf %101, %105 : vector<16x32xf32>
    %107 = arith.mulf %106, %22 : vector<16x32xf32>
    %108 = arith.addf %107, %24 : vector<16x32xf32>
    %109 = arith.truncf %108 : vector<16x32xf32> to vector<16x32xbf16>
    %cst_43 = arith.constant dense<0.000000e+00> : vector<16x128xf32>
    %110 = tpu.matmul %109, %10, %cst_43 {dimension_numbers = #tpu.dot_dimension_numbers<[1], [0], [0], [1], [0, 0, 1, 1], [], []>} : vector<16x32xbf16>, vector<32x128xbf16>, vector<16x128xf32> -> vector<16x128xf32>
    %111 = arith.addf %110, %28 : vector<16x128xf32>
    %cst_44 = arith.constant 5.000000e-01 : f32
    %112 = vector.broadcast %cst_44 : f32 to vector<16x128xf32>
    %113 = arith.mulf %112, %111 : vector<16x128xf32>
    %cst_45 = arith.constant 0.707106769 : f32
    %114 = vector.broadcast %cst_45 : f32 to vector<16x128xf32>
    %115 = arith.mulf %111, %114 : vector<16x128xf32>
    %116 = math.erf %115 : vector<16x128xf32>
    %cst_46 = arith.constant 1.000000e+00 : f32
    %117 = vector.broadcast %cst_46 : f32 to vector<16x128xf32>
    %118 = arith.addf %117, %116 : vector<16x128xf32>
    %119 = arith.mulf %113, %118 : vector<16x128xf32>
    %120 = arith.truncf %119 : vector<16x128xf32> to vector<16x128xbf16>
    %cst_47 = arith.constant dense<0.000000e+00> : vector<16x32xf32>
    %121 = tpu.matmul %120, %14, %cst_47 {dimension_numbers = #tpu.dot_dimension_numbers<[1], [0], [0], [1], [0, 0, 1, 1], [], []>} : vector<16x128xbf16>, vector<128x32xbf16>, vector<16x32xf32> -> vector<16x32xf32>
    %122 = arith.addf %121, %26 : vector<16x32xf32>
    %123 = arith.addf %88, %122 : vector<16x32xf32>
    %c2_48 = arith.constant 2 : index
    %c0_49 = arith.constant 0 : index
    %c0_50 = arith.constant 0 : index
    %124 = vector.load %arg2[%c2_48, %c0_49, %c0_50] : memref<5x32x128xbf16, #tpu.memory_space<vmem>>, vector<1x32x128xbf16>
    %125 = vector.shape_cast %124 : vector<1x32x128xbf16> to vector<32x128xbf16>
    %c3_51 = arith.constant 3 : index
    %c0_52 = arith.constant 0 : index
    %c0_53 = arith.constant 0 : index
    %126 = vector.load %arg2[%c3_51, %c0_52, %c0_53] : memref<5x32x128xbf16, #tpu.memory_space<vmem>>, vector<1x32x128xbf16>
    %127 = vector.shape_cast %126 : vector<1x32x128xbf16> to vector<32x128xbf16>
    %c1_54 = arith.constant 1 : index
    %c0_55 = arith.constant 0 : index
    %c0_56 = arith.constant 0 : index
    %128 = vector.load %arg3[%c1_54, %c0_55, %c0_56] : memref<2x160x32xbf16, #tpu.memory_space<vmem>>, vector<1x160x32xbf16>
    %129 = vector.shape_cast %128 : vector<1x160x32xbf16> to vector<160x32xbf16>
    %130 = vector.extract_strided_slice %129 {offsets = [0, 0], sizes = [32, 32], strides = [1, 1]} : vector<160x32xbf16> to vector<32x32xbf16>
    %131 = vector.extract_strided_slice %129 {offsets = [32, 0], sizes = [128, 32], strides = [1, 1]} : vector<160x32xbf16> to vector<128x32xbf16>
    %c6 = arith.constant 6 : index
    %c0_57 = arith.constant 0 : index
    %c0_58 = arith.constant 0 : index
    %132 = vector.load %arg4[%c6, %c0_57, %c0_58] : memref<14x16x32xf32, #tpu.memory_space<vmem>>, vector<1x16x32xf32>
    %133 = vector.shape_cast %132 : vector<1x16x32xf32> to vector<16x32xf32>
    %c7 = arith.constant 7 : index
    %c0_59 = arith.constant 0 : index
    %c0_60 = arith.constant 0 : index
    %134 = vector.load %arg4[%c7, %c0_59, %c0_60] : memref<14x16x32xf32, #tpu.memory_space<vmem>>, vector<1x16x32xf32>
    %135 = vector.shape_cast %134 : vector<1x16x32xf32> to vector<16x32xf32>
    %c8 = arith.constant 8 : index
    %c0_61 = arith.constant 0 : index
    %c0_62 = arith.constant 0 : index
    %136 = vector.load %arg4[%c8, %c0_61, %c0_62] : memref<14x16x32xf32, #tpu.memory_space<vmem>>, vector<1x16x32xf32>
    %137 = vector.shape_cast %136 : vector<1x16x32xf32> to vector<16x32xf32>
    %c9 = arith.constant 9 : index
    %c0_63 = arith.constant 0 : index
    %c0_64 = arith.constant 0 : index
    %138 = vector.load %arg4[%c9, %c0_63, %c0_64] : memref<14x16x32xf32, #tpu.memory_space<vmem>>, vector<1x16x32xf32>
    %139 = vector.shape_cast %138 : vector<1x16x32xf32> to vector<16x32xf32>
    %c10 = arith.constant 10 : index
    %c0_65 = arith.constant 0 : index
    %c0_66 = arith.constant 0 : index
    %140 = vector.load %arg4[%c10, %c0_65, %c0_66] : memref<14x16x32xf32, #tpu.memory_space<vmem>>, vector<1x16x32xf32>
    %141 = vector.shape_cast %140 : vector<1x16x32xf32> to vector<16x32xf32>
    %c11 = arith.constant 11 : index
    %c0_67 = arith.constant 0 : index
    %c0_68 = arith.constant 0 : index
    %142 = vector.load %arg4[%c11, %c0_67, %c0_68] : memref<14x16x32xf32, #tpu.memory_space<vmem>>, vector<1x16x32xf32>
    %143 = vector.shape_cast %142 : vector<1x16x32xf32> to vector<16x32xf32>
    %c1_69 = arith.constant 1 : index
    %c0_70 = arith.constant 0 : index
    %c0_71 = arith.constant 0 : index
    %144 = vector.load %arg5[%c1_69, %c0_70, %c0_71] : memref<3x16x128xf32, #tpu.memory_space<vmem>>, vector<1x16x128xf32>
    %145 = vector.shape_cast %144 : vector<1x16x128xf32> to vector<16x128xf32>
    %cst_72 = arith.constant dense<0.000000e+00> : vector<16xf32>
    %146 = vector.multi_reduction <add>, %123, %cst_72 [1] : vector<16x32xf32> to vector<16xf32>
    %147 = vector.shape_cast %146 : vector<16xf32> to vector<16x1xf32>
    %cst_73 = arith.constant 3.200000e+01 : f32
    %148 = vector.broadcast %cst_73 : f32 to vector<16x1xf32>
    %149 = arith.divf %147, %148 : vector<16x1xf32>
    %150 = vector.broadcast %149 : vector<16x1xf32> to vector<16x32xf32>
    %151 = arith.subf %123, %150 : vector<16x32xf32>
    %152 = arith.mulf %151, %151 : vector<16x32xf32>
    %cst_74 = arith.constant dense<0.000000e+00> : vector<16xf32>
    %153 = vector.multi_reduction <add>, %152, %cst_74 [1] : vector<16x32xf32> to vector<16xf32>
    %154 = vector.shape_cast %153 : vector<16xf32> to vector<16x1xf32>
    %cst_75 = arith.constant 3.200000e+01 : f32
    %155 = vector.broadcast %cst_75 : f32 to vector<16x1xf32>
    %156 = arith.divf %154, %155 : vector<16x1xf32>
    %157 = vector.broadcast %149 : vector<16x1xf32> to vector<16x32xf32>
    %158 = arith.subf %123, %157 : vector<16x32xf32>
    %cst_76 = arith.constant 9.99999974E-6 : f32
    %159 = vector.broadcast %cst_76 : f32 to vector<16x1xf32>
    %160 = arith.addf %156, %159 : vector<16x1xf32>
    %161 = math.rsqrt %160 : vector<16x1xf32>
    %162 = vector.broadcast %161 : vector<16x1xf32> to vector<16x32xf32>
    %163 = arith.mulf %158, %162 : vector<16x32xf32>
    %164 = arith.mulf %163, %133 : vector<16x32xf32>
    %165 = arith.addf %164, %135 : vector<16x32xf32>
    %166 = arith.truncf %165 : vector<16x32xf32> to vector<16x32xbf16>
    %cst_77 = arith.constant dense<0.000000e+00> : vector<16x128xf32>
    %167 = tpu.matmul %166, %125, %cst_77 {dimension_numbers = #tpu.dot_dimension_numbers<[1], [0], [0], [1], [0, 0, 1, 1], [], []>} : vector<16x32xbf16>, vector<32x128xbf16>, vector<16x128xf32> -> vector<16x128xf32>
    %168 = vector.extract_strided_slice %167 {offsets = [0, 0], sizes = [16, 32], strides = [1, 1]} : vector<16x128xf32> to vector<16x32xf32>
    %169 = vector.shape_cast %168 : vector<16x32xf32> to vector<2x8x4x8xf32>
    %170 = tpu.transpose %169, [0, 2, 1, 3] : vector<2x8x4x8xf32> -> vector<2x4x8x8xf32>
    %171 = vector.shape_cast %170 : vector<2x4x8x8xf32> to vector<8x8x8xf32>
    %172 = arith.truncf %171 : vector<8x8x8xf32> to vector<8x8x8xbf16>
    %173 = vector.extract_strided_slice %167 {offsets = [0, 32], sizes = [16, 32], strides = [1, 1]} : vector<16x128xf32> to vector<16x32xf32>
    %174 = vector.shape_cast %173 : vector<16x32xf32> to vector<2x8x4x8xf32>
    %175 = tpu.transpose %174, [0, 2, 1, 3] : vector<2x8x4x8xf32> -> vector<2x4x8x8xf32>
    %176 = vector.shape_cast %175 : vector<2x4x8x8xf32> to vector<8x8x8xf32>
    %177 = arith.truncf %176 : vector<8x8x8xf32> to vector<8x8x8xbf16>
    %178 = vector.extract_strided_slice %167 {offsets = [0, 64], sizes = [16, 32], strides = [1, 1]} : vector<16x128xf32> to vector<16x32xf32>
    %179 = vector.shape_cast %178 : vector<16x32xf32> to vector<2x8x4x8xf32>
    %180 = tpu.transpose %179, [0, 2, 1, 3] : vector<2x8x4x8xf32> -> vector<2x4x8x8xf32>
    %181 = vector.shape_cast %180 : vector<2x4x8x8xf32> to vector<8x8x8xf32>
    %182 = arith.truncf %181 : vector<8x8x8xf32> to vector<8x8x8xbf16>
    "tpu.trace_start"() <{level = 10 : i32, message = "gtd,gsd->gts"}> : () -> ()
    %cst_78 = arith.constant dense<0.000000e+00> : vector<8x8x8xf32>
    %183 = tpu.matmul %172, %177, %cst_78 {dimension_numbers = #tpu.dot_dimension_numbers<[2], [2], [1], [1], [0, 0, 0, 1, 1, 1], [0], [0]>} : vector<8x8x8xbf16>, vector<8x8x8xbf16>, vector<8x8x8xf32> -> vector<8x8x8xf32>
    "tpu.trace_stop"() : () -> ()
    %184 = vector.shape_cast %6 : vector<8x8xf32> to vector<1x8x8xf32>
    %185 = vector.broadcast %184 : vector<1x8x8xf32> to vector<8x8x8xf32>
    %186 = arith.addf %183, %185 : vector<8x8x8xf32>
    %cst_79 = arith.constant dense<0xFF800000> : vector<8x8xf32>
    %187 = vector.multi_reduction <maximumf>, %186, %cst_79 [2] : vector<8x8x8xf32> to vector<8x8xf32>
    %188 = vector.shape_cast %187 : vector<8x8xf32> to vector<8x8x1xf32>
    %189 = vector.broadcast %188 : vector<8x8x1xf32> to vector<8x8x8xf32>
    %190 = arith.subf %186, %189 : vector<8x8x8xf32>
    %191 = math.exp %190 : vector<8x8x8xf32>
    %cst_80 = arith.constant dense<0.000000e+00> : vector<8x8xf32>
    %192 = vector.multi_reduction <add>, %191, %cst_80 [2] : vector<8x8x8xf32> to vector<8x8xf32>
    %193 = vector.shape_cast %192 : vector<8x8xf32> to vector<8x8x1xf32>
    %194 = tpu.reciprocal %193 {approx = true} : vector<8x8x1xf32> -> vector<8x8x1xf32>
    %195 = vector.broadcast %194 : vector<8x8x1xf32> to vector<8x8x8xf32>
    %196 = arith.mulf %191, %195 : vector<8x8x8xf32>
    %197 = arith.truncf %196 : vector<8x8x8xf32> to vector<8x8x8xbf16>
    "tpu.trace_start"() <{level = 10 : i32, message = "gts,gsd->gtd"}> : () -> ()
    %cst_81 = arith.constant dense<0.000000e+00> : vector<8x8x8xf32>
    %198 = tpu.matmul %197, %182, %cst_81 {dimension_numbers = #tpu.dot_dimension_numbers<[2], [1], [1], [2], [0, 0, 0, 1, 1, 2], [0], [0]>} : vector<8x8x8xbf16>, vector<8x8x8xbf16>, vector<8x8x8xf32> -> vector<8x8x8xf32>
    "tpu.trace_stop"() : () -> ()
    %199 = vector.shape_cast %198 : vector<8x8x8xf32> to vector<2x4x8x8xf32>
    %200 = tpu.transpose %199, [0, 2, 1, 3] : vector<2x4x8x8xf32> -> vector<2x8x4x8xf32>
    %201 = vector.shape_cast %200 : vector<2x8x4x8xf32> to vector<16x32xf32>
    %202 = arith.truncf %201 : vector<16x32xf32> to vector<16x32xbf16>
    %cst_82 = arith.constant dense<0.000000e+00> : vector<16x32xf32>
    %203 = tpu.matmul %202, %130, %cst_82 {dimension_numbers = #tpu.dot_dimension_numbers<[1], [0], [0], [1], [0, 0, 1, 1], [], []>} : vector<16x32xbf16>, vector<32x32xbf16>, vector<16x32xf32> -> vector<16x32xf32>
    %204 = arith.addf %123, %203 : vector<16x32xf32>
    %205 = arith.addf %204, %137 : vector<16x32xf32>
    %cst_83 = arith.constant dense<0.000000e+00> : vector<16xf32>
    %206 = vector.multi_reduction <add>, %205, %cst_83 [1] : vector<16x32xf32> to vector<16xf32>
    %207 = vector.shape_cast %206 : vector<16xf32> to vector<16x1xf32>
    %cst_84 = arith.constant 3.200000e+01 : f32
    %208 = vector.broadcast %cst_84 : f32 to vector<16x1xf32>
    %209 = arith.divf %207, %208 : vector<16x1xf32>
    %210 = vector.broadcast %209 : vector<16x1xf32> to vector<16x32xf32>
    %211 = arith.subf %205, %210 : vector<16x32xf32>
    %212 = arith.mulf %211, %211 : vector<16x32xf32>
    %cst_85 = arith.constant dense<0.000000e+00> : vector<16xf32>
    %213 = vector.multi_reduction <add>, %212, %cst_85 [1] : vector<16x32xf32> to vector<16xf32>
    %214 = vector.shape_cast %213 : vector<16xf32> to vector<16x1xf32>
    %cst_86 = arith.constant 3.200000e+01 : f32
    %215 = vector.broadcast %cst_86 : f32 to vector<16x1xf32>
    %216 = arith.divf %214, %215 : vector<16x1xf32>
    %217 = vector.broadcast %209 : vector<16x1xf32> to vector<16x32xf32>
    %218 = arith.subf %205, %217 : vector<16x32xf32>
    %cst_87 = arith.constant 9.99999974E-6 : f32
    %219 = vector.broadcast %cst_87 : f32 to vector<16x1xf32>
    %220 = arith.addf %216, %219 : vector<16x1xf32>
    %221 = math.rsqrt %220 : vector<16x1xf32>
    %222 = vector.broadcast %221 : vector<16x1xf32> to vector<16x32xf32>
    %223 = arith.mulf %218, %222 : vector<16x32xf32>
    %224 = arith.mulf %223, %139 : vector<16x32xf32>
    %225 = arith.addf %224, %141 : vector<16x32xf32>
    %226 = arith.truncf %225 : vector<16x32xf32> to vector<16x32xbf16>
    %cst_88 = arith.constant dense<0.000000e+00> : vector<16x128xf32>
    %227 = tpu.matmul %226, %127, %cst_88 {dimension_numbers = #tpu.dot_dimension_numbers<[1], [0], [0], [1], [0, 0, 1, 1], [], []>} : vector<16x32xbf16>, vector<32x128xbf16>, vector<16x128xf32> -> vector<16x128xf32>
    %228 = arith.addf %227, %145 : vector<16x128xf32>
    %cst_89 = arith.constant 5.000000e-01 : f32
    %229 = vector.broadcast %cst_89 : f32 to vector<16x128xf32>
    %230 = arith.mulf %229, %228 : vector<16x128xf32>
    %cst_90 = arith.constant 0.707106769 : f32
    %231 = vector.broadcast %cst_90 : f32 to vector<16x128xf32>
    %232 = arith.mulf %228, %231 : vector<16x128xf32>
    %233 = math.erf %232 : vector<16x128xf32>
    %cst_91 = arith.constant 1.000000e+00 : f32
    %234 = vector.broadcast %cst_91 : f32 to vector<16x128xf32>
    %235 = arith.addf %234, %233 : vector<16x128xf32>
    %236 = arith.mulf %230, %235 : vector<16x128xf32>
    %237 = arith.truncf %236 : vector<16x128xf32> to vector<16x128xbf16>
    %cst_92 = arith.constant dense<0.000000e+00> : vector<16x32xf32>
    %238 = tpu.matmul %237, %131, %cst_92 {dimension_numbers = #tpu.dot_dimension_numbers<[1], [0], [0], [1], [0, 0, 1, 1], [], []>} : vector<16x128xbf16>, vector<128x32xbf16>, vector<16x32xf32> -> vector<16x32xf32>
    %239 = arith.addf %238, %143 : vector<16x32xf32>
    %240 = arith.addf %205, %239 : vector<16x32xf32>
    %c12 = arith.constant 12 : index
    %c0_93 = arith.constant 0 : index
    %c0_94 = arith.constant 0 : index
    %241 = vector.load %arg4[%c12, %c0_93, %c0_94] : memref<14x16x32xf32, #tpu.memory_space<vmem>>, vector<1x16x32xf32>
    %242 = vector.shape_cast %241 : vector<1x16x32xf32> to vector<16x32xf32>
    %c13 = arith.constant 13 : index
    %c0_95 = arith.constant 0 : index
    %c0_96 = arith.constant 0 : index
    %243 = vector.load %arg4[%c13, %c0_95, %c0_96] : memref<14x16x32xf32, #tpu.memory_space<vmem>>, vector<1x16x32xf32>
    %244 = vector.shape_cast %243 : vector<1x16x32xf32> to vector<16x32xf32>
    %c2_97 = arith.constant 2 : index
    %c0_98 = arith.constant 0 : index
    %c0_99 = arith.constant 0 : index
    %245 = vector.load %arg5[%c2_97, %c0_98, %c0_99] : memref<3x16x128xf32, #tpu.memory_space<vmem>>, vector<1x16x128xf32>
    %246 = vector.shape_cast %245 : vector<1x16x128xf32> to vector<16x128xf32>
    %c4_100 = arith.constant 4 : index
    %c0_101 = arith.constant 0 : index
    %c0_102 = arith.constant 0 : index
    %247 = vector.load %arg2[%c4_100, %c0_101, %c0_102] : memref<5x32x128xbf16, #tpu.memory_space<vmem>>, vector<1x32x128xbf16>
    %248 = vector.shape_cast %247 : vector<1x32x128xbf16> to vector<32x128xbf16>
    %cst_103 = arith.constant dense<0.000000e+00> : vector<16xf32>
    %249 = vector.multi_reduction <add>, %240, %cst_103 [1] : vector<16x32xf32> to vector<16xf32>
    %250 = vector.shape_cast %249 : vector<16xf32> to vector<16x1xf32>
    %cst_104 = arith.constant 3.200000e+01 : f32
    %251 = vector.broadcast %cst_104 : f32 to vector<16x1xf32>
    %252 = arith.divf %250, %251 : vector<16x1xf32>
    %253 = vector.broadcast %252 : vector<16x1xf32> to vector<16x32xf32>
    %254 = arith.subf %240, %253 : vector<16x32xf32>
    %255 = arith.mulf %254, %254 : vector<16x32xf32>
    %cst_105 = arith.constant dense<0.000000e+00> : vector<16xf32>
    %256 = vector.multi_reduction <add>, %255, %cst_105 [1] : vector<16x32xf32> to vector<16xf32>
    %257 = vector.shape_cast %256 : vector<16xf32> to vector<16x1xf32>
    %cst_106 = arith.constant 3.200000e+01 : f32
    %258 = vector.broadcast %cst_106 : f32 to vector<16x1xf32>
    %259 = arith.divf %257, %258 : vector<16x1xf32>
    %260 = vector.broadcast %252 : vector<16x1xf32> to vector<16x32xf32>
    %261 = arith.subf %240, %260 : vector<16x32xf32>
    %cst_107 = arith.constant 9.99999974E-6 : f32
    %262 = vector.broadcast %cst_107 : f32 to vector<16x1xf32>
    %263 = arith.addf %259, %262 : vector<16x1xf32>
    %264 = math.rsqrt %263 : vector<16x1xf32>
    %265 = vector.broadcast %264 : vector<16x1xf32> to vector<16x32xf32>
    %266 = arith.mulf %261, %265 : vector<16x32xf32>
    %267 = arith.mulf %266, %242 : vector<16x32xf32>
    %268 = arith.addf %267, %244 : vector<16x32xf32>
    %269 = arith.truncf %268 : vector<16x32xf32> to vector<16x32xbf16>
    %cst_108 = arith.constant dense<0.000000e+00> : vector<16x128xf32>
    %270 = tpu.matmul %269, %248, %cst_108 {dimension_numbers = #tpu.dot_dimension_numbers<[1], [0], [0], [1], [0, 0, 1, 1], [], []>} : vector<16x32xbf16>, vector<32x128xbf16>, vector<16x128xf32> -> vector<16x128xf32>
    %271 = arith.addf %270, %246 : vector<16x128xf32>
    %c0_109 = arith.constant 0 : index
    %c0_110 = arith.constant 0 : index
    %272 = vector.load %arg6[%c0_109, %c0_110] : memref<16x128xf32, #tpu.memory_space<vmem>>, vector<16x128xf32>
    tpu.vector_store %arg6[%c0_109, %c0_110], %271 {strides = array<i32>} : memref<16x128xf32, #tpu.memory_space<vmem>>, vector<16x128xf32>,
    return
  }
  func.func @transform_0(%arg0: i32) -> (i32, i32) {
    %c0_i32 = arith.constant 0 : i32
    %c0_i32_0 = arith.constant 0 : i32
    %c0_i32_1 = arith.constant 0 : i32
    return %c0_i32, %c0_i32_0 : i32, i32
  }
  func.func @transform_1(%arg0: i32) -> (i32, i32, i32) {
    %c0_i32 = arith.constant 0 : i32
    %c0_i32_0 = arith.constant 0 : i32
    %c0_i32_1 = arith.constant 0 : i32
    %c0_i32_2 = arith.constant 0 : i32
    return %c0_i32, %c0_i32_0, %c0_i32_1 : i32, i32, i32
  }
  func.func @transform_2(%arg0: i32) -> (i32, i32, i32) {
    %c0_i32 = arith.constant 0 : i32
    %c0_i32_0 = arith.constant 0 : i32
    %c0_i32_1 = arith.constant 0 : i32
    %c0_i32_2 = arith.constant 0 : i32
    return %c0_i32, %c0_i32_0, %c0_i32_1 : i32, i32, i32
  }
  func.func @transform_3(%arg0: i32) -> (i32, i32, i32) {
    %c0_i32 = arith.constant 0 : i32
    %c0_i32_0 = arith.constant 0 : i32
    %c0_i32_1 = arith.constant 0 : i32
    %c0_i32_2 = arith.constant 0 : i32
    return %c0_i32, %c0_i32_0, %c0_i32_1 : i32, i32, i32
  }
  func.func @transform_4(%arg0: i32) -> (i32, i32, i32) {
    %c0_i32 = arith.constant 0 : i32
    %c0_i32_0 = arith.constant 0 : i32
    %c0_i32_1 = arith.constant 0 : i32
    %c0_i32_2 = arith.constant 0 : i32
    return %c0_i32, %c0_i32_0, %c0_i32_1 : i32, i32, i32
  }
  func.func @transform_5(%arg0: i32) -> (i32, i32) {
    %c0_i32 = arith.constant 0 : i32
    %c0_i32_0 = arith.constant 0 : i32
    %c0_i32_1 = arith.constant 0 : i32
    return %c0_i32, %c0_i32_0 : i32, i32
  }
}

</mosaic_0001>

<bundles_post_ra>
// kernel: transformer_forward.1
= control target key start
LH: loop header
LB: loop body
LE: loop exit
PB: predicated region body
PF: predicated region fallthrough
CT: control target
= control target key end

     0   :  { %vm78_vm0 = vcmask 261120   ;;  %s6968_s0 = inlined_call_operand.vmem [shape: f32[16,32], index: 0, kind: input, shape index: {}]   ;;  %s6969_s1 = inlined_call_operand.vmem [shape: bf16[5,32,128], index: 1, kind: input, shape index: {}]   ;;  %s6970_s2 = inlined_call_operand.vmem [shape: bf16[2,160,32], index: 2, kind: input, shape index: {}]   ;;  %s6971_s3 = inlined_call_operand.vmem [shape: f32[14,16,32], index: 3, kind: input, shape index: {}]   ;;  %s6972_s4 = inlined_call_operand.vmem [shape: f32[3,16,128], index: 4, kind: input, shape index: {}]   ;;  %s6973_s5 = inlined_call_operand.hbm [shape: f32[16,128], index: 5, kind: output, shape index: {}]  }
   0x1   :  { %v22_v0 = vld [vmem:[%s6968_s0] sm:$0xff]  ;;  %v23_v1 = vld [vmem:[%s6968_s0 + $0x8] sm:$0xff] }
   0x2   :  { %v79_v2 = vsel %vm78_vm0, %v22_v0, 0.0  ;;  %v82_v3 = vsel %vm78_vm0, %v23_v1, 0.0 }
   0x3   :  { %80 = vadd.xlane.f32.xlu0 %v79_v2 }
   0x7   :  { %83 = vadd.xlane.f32.xlu0 %v82_v3 }
   0x8   :  { %10 = vsyncpa [#allocation3], 0  ;;  %v5616_v14 = vld [vmem:[%s6969_s1] sm:$0xff]   ;;  %v5764_v15 = vmov 0.0   ;;  %vm5765_vm1 = vmmov 0   ;;  %v5617_v16 = vld [vmem:[%s6969_s1 + $0x8] sm:$0xff]   ;;  %v24_v46 = vlaneseq }
   0x9   :  { %5283 = vmatprep.subr.bf16.mxu1 %v5764_v15  ;;  %5287 = vmatprep.mubr.msk.bf16.mxu1 %vm5765_vm1, %v5764_v15  ;;  %v59_v25 = vld [vmem:[%s6971_s3] sm:$0xff]  ;;  %v60_v27 = vld [vmem:[%s6971_s3 + $0x8] sm:$0xff]  ;;  %v5017_v30 = vld [vmem:[%s6971_s3 + $0x10] sm:$0xff]  ;;  %s5766_s9 = smov 112   ;;  %s5767_s10 = smov 120   ;;  %vm1075_vm2 = vcmask 64512  }
   0xa   :  { %5284 = vmatpush3.bf16.msra.mxu1 %v5616_v14  ;;  %5297 = vmatprep.subr.bf16.mxu0 %v5764_v15  ;;  %v5018_v31 = vld [vmem:[%s6971_s3 + $0x18] sm:$0xff]  ;;  %s5768_s11 = smov 104   ;;  %s5769_s12 = smov 96   ;;  %v5770_v47 = vmov 1983009808   ;;  %v5893_v49 = vshrl.u32 %v24_v46, 7 }
   0xb   :  { %5285 = vmatprep.subr.bf16.mxu1 %v5764_v15  ;;  %5299 = vmatprep.mubr.msk.bf16.mxu0 %vm5765_vm1, %v5764_v15  ;;  %v190_v48 = vunpack.c.l.s4 %v5770_v47  ;;  %v5771_v51 = vmov 1934713408   ;;  %s5773_s13 = smov 64   ;;  %vm1543_vm4 = vcmask 1043456   ;;  %s5774_s18 = smov 16   ;;  %vm2207_vm5 = vcmask 130048  }
   0xc   :  { %v222_v52 = vunpack.c.l.s4 %v5771_v51  ;;  %s5775_s19 = smov 8   ;;  %s5776_s20 = smov 24   ;;  %vm2210_vm6 = vcmask 195584  }
   0xd   :  { %v191_v50 = vunpack.c.0.s8 %v190_v48  ;;  %s5777_s24 = smov [#allocation2]  }
   0xe   :  { %5286 = vmatpush3.bf16.msra.mxu1 %v5617_v16  ;;  %v223_v58 = vunpack.c.0.s8 %v222_v52  ;;  %s5002_s25 = sshll.u32 %s5777_s24, 4  ;;  %s5003_s25 = int_to_ptr.vmem [resolvable:$true] %s5002_s25 }
   0xf   :  { %5291 = vmatprep.subr.bf16.mxu1 %v5764_v15  ;;  %v5900_v55 = vsub.s32 %v191_v50, %v5893_v49  ;;  %p5745_p1 = scmp.lt.s32.totalorder %s5003_s25, %s5003_s25 }
  0x10   :  { %v5911_v63 = vsub.s32 %v223_v58, %v5893_v49 }
  0x90   :  { %v81_v4 = vpop.xlane.xlu0 %80 }
  0x91   :  { %v86_v5 = vmul.f32 0.03125, %v81_v4 }
  0x93   :  { %v88_v6 = vsub.f32 %v22_v0, %v86_v5 }
  0x94   :  { %v84_v7 = vpop.xlane.xlu0 %83 }
  0x95   :  { %v87_v8 = vmul.f32 0.03125, %v84_v7  ;;  %v90_v9 = vmul.f32 %v88_v6, %v88_v6 }
  0x97   :  { %v89_v10 = vsub.f32 %v23_v1, %v87_v8  ;;  %v92_v11 = vsel %vm78_vm0, %v90_v9, 0.0 }
  0x98   :  { %93 = vadd.xlane.f32.xlu1 %v92_v11 }
  0x99   :  { %v91_v12 = vmul.f32 %v89_v10, %v89_v10 }
  0x9b   :  { %v95_v13 = vsel %vm78_vm0, %v91_v12, 0.0 }
  0x9c   :  { %96 = vadd.xlane.f32.xlu1 %v95_v13 }
 0x125   :  { %v94_v17 = vpop.xlane.xlu1 %93 }
 0x126   :  { %v98_v18 = vmul.f32 0.03125, %v94_v17 }
 0x128   :  { %v100_v19 = vadd.f32 1e-05, %v98_v18 }
 0x129   :  { %v97_v20 = vpop.xlane.xlu1 %96 }
 0x12a   :  { %5646 = vrsqrt.f32 %v100_v19  ;;  %v99_v21 = vmul.f32 0.03125, %v97_v20 }
 0x12c   :  { %v101_v22 = vadd.f32 1e-05, %v99_v21 }
 0x12e   :  { %5648 = vrsqrt.f32 %v101_v22 }
 0x134   :  { %v5647_v23 = vpop.eup %5646 }
 0x135   :  { %v104_v24 = vmul.f32 %v5647_v23, %v88_v6 }
 0x137   :  { %v106_v29 = vmul.f32 %v104_v24, %v59_v25 }
 0x138   :  { %v5649_v26 = vpop.eup %5648 }
 0x139   :  { %v105_v28 = vmul.f32 %v5649_v26, %v89_v10  ;;  %v108_v33 = vadd.f32 %v5017_v30, %v106_v29 }
 0x13b   :  { %v107_v32 = vmul.f32 %v105_v28, %v60_v27 }
 0x13d   :  { %v109_v34 = vadd.f32 %v5018_v31, %v107_v32 }
 0x13f   :  { %v110_v35 = vpack.c.bf16 %v109_v34, %v108_v33 }
 0x141   :  { %5288 = vmatmul.mubr.msk.bf16.vlgmr.msra.gmra.mrb[0].mxu1 %vm78_vm0, %v110_v35 }
 0x142   :  { %5293 = vmatprep.mubr.msk.bf16.mxu1 %vm5765_vm1, %v5764_v15 }
 0x214   :  { %v5848_v36 = vpop.f32.mrb[0].mxu1 }
 0x215   :  { %175 = vrot.lane.b32.xlu1 %v5848_v36, %s5766_s9  ;;  %169 = vrot.lane.b32.xlu0 %v5848_v36, %s5767_s10  ;;  %v5289_v37 = vpop.f32.mrb[1].mxu1 }
 0x216   :  { %v5854_v38 = vpop.f32.mrb[2].mxu1 }
 0x217   :  { %v5290_v39 = vpop.f32.mrb[3].mxu1 }
 0x219   :  { %181 = vrot.lane.b32.xlu1 %v5848_v36, %s5768_s11  ;;  %177 = vrot.lane.b32.xlu0 %v5854_v38, %s5766_s9 }
 0x21d   :  { %467 = vrot.lane.b32.xlu0 %v5848_v36, %s5769_s12  ;;  %171 = vrot.lane.b32.xlu1 %v5854_v38, %s5767_s10 }
 0x221   :  { %183 = vrot.lane.b32.xlu1 %v5854_v38, %s5768_s11 }
 0x287   :  { %v5866_v40 = vpop.permute.xlu1 %175  ;;  %v5868_v41 = vpop.permute.xlu0 %169 }
 0x288   :  { %475 = vrot.lane.b32.xlu0 %v5866_v40, %s5769_s12  ;;  %471 = vrot.lane.b32.xlu1 %v5868_v41, %s5769_s12  ;;  %v187_v56 = vcombine.low %v5848_v36, %v5866_v40  ;;  %v188_v57 = vcombine.high %v5848_v36, %v5866_v40 }
 0x28a   :  { %v195_v61 = vrot.slane %v187_v56, %v5900_v55  ;;  %v202_v62 = vrot.slane %v188_v57, %v5900_v55 }
 0x28b   :  { %v5874_v42 = vpop.permute.xlu1 %181  ;;  %v5880_v43 = vpop.permute.xlu0 %177 }
 0x28c   :  { %469 = vrot.lane.b32.xlu0 %v5854_v38, %s5769_s12  ;;  %479 = vrot.lane.b32.xlu1 %v5874_v42, %s5769_s12  ;;  %v203_v53 = vcombine.low %v5868_v41, %v5874_v42  ;;  %v204_v54 = vcombine.high %v5868_v41, %v5874_v42  ;;  %v255_v16 = vcombine.low %v5854_v38, %v5880_v43 }
 0x28d   :  { %v256_v17 = vcombine.high %v5854_v38, %v5880_v43 }
 0x28e   :  { %v211_v59 = vrot.slane %v203_v53, %v5900_v55  ;;  %v218_v60 = vrot.slane %v204_v54, %v5900_v55  ;;  %v263_v30 = vrot.slane %v255_v16, %v5900_v55 }
 0x28f   :  { %v5882_v44 = vpop.permute.xlu1 %171  ;;  %v468_v4 = vpop.permute.xlu0 %467  ;;  %v5939_v31 = vrot.slane %v256_v17, %v5900_v55 }
 0x290   :  { %477 = vrot.lane.b32.xlu0 %v5880_v43, %s5769_s12  ;;  %473 = vrot.lane.b32.xlu1 %v5882_v44, %s5769_s12  ;;  %v219_v0 = vcombine.low %v195_v61, %v211_v59  ;;  %v220_v1 = vcombine.high %v195_v61, %v211_v59  ;;  %v235_v2 = vcombine.low %v202_v62, %v218_v60 }
 0x291   :  { %v236_v3 = vcombine.high %v202_v62, %v218_v60 }
 0x292   :  { %v227_v5 = vrot.slane %v219_v0, %v5911_v63  ;;  %v234_v6 = vrot.slane %v220_v1, %v5911_v63  ;;  %v243_v7 = vrot.slane %v235_v2, %v5911_v63 }
 0x293   :  { %v5888_v45 = vpop.permute.xlu1 %183  ;;  %v250_v8 = vrot.slane %v236_v3, %v5911_v63 }
 0x294   :  { %481 = vrot.lane.b32.xlu1 %v5888_v45, %s5769_s12  ;;  %v323_v11 = vcombine.low %v227_v5, %v234_v6  ;;  %v5030_v12 = vcombine.high %v227_v5, %v234_v6  ;;  %v271_v18 = vcombine.low %v5882_v44, %v5888_v45  ;;  %v272_v19 = vcombine.high %v5882_v44, %v5888_v45 }
 0x295   :  { %v339_v13 = vcombine.low %v243_v7, %v250_v8  ;;  %v5031_v14 = vcombine.high %v243_v7, %v250_v8 }
 0x296   :  { %v5926_v23 = vrot.slane %v323_v11, %v5900_v55  ;;  %v5929_v24 = vrot.slane %v5030_v12, %v5900_v55  ;;  %v279_v32 = vrot.slane %v271_v18, %v5900_v55  ;;  %v5943_v33 = vrot.slane %v272_v19, %v5900_v55 }
 0x297   :  { %v5932_v25 = vrot.slane %v339_v13, %v5900_v55  ;;  %v5935_v26 = vrot.slane %v5031_v14, %v5900_v55 }
 0x298   :  { %v355_v48 = vcombine.low %v5926_v23, %v5929_v24  ;;  %v356_v51 = vcombine.high %v5926_v23, %v5929_v24  ;;  %v287_v59 = vcombine.low %v263_v30, %v279_v32  ;;  %v288_v60 = vcombine.high %v263_v30, %v279_v32 }
 0x299   :  { %v371_v50 = vcombine.low %v5932_v25, %v5935_v26  ;;  %v372_v52 = vcombine.high %v5932_v25, %v5935_v26  ;;  %v303_v61 = vcombine.low %v5939_v31, %v5943_v33  ;;  %v304_v62 = vcombine.high %v5939_v31, %v5943_v33 }
 0x29a   :  { %v363_v7 = vrot.slane %v355_v48, %v5911_v63  ;;  %v5968_v13 = vrot.slane %v287_v59, %v5911_v63  ;;  %v5971_v14 = vrot.slane %v288_v60, %v5911_v63 }
 0x29b   :  { %v379_v8 = vrot.slane %v371_v50, %v5911_v63  ;;  %v311_v59 = vrot.slane %v303_v61, %v5911_v63  ;;  %v318_v60 = vrot.slane %v304_v62, %v5911_v63 }
 0x2fa   :  { %v476_v9 = vpop.permute.xlu0 %475  ;;  %v472_v10 = vpop.permute.xlu1 %471 }
 0x2fb   :  { %v491_v20 = vcombine.low %v468_v4, %v476_v9  ;;  %v492_v21 = vcombine.high %v468_v4, %v476_v9 }
 0x2fd   :  { %v499_v34 = vrot.slane %v491_v20, %v5900_v55  ;;  %v506_v35 = vrot.slane %v492_v21, %v5900_v55 }
 0x2fe   :  { %v470_v22 = vpop.permute.xlu0 %469  ;;  %v480_v27 = vpop.permute.xlu1 %479 }
 0x2ff   :  { %v507_v28 = vcombine.low %v472_v10, %v480_v27  ;;  %v508_v29 = vcombine.high %v472_v10, %v480_v27 }
 0x301   :  { %v515_v37 = vrot.slane %v507_v28, %v5900_v55  ;;  %v522_v39 = vrot.slane %v508_v29, %v5900_v55 }
 0x302   :  { %v474_v47 = vpop.permute.xlu1 %473  ;;  %v478_v58 = vpop.permute.xlu0 %477 }
 0x303   :  { %v523_v53 = vcombine.low %v499_v34, %v515_v37  ;;  %v524_v54 = vcombine.high %v499_v34, %v515_v37  ;;  %v539_v56 = vcombine.low %v506_v35, %v522_v39  ;;  %v540_v57 = vcombine.high %v506_v35, %v522_v39 }
 0x304   :  { %v559_v4 = vcombine.low %v470_v22, %v478_v58  ;;  %v560_v5 = vcombine.high %v470_v22, %v478_v58 }
 0x305   :  { %v531_v0 = vrot.slane %v523_v53, %v5911_v63  ;;  %v538_v1 = vrot.slane %v524_v54, %v5911_v63  ;;  %v547_v2 = vrot.slane %v539_v56, %v5911_v63  ;;  %v554_v3 = vrot.slane %v540_v57, %v5911_v63 }
 0x306   :  { %v482_v6 = vpop.permute.xlu1 %481  ;;  %v567_v22 = vrot.slane %v559_v4, %v5900_v55  ;;  %v574_v27 = vrot.slane %v560_v5, %v5900_v55 }
 0x307   :  { %v627_v9 = vcombine.low %v531_v0, %v538_v1  ;;  %v5034_v10 = vcombine.high %v531_v0, %v538_v1  ;;  %v643_v11 = vcombine.low %v547_v2, %v554_v3  ;;  %v5035_v12 = vcombine.high %v547_v2, %v554_v3 }
 0x308   :  { %v575_v16 = vcombine.low %v474_v47, %v482_v6  ;;  %v576_v17 = vcombine.high %v474_v47, %v482_v6 }
 0x309   :  { %v634_v18 = vrot.slane %v627_v9, %v5900_v55  ;;  %v642_v19 = vrot.slane %v5034_v10, %v5900_v55  ;;  %v650_v20 = vrot.slane %v643_v11, %v5900_v55  ;;  %v658_v21 = vrot.slane %v5035_v12, %v5900_v55 }
 0x30a   :  { %v583_v28 = vrot.slane %v575_v16, %v5900_v55  ;;  %v590_v29 = vrot.slane %v576_v17, %v5900_v55  ;;  %v387_v10 = vcombine.low %v363_v7, %v379_v8 }
 0x30b   :  { %v659_v30 = vcombine.low %v634_v18, %v642_v19  ;;  %v675_v31 = vcombine.low %v650_v20, %v658_v21  ;;  %v660_v32 = vcombine.high %v634_v18, %v642_v19  ;;  %v676_v33 = vcombine.high %v650_v20, %v658_v21 }
 0x30c   :  { %v591_v34 = vcombine.low %v567_v22, %v583_v28  ;;  %v592_v35 = vcombine.high %v567_v22, %v583_v28  ;;  %v607_v37 = vcombine.low %v574_v27, %v590_v29  ;;  %v608_v39 = vcombine.high %v574_v27, %v590_v29 }
 0x30d   :  { %v667_v47 = vrot.slane %v659_v30, %v5911_v63  ;;  %v683_v48 = vrot.slane %v675_v31, %v5911_v63  ;;  %v674_v50 = vrot.slane %v660_v32, %v5911_v63  ;;  %v690_v53 = vrot.slane %v676_v33, %v5911_v63 }
 0x30e   :  { %v599_v54 = vrot.slane %v591_v34, %v5911_v63  ;;  %v606_v56 = vrot.slane %v592_v35, %v5911_v63  ;;  %v615_v57 = vrot.slane %v607_v37, %v5911_v63  ;;  %v622_v58 = vrot.slane %v608_v39, %v5911_v63 }
 0x30f   :  { %v691_v0 = vcombine.low %v667_v47, %v683_v48  ;;  %v692_v1 = vcombine.high %v667_v47, %v683_v48  ;;  %v693_v11 = vcombine.low %v674_v50, %v690_v53  ;;  %v388_v19 = vcombine.high %v363_v7, %v379_v8 }
 0x310   :  { %v695_v2 = vcombine.low %v599_v54, %v606_v56  ;;  %v5036_v3 = vcombine.high %v599_v54, %v606_v56  ;;  %v711_v4 = vcombine.low %v615_v57, %v622_v58  ;;  %v5037_v5 = vcombine.high %v615_v57, %v622_v58 }
 0x311   :  { %v763_v6 = vpack.c.bf16 %v691_v0, %v691_v0  ;;  %v764_v9 = vpack.c.bf16 %v692_v1, %v692_v1  ;;  %v694_v20 = vcombine.high %v674_v50, %v690_v53  ;;  %v391_v21 = vcombine.low %v5968_v13, %v5971_v14 }
 0x312   :  { %v702_v12 = vrot.slane %v695_v2, %v5900_v55  ;;  %v710_v16 = vrot.slane %v5036_v3, %v5900_v55  ;;  %v718_v17 = vrot.slane %v711_v4, %v5900_v55  ;;  %v726_v61 = vrot.slane %v5037_v5, %v5900_v55 }
 0x313   :  { %v1080_v62 = vsel %vm1075_vm2, %v763_v6, 0  ;;  %v1126_v18 = vsel %vm1075_vm2, %v764_v9, 0  ;;  %v5032_v28 = vcombine.high %v5968_v13, %v5971_v14  ;;  %v407_v29 = vcombine.low %v311_v59, %v318_v60 }
 0x314   :  { %5292 = vmatpush3.bf16.xpose.msra.mxu1 %v1080_v62  ;;  %5298 = vmatpush3.bf16.xpose.msra.mxu0 %v1126_v18  ;;  %v727_v22 = vcombine.low %v702_v12, %v710_v16  ;;  %v743_v27 = vcombine.low %v718_v17, %v726_v61  ;;  %v5033_v30 = vcombine.high %v311_v59, %v318_v60 }
 0x315   :  { %5303 = vmatprep.subr.bf16.mxu1 %v5764_v15  ;;  %5309 = vmatprep.subr.bf16.mxu0 %v5764_v15  ;;  %v765_v31 = vpack.c.bf16 %v693_v11, %v693_v11  ;;  %v766_v32 = vpack.c.bf16 %v694_v20, %v694_v20  ;;  %v459_v33 = vpack.c.bf16 %v387_v10, %v387_v10 }
 0x316   :  { %v735_v7 = vrot.slane %v727_v22, %v5911_v63  ;;  %v751_v8 = vrot.slane %v743_v27, %v5911_v63  ;;  %v460_v34 = vpack.c.bf16 %v388_v19, %v388_v19  ;;  %v370_v35 = vrot.slane %v356_v51, %v5911_v63 }
 0x317   :  { %v386_v13 = vrot.slane %v372_v52, %v5911_v63  ;;  %v398_v14 = vrot.slane %v391_v21, %v5900_v55  ;;  %v406_v37 = vrot.slane %v5032_v28, %v5900_v55  ;;  %v414_v39 = vrot.slane %v407_v29, %v5900_v55 }
 0x318   :  { %v422_v47 = vrot.slane %v5033_v30, %v5900_v55  ;;  %v1172_v48 = vsel %vm1075_vm2, %v765_v31, 0  ;;  %v728_v50 = vcombine.high %v702_v12, %v710_v16  ;;  %v1218_v23 = vsel %vm1075_vm2, %v766_v32, 0 }
 0x319   :  { %v759_v24 = vcombine.low %v735_v7, %v751_v8  ;;  %v760_v25 = vcombine.high %v735_v7, %v751_v8  ;;  %v744_v26 = vcombine.high %v718_v17, %v726_v61  ;;  %v389_v51 = vcombine.low %v370_v35, %v386_v13 }
 0x31a   :  { %v390_v52 = vcombine.high %v370_v35, %v386_v13  ;;  %v423_v53 = vcombine.low %v398_v14, %v406_v37  ;;  %v439_v54 = vcombine.low %v414_v39, %v422_v47  ;;  %v742_v58 = vrot.slane %v728_v50, %v5911_v63 }
 0x31b   :  { %5294 = vmatmul.mubr.msk.bf16.vlgmr.msra.gmra.mrb[4].mxu1 %vm1075_vm2, %v459_v33  ;;  %5300 = vmatmul.mubr.msk.bf16.vlgmr.msra.gmra.mrb[0].mxu0 %vm1075_vm2, %v460_v34  ;;  %v767_v56 = vpack.c.bf16 %v759_v24, %v759_v24  ;;  %v768_v57 = vpack.c.bf16 %v760_v25, %v760_v25  ;;  %v758_v59 = vrot.slane %v744_v26, %v5911_v63  ;;  %v27_v30 = vand.u32 127, %v24_v46 }
 0x31c   :  { %5304 = vmatpush3.bf16.xpose.msra.mxu1 %v1172_v48  ;;  %5310 = vmatpush3.bf16.xpose.msra.mxu0 %v1218_v23  ;;  %v461_v60 = vpack.c.bf16 %v389_v51, %v389_v51  ;;  %v462_v0 = vpack.c.bf16 %v390_v52, %v390_v52  ;;  %v431_v1 = vrot.slane %v423_v53, %v5911_v63  ;;  %v5772_v31 = vmov -1e+30  }
 0x31d   :  { %5305 = vmatprep.mubr.msk.bf16.mxu1 %vm5765_vm1, %v5764_v15  ;;  %5311 = vmatprep.mubr.msk.bf16.mxu0 %vm5765_vm1, %v5764_v15  ;;  %v447_v2 = vrot.slane %v439_v54, %v5911_v63  ;;  %v1264_v3 = vsel %vm1075_vm2, %v767_v56, 0  ;;  %v1310_v4 = vsel %vm1075_vm2, %v768_v57, 0  ;;  %v761_v5 = vcombine.low %v742_v58, %v758_v59 }
 0x31e   :  { %5315 = vmatprep.subr.bf16.mxu1 %v5764_v15  ;;  %5321 = vmatprep.subr.bf16.mxu0 %v5764_v15  ;;  %v762_v6 = vcombine.high %v742_v58, %v758_v59  ;;  %v424_v9 = vcombine.high %v398_v14, %v406_v37  ;;  %v440_v12 = vcombine.high %v414_v39, %v422_v47 }
 0x31f   :  { %v455_v10 = vcombine.low %v431_v1, %v447_v2  ;;  %v456_v11 = vcombine.high %v431_v1, %v447_v2  ;;  %v769_v16 = vpack.c.bf16 %v761_v5, %v761_v5  ;;  %vm28_vm3 = vcmp.le.s32.totalorder %v27_v30, %v5893_v49 }
 0x320   :  { %v770_v17 = vpack.c.bf16 %v762_v6, %v762_v6  ;;  %v438_v18 = vrot.slane %v424_v9, %v5911_v63  ;;  %v454_v19 = vrot.slane %v440_v12, %v5911_v63  ;;  %v6061_v32 = vsel %vm28_vm3, 0.0, %v5772_v31 }
 0x321   :  { %v463_v61 = vpack.c.bf16 %v455_v10, %v455_v10  ;;  %v464_v62 = vpack.c.bf16 %v456_v11, %v456_v11  ;;  %v1356_v20 = vsel %vm1075_vm2, %v769_v16, 0 }
 0x322   :  { %v1402_v21 = vsel %vm1075_vm2, %v770_v17, 0  ;;  %v457_v22 = vcombine.low %v438_v18, %v454_v19  ;;  %v458_v27 = vcombine.high %v438_v18, %v454_v19 }
 0x323   :  { %5306 = vmatmul.mubr.msk.bf16.vlgmr.msra.gmra.mrb[8].mxu1 %vm1075_vm2, %v461_v60  ;;  %5312 = vmatmul.mubr.msk.bf16.vlgmr.msra.gmra.mrb[4].mxu0 %vm1075_vm2, %v462_v0 }
 0x324   :  { %5316 = vmatpush3.bf16.xpose.msra.mxu1 %v1264_v3  ;;  %5322 = vmatpush3.bf16.xpose.msra.mxu0 %v1310_v4  ;;  %v465_v28 = vpack.c.bf16 %v457_v22, %v457_v22  ;;  %v466_v29 = vpack.c.bf16 %v458_v27, %v458_v27 }
 0x325   :  { %5317 = vmatprep.mubr.msk.bf16.mxu1 %vm5765_vm1, %v5764_v15  ;;  %5323 = vmatprep.mubr.msk.bf16.mxu0 %vm5765_vm1, %v5764_v15 }
 0x326   :  { %5327 = vmatprep.subr.bf16.mxu1 %v5764_v15  ;;  %5333 = vmatprep.subr.bf16.mxu0 %v5764_v15 }
 0x32b   :  { %5318 = vmatmul.mubr.msk.bf16.vlgmr.msra.gmra.mrb[12].mxu1 %vm1075_vm2, %v463_v61  ;;  %5324 = vmatmul.mubr.msk.bf16.vlgmr.msra.gmra.mrb[8].mxu0 %vm1075_vm2, %v464_v62 }
 0x32c   :  { %5328 = vmatpush3.bf16.xpose.msra.mxu1 %v1356_v20  ;;  %5334 = vmatpush3.bf16.xpose.msra.mxu0 %v1402_v21 }
 0x32d   :  { %5329 = vmatprep.mubr.msk.bf16.mxu1 %vm5765_vm1, %v5764_v15  ;;  %5335 = vmatprep.mubr.msk.bf16.mxu0 %vm5765_vm1, %v5764_v15 }
 0x32e   :  { %5339 = vmatprep.subr.bf16.mxu1 %v5764_v15  ;;  %5345 = vmatprep.subr.bf16.mxu0 %v5764_v15 }
 0x333   :  { %5330 = vmatmul.mubr.msk.bf16.vlgmr.msra.gmra.mrb[16].mxu1 %vm1075_vm2, %v465_v28  ;;  %5336 = vmatmul.mubr.msk.bf16.vlgmr.msra.gmra.mrb[12].mxu0 %vm1075_vm2, %v466_v29 }
 0x334   :  { %5341 = vmatprep.mubr.msk.bf16.mxu1 %vm5765_vm1, %v5764_v15  ;;  %5347 = vmatprep.mubr.msk.bf16.mxu0 %vm5765_vm1, %v5764_v15 }
 0x3ee   :  { %v1116_v7 = vpop.f32.mrb[4].mxu1  ;;  %v1162_v8 = vpop.f32.mrb[0].mxu0 }
 0x3ef   :  { %v6064_v33 = vadd.f32 %v1116_v7, %v6061_v32  ;;  %v1163_v34 = vadd.f32 %v1162_v8, %v6061_v32  ;;  %v5295_v35 = vpop.f32.mrb[5].mxu1  ;;  %v5301_v13 = vpop.f32.mrb[1].mxu0 }
 0x3f0   :  { %v1119_v14 = vpop.f32.mrb[6].mxu1  ;;  %v1165_v37 = vpop.f32.mrb[2].mxu0 }
 0x3f1   :  { %v5296_v39 = vpop.f32.mrb[7].mxu1  ;;  %v5302_v47 = vpop.f32.mrb[3].mxu0  ;;  %v1447_v46 = vsel %vm1075_vm2, %v1163_v34, -inf  ;;  %v1444_v49 = vsel %vm1075_vm2, %v6064_v33, -inf }
 0x3f2   :  { %1448 = vmax.xlane.f32.xlu1 %v1447_v46  ;;  %1445 = vmax.xlane.f32.xlu0 %v1444_v49 }
 0x3f6   :  { %v1208_v48 = vpop.f32.mrb[8].mxu1  ;;  %v1254_v50 = vpop.f32.mrb[4].mxu0 }
 0x3f7   :  { %v1209_v23 = vadd.f32 %v1208_v48, %v6061_v32  ;;  %v5307_v24 = vpop.f32.mrb[9].mxu1  ;;  %v5313_v25 = vpop.f32.mrb[5].mxu0  ;;  %v1255_v52 = vadd.f32 %v1254_v50, %v6061_v32 }
 0x3f8   :  { %v1211_v26 = vpop.f32.mrb[10].mxu1  ;;  %v1257_v51 = vpop.f32.mrb[6].mxu0 }
 0x3f9   :  { %v5308_v53 = vpop.f32.mrb[11].mxu1  ;;  %v5314_v54 = vpop.f32.mrb[7].mxu0  ;;  %v1450_v56 = vsel %vm1075_vm2, %v1209_v23, -inf  ;;  %v1453_v57 = vsel %vm1075_vm2, %v1255_v52, -inf }
 0x3fa   :  { %1451 = vmax.xlane.f32.xlu0 %v1450_v56 }
 0x3fe   :  { %v1346_v58 = vpop.f32.mrb[8].mxu0  ;;  %1454 = vmax.xlane.f32.xlu0 %v1453_v57  ;;  %v1300_v59 = vpop.f32.mrb[12].mxu1 }
 0x3ff   :  { %v1347_v60 = vadd.f32 %v1346_v58, %v6061_v32  ;;  %v1301_v0 = vadd.f32 %v1300_v59, %v6061_v32  ;;  %v5319_v1 = vpop.f32.mrb[13].mxu1  ;;  %v5325_v2 = vpop.f32.mrb[9].mxu0 }
 0x400   :  { %v1303_v3 = vpop.f32.mrb[14].mxu1  ;;  %v1349_v4 = vpop.f32.mrb[10].mxu0 }
 0x401   :  { %v5320_v5 = vpop.f32.mrb[15].mxu1  ;;  %v5326_v6 = vpop.f32.mrb[11].mxu0  ;;  %v1459_v9 = vsel %vm1075_vm2, %v1347_v60, -inf  ;;  %v1456_v10 = vsel %vm1075_vm2, %v1301_v0, -inf }
 0x402   :  { %1460 = vmax.xlane.f32.xlu1 %v1459_v9  ;;  %1457 = vmax.xlane.f32.xlu0 %v1456_v10 }
 0x406   :  { %v1392_v11 = vpop.f32.mrb[16].mxu1  ;;  %v1438_v12 = vpop.f32.mrb[12].mxu0 }
 0x407   :  { %v6079_v16 = vadd.f32 %v1392_v11, %v6061_v32  ;;  %v5331_v17 = vpop.f32.mrb[17].mxu1  ;;  %v5337_v61 = vpop.f32.mrb[13].mxu0  ;;  %v1439_v22 = vadd.f32 %v1438_v12, %v6061_v32 }
 0x408   :  { %v1395_v62 = vpop.f32.mrb[18].mxu1  ;;  %v1441_v18 = vpop.f32.mrb[14].mxu0 }
 0x409   :  { %v5332_v19 = vpop.f32.mrb[19].mxu1  ;;  %v5338_v20 = vpop.f32.mrb[15].mxu0  ;;  %v1462_v21 = vsel %vm1075_vm2, %v6079_v16, -inf  ;;  %v1465_v27 = vsel %vm1075_vm2, %v1439_v22, -inf }
 0x40a   :  { %1463 = vmax.xlane.f32.xlu0 %v1462_v21 }
 0x413   :  { %775 = vrot.lane.b32.xlu1 %v5868_v41, %s5773_s13 }
 0x417   :  { %779 = vrot.lane.b32.xlu1 %v5866_v40, %s5773_s13 }
 0x420   :  { %771 = vrot.lane.b32.xlu0 %v5848_v36, %s5773_s13 }
 0x43b   :  { %1466 = vmax.xlane.f32.xlu1 %v1465_v27 }
 0x44c   :  { %783 = vrot.lane.b32.xlu1 %v5874_v42, %s5773_s13 }
 0x47f   :  { %v1449_v28 = vpop.xlane.xlu1 %1448  ;;  %v1446_v29 = vpop.xlane.xlu0 %1445 }
 0x480   :  { %v1469_v30 = vsub.f32 %v1163_v34, %v1449_v28  ;;  %v1468_v31 = vsub.f32 %v6064_v33, %v1446_v29 }
 0x482   :  { %v1478_v41 = vmul.f32 1.442695, %v1469_v30  ;;  %v1476_v7 = vmul.f32 1.442695, %v1468_v31 }
 0x484   :  { %5650 = vpow2.f32 %v1478_v41 }
 0x485   :  { %5652 = vpow2.f32 %v1476_v7 }
 0x487   :  { %v1452_v40 = vpop.xlane.xlu0 %1451 }
 0x488   :  { %v1470_v8 = vsub.f32 %v1209_v23, %v1452_v40 }
 0x48a   :  { %v1480_v36 = vmul.f32 1.442695, %v1470_v8 }
 0x48b   :  { %v1455_v35 = vpop.xlane.xlu0 %1454 }
 0x48c   :  { %5654 = vpow2.f32 %v1480_v36  ;;  %v1471_v13 = vsub.f32 %v1255_v52, %v1455_v35 }
 0x48e   :  { %v6094_v14 = vpop.eup %5650  ;;  %v1482_v37 = vmul.f32 1.442695, %v1471_v13 }
 0x48f   :  { %v6096_v39 = vpop.eup %5652  ;;  %v1461_v42 = vpop.xlane.xlu1 %1460  ;;  %v1495_v33 = vsel %vm1075_vm2, %v6094_v14, 0.0 }
 0x490   :  { %v1458_v47 = vpop.xlane.xlu0 %1457  ;;  %5656 = vpow2.f32 %v1482_v37  ;;  %v1473_v34 = vsub.f32 %v1347_v60, %v1461_v42  ;;  %1496 = vadd.xlane.f32.xlu1 %v1495_v33  ;;  %v1492_v49 = vsel %vm1075_vm2, %v6096_v39, 0.0 }
 0x491   :  { %v1472_v46 = vsub.f32 %v1301_v0, %v1458_v47  ;;  %1493 = vadd.xlane.f32.xlu0 %v1492_v49 }
 0x492   :  { %v1486_v50 = vmul.f32 1.442695, %v1473_v34 }
 0x493   :  { %v1484_v48 = vmul.f32 1.442695, %v1472_v46  ;;  %v776_v56 = vpop.permute.xlu1 %775 }
 0x495   :  { %5658 = vpow2.f32 %v1484_v48 }
 0x496   :  { %v6102_v23 = vpop.eup %5654  ;;  %5660 = vpow2.f32 %v1486_v50 }
 0x497   :  { %v1498_v24 = vsel %vm1075_vm2, %v6102_v23, 0.0  ;;  %v1464_v57 = vpop.xlane.xlu0 %1463  ;;  %v780_v59 = vpop.permute.xlu1 %779 }
 0x498   :  { %1499 = vadd.xlane.f32.xlu0 %v1498_v24  ;;  %v1474_v58 = vsub.f32 %v6079_v16, %v1464_v57 }
 0x49a   :  { %v6106_v25 = vpop.eup %5656  ;;  %v1488_v60 = vmul.f32 1.442695, %v1474_v58 }
 0x49b   :  { %v1501_v26 = vsel %vm1075_vm2, %v6106_v25, 0.0  ;;  %v772_v0 = vpop.permute.xlu0 %771 }
 0x49c   :  { %1502 = vadd.xlane.f32.xlu1 %v1501_v26  ;;  %5662 = vpow2.f32 %v1488_v60  ;;  %v796_v3 = vcombine.high %v772_v0, %v780_v59 }
 0x49f   :  { %v6110_v51 = vpop.eup %5658 }
 0x4a0   :  { %v1504_v52 = vsel %vm1075_vm2, %v6110_v51, 0.0  ;;  %v6114_v53 = vpop.eup %5660 }
 0x4a1   :  { %1505 = vadd.xlane.f32.xlu0 %v1504_v52  ;;  %v1507_v54 = vsel %vm1075_vm2, %v6114_v53, 0.0 }
 0x4a5   :  { %1508 = vadd.xlane.f32.xlu0 %v1507_v54 }
 0x4a6   :  { %v6135_v20 = vpop.eup %5662 }
 0x4a7   :  { %v1510_v8 = vsel %vm1075_vm2, %v6135_v20, 0.0 }
 0x4ad   :  { %777 = vrot.lane.b32.xlu1 %v5882_v44, %s5773_s13  ;;  %v795_v44 = vcombine.low %v772_v0, %v780_v59 }
 0x4af   :  { %v803_v6 = vrot.slane %v795_v44, %v5900_v55 }
 0x4b1   :  { %781 = vrot.lane.b32.xlu1 %v5880_v43, %s5773_s13 }
 0x4b5   :  { %785 = vrot.lane.b32.xlu1 %v5888_v45, %s5773_s13 }
 0x4bb   :  { %773 = vrot.lane.b32.xlu0 %v5854_v38, %s5773_s13  ;;  %v810_v38 = vrot.slane %v796_v3, %v5900_v55 }
 0x4c8   :  { %v1467_v1 = vpop.xlane.xlu1 %1466 }
 0x4c9   :  { %v1475_v2 = vsub.f32 %v1439_v22, %v1467_v1 }
 0x4cb   :  { %v1490_v4 = vmul.f32 1.442695, %v1475_v2 }
 0x4cc   :  { %v784_v43 = vpop.permute.xlu1 %783 }
 0x4cd   :  { %5664 = vpow2.f32 %v1490_v4  ;;  %v811_v5 = vcombine.low %v776_v56, %v784_v43  ;;  %v812_v45 = vcombine.high %v776_v56, %v784_v43 }
 0x4cf   :  { %v819_v9 = vrot.slane %v811_v5, %v5900_v55  ;;  %v826_v10 = vrot.slane %v812_v45, %v5900_v55 }
 0x4d1   :  { %v827_v11 = vcombine.low %v803_v6, %v819_v9  ;;  %v828_v12 = vcombine.high %v803_v6, %v819_v9  ;;  %v843_v16 = vcombine.low %v810_v38, %v826_v10  ;;  %v844_v17 = vcombine.high %v810_v38, %v826_v10 }
 0x4d3   :  { %v835_v61 = vrot.slane %v827_v11, %v5911_v63  ;;  %v842_v62 = vrot.slane %v828_v12, %v5911_v63  ;;  %v851_v18 = vrot.slane %v843_v16, %v5911_v63  ;;  %v858_v19 = vrot.slane %v844_v17, %v5911_v63 }
 0x4d5   :  { %v931_v21 = vcombine.low %v835_v61, %v842_v62  ;;  %v5038_v22 = vcombine.high %v835_v61, %v842_v62  ;;  %v947_v27 = vcombine.low %v851_v18, %v858_v19  ;;  %v5039_v28 = vcombine.high %v851_v18, %v858_v19 }
 0x4d7   :  { %v6137_v29 = vpop.eup %5664  ;;  %v938_v30 = vrot.slane %v931_v21, %v5900_v55  ;;  %v946_v31 = vrot.slane %v5038_v22, %v5900_v55  ;;  %v954_v41 = vrot.slane %v947_v27, %v5900_v55  ;;  %v962_v7 = vrot.slane %v5039_v28, %v5900_v55 }
 0x4d8   :  { %v1513_v40 = vsel %vm1075_vm2, %v6137_v29, 0.0 }
 0x4d9   :  { %1514 = vadd.xlane.f32.xlu1 %v1513_v40  ;;  %v963_v36 = vcombine.low %v938_v30, %v946_v31  ;;  %v979_v35 = vcombine.low %v954_v41, %v962_v7  ;;  %v964_v13 = vcombine.high %v938_v30, %v946_v31  ;;  %v980_v37 = vcombine.high %v954_v41, %v962_v7 }
 0x4da   :  { %1511 = vadd.xlane.f32.xlu0 %v1510_v8 }
 0x4db   :  { %v971_v42 = vrot.slane %v963_v36, %v5911_v63  ;;  %v987_v47 = vrot.slane %v979_v35, %v5911_v63  ;;  %v978_v33 = vrot.slane %v964_v13, %v5911_v63  ;;  %v994_v34 = vrot.slane %v980_v37, %v5911_v63 }
 0x4dd   :  { %v995_v46 = vcombine.low %v971_v42, %v987_v47  ;;  %v996_v49 = vcombine.high %v971_v42, %v987_v47  ;;  %v997_v48 = vcombine.low %v978_v33, %v994_v34  ;;  %v998_v50 = vcombine.high %v978_v33, %v994_v34 }
 0x4df   :  { %v1067_v24 = vpack.c.bf16 %v995_v46, %v995_v46  ;;  %v1068_v26 = vpack.c.bf16 %v996_v49, %v996_v49  ;;  %v1070_v2 = vpack.c.bf16 %v998_v50, %v998_v50  ;;  %v1069_v3 = vpack.c.bf16 %v997_v48, %v997_v48 }
 0x4e1   :  { %v1545_v52 = vsel %vm1543_vm4, %v1067_v24, 0  ;;  %v1591_v54 = vsel %vm1543_vm4, %v1068_v26, 0  ;;  %v1683_v45 = vsel %vm1543_vm4, %v1070_v2, 0  ;;  %v1637_v6 = vsel %vm1543_vm4, %v1069_v3, 0 }
 0x4e2   :  { %5340 = vmatpush3.bf16.msra.mxu1 %v1545_v52  ;;  %5346 = vmatpush3.bf16.msra.mxu0 %v1591_v54 }
 0x4e3   :  { %5351 = vmatprep.subr.bf16.mxu1 %v5764_v15  ;;  %5357 = vmatprep.subr.bf16.mxu0 %v5764_v15 }
 0x51d   :  { %v1497_v56 = vpop.xlane.xlu1 %1496 }
 0x51e   :  { %5666 = vrcp.f32 %v1497_v56  ;;  %v1494_v57 = vpop.xlane.xlu0 %1493 }
 0x51f   :  { %5668 = vrcp.f32 %v1494_v57 }
 0x525   :  { %v1500_v58 = vpop.xlane.xlu0 %1499 }
 0x526   :  { %5670 = vrcp.f32 %v1500_v58 }
 0x528   :  { %v5667_v59 = vpop.eup %5666 }
 0x529   :  { %v5669_v60 = vpop.eup %5668  ;;  %v1525_v0 = vmul.f32 %v5667_v59, %v6094_v14  ;;  %v1503_v1 = vpop.xlane.xlu1 %1502 }
 0x52a   :  { %v1524_v44 = vmul.f32 %v5669_v60, %v6096_v39  ;;  %5672 = vrcp.f32 %v1503_v1 }
 0x52b   :  { %v1533_v4 = vpack.c.bf16 %v1525_v0, %v1525_v0 }
 0x52c   :  { %v1532_v43 = vpack.c.bf16 %v1524_v44, %v1524_v44 }
 0x52d   :  { %v778_v5 = vpop.permute.xlu1 %777  ;;  %5348 = vmatmul.mubr.msk.bf16.vlgmr.msra.gmra.mrb[16].mxu0 %vm1075_vm2, %v1533_v4 }
 0x52e   :  { %5342 = vmatmul.mubr.msk.bf16.vlgmr.msra.gmra.mrb[20].mxu1 %vm1075_vm2, %v1532_v43  ;;  %5358 = vmatpush3.bf16.msra.mxu0 %v1683_v45  ;;  %v1506_v38 = vpop.xlane.xlu0 %1505 }
 0x52f   :  { %5352 = vmatpush3.bf16.msra.mxu1 %v1637_v6  ;;  %5353 = vmatprep.mubr.msk.bf16.mxu1 %vm5765_vm1, %v5764_v15  ;;  %5674 = vrcp.f32 %v1506_v38 }
 0x530   :  { %v5671_v14 = vpop.eup %5670  ;;  %5359 = vmatprep.mubr.msk.bf16.mxu0 %vm5765_vm1, %v5764_v15  ;;  %5363 = vmatprep.subr.bf16.mxu1 %v5764_v15 }
 0x531   :  { %v1526_v39 = vmul.f32 %v5671_v14, %v6102_v23  ;;  %v782_v9 = vpop.permute.xlu1 %781  ;;  %5369 = vmatprep.subr.bf16.mxu0 %v5764_v15 }
 0x532   :  { %v1509_v10 = vpop.xlane.xlu0 %1508 }
 0x533   :  { %v1534_v11 = vpack.c.bf16 %v1526_v39, %v1526_v39  ;;  %5676 = vrcp.f32 %v1509_v10 }
 0x534   :  { %v5673_v12 = vpop.eup %5672 }
 0x535   :  { %v1527_v16 = vmul.f32 %v5673_v12, %v6106_v25  ;;  %v786_v17 = vpop.permute.xlu1 %785 }
 0x536   :  { %v879_v61 = vcombine.low %v778_v5, %v786_v17  ;;  %v880_v62 = vcombine.high %v778_v5, %v786_v17  ;;  %5354 = vmatmul.mubr.msk.bf16.vlgmr.msra.gmra.mrb[24].mxu1 %vm1075_vm2, %v1534_v11  ;;  %v774_v18 = vpop.permute.xlu0 %773 }
 0x537   :  { %v863_v19 = vcombine.low %v774_v18, %v782_v9  ;;  %v864_v21 = vcombine.high %v774_v18, %v782_v9  ;;  %v1535_v22 = vpack.c.bf16 %v1527_v16, %v1527_v16  ;;  %5365 = vmatprep.mubr.msk.bf16.mxu1 %vm5765_vm1, %v5764_v15 }
 0x538   :  { %v887_v23 = vrot.slane %v879_v61, %v5900_v55  ;;  %v894_v27 = vrot.slane %v880_v62, %v5900_v55 }
 0x539   :  { %v871_v28 = vrot.slane %v863_v19, %v5900_v55  ;;  %v878_v25 = vrot.slane %v864_v21, %v5900_v55  ;;  %5360 = vmatmul.mubr.msk.bf16.vlgmr.msra.gmra.mrb[20].mxu0 %vm1075_vm2, %v1535_v22  ;;  %v5675_v52 = vpop.eup %5674 }
 0x53a   :  { %5371 = vmatprep.mubr.msk.bf16.mxu0 %vm5765_vm1, %v5764_v15  ;;  %v1528_v44 = vmul.f32 %v5675_v52, %v6110_v51 }
 0x53b   :  { %v895_v30 = vcombine.low %v871_v28, %v887_v23  ;;  %v896_v31 = vcombine.high %v871_v28, %v887_v23  ;;  %v911_v41 = vcombine.low %v878_v25, %v894_v27  ;;  %v912_v7 = vcombine.high %v878_v25, %v894_v27 }
 0x53c   :  { %v1536_v14 = vpack.c.bf16 %v1528_v44, %v1528_v44 }
 0x53d   :  { %v903_v40 = vrot.slane %v895_v30, %v5911_v63  ;;  %v910_v8 = vrot.slane %v896_v31, %v5911_v63  ;;  %v919_v36 = vrot.slane %v911_v41, %v5911_v63  ;;  %v926_v35 = vrot.slane %v912_v7, %v5911_v63  ;;  %v5677_v59 = vpop.eup %5676 }
 0x53e   :  { %v1529_v3 = vmul.f32 %v5677_v59, %v6114_v53 }
 0x53f   :  { %v999_v13 = vcombine.low %v903_v40, %v910_v8  ;;  %v5040_v37 = vcombine.high %v903_v40, %v910_v8  ;;  %v1015_v42 = vcombine.low %v919_v36, %v926_v35  ;;  %v5041_v47 = vcombine.high %v919_v36, %v926_v35 }
 0x540   :  { %v1537_v39 = vpack.c.bf16 %v1529_v3, %v1529_v3 }
 0x541   :  { %v1006_v33 = vrot.slane %v999_v13, %v5900_v55  ;;  %v1014_v34 = vrot.slane %v5040_v37, %v5900_v55  ;;  %v1022_v46 = vrot.slane %v1015_v42, %v5900_v55  ;;  %v1030_v49 = vrot.slane %v5041_v47, %v5900_v55 }
 0x543   :  { %v1031_v48 = vcombine.low %v1006_v33, %v1014_v34  ;;  %v1047_v50 = vcombine.low %v1022_v46, %v1030_v49  ;;  %v1032_v24 = vcombine.high %v1006_v33, %v1014_v34  ;;  %v1048_v26 = vcombine.high %v1022_v46, %v1030_v49 }
 0x545   :  { %v1039_v54 = vrot.slane %v1031_v48, %v5911_v63  ;;  %v1055_v56 = vrot.slane %v1047_v50, %v5911_v63  ;;  %v1046_v57 = vrot.slane %v1032_v24, %v5911_v63  ;;  %v1062_v58 = vrot.slane %v1048_v26, %v5911_v63 }
 0x547   :  { %v1063_v60 = vcombine.low %v1039_v54, %v1055_v56  ;;  %v1064_v0 = vcombine.high %v1039_v54, %v1055_v56  ;;  %v1065_v1 = vcombine.low %v1046_v57, %v1062_v58  ;;  %v1066_v2 = vcombine.high %v1046_v57, %v1062_v58 }
 0x549   :  { %v1071_v4 = vpack.c.bf16 %v1063_v60, %v1063_v60  ;;  %v1072_v43 = vpack.c.bf16 %v1064_v0, %v1064_v0  ;;  %v1073_v6 = vpack.c.bf16 %v1065_v1, %v1065_v1  ;;  %v1074_v38 = vpack.c.bf16 %v1066_v2, %v1066_v2 }
 0x54b   :  { %v1729_v5 = vsel %vm1543_vm4, %v1071_v4, 0  ;;  %v1775_v45 = vsel %vm1543_vm4, %v1072_v43, 0  ;;  %v1821_v51 = vsel %vm1543_vm4, %v1073_v6, 0  ;;  %v1867_v53 = vsel %vm1543_vm4, %v1074_v38, 0 }
 0x54c   :  { %5364 = vmatpush3.bf16.msra.mxu1 %v1729_v5  ;;  %5370 = vmatpush3.bf16.msra.mxu0 %v1775_v45 }
 0x54d   :  { %5375 = vmatprep.subr.bf16.mxu1 %v5764_v15  ;;  %5381 = vmatprep.subr.bf16.mxu0 %v5764_v15 }
 0x54f   :  { %5366 = vmatmul.mubr.msk.bf16.vlgmr.msra.gmra.mrb[28].mxu1 %vm1075_vm2, %v1536_v14  ;;  %5372 = vmatmul.mubr.msk.bf16.vlgmr.msra.gmra.mrb[24].mxu0 %vm1075_vm2, %v1537_v39 }
 0x550   :  { %5376 = vmatpush3.bf16.msra.mxu1 %v1821_v51  ;;  %5382 = vmatpush3.bf16.msra.mxu0 %v1867_v53 }
 0x551   :  { %5377 = vmatprep.mubr.msk.bf16.mxu1 %vm5765_vm1, %v5764_v15  ;;  %5383 = vmatprep.mubr.msk.bf16.mxu0 %vm5765_vm1, %v5764_v15 }
 0x552   :  { %5387 = vmatprep.subr.bf16.mxu1 %v5764_v15  ;;  %5395 = vmatprep.subr.bf16.mxu0 %v5764_v15 }
 0x566   :  { %v1515_v9 = vpop.xlane.xlu1 %1514 }
 0x567   :  { %5678 = vrcp.f32 %v1515_v9  ;;  %v1512_v10 = vpop.xlane.xlu0 %1511 }
 0x568   :  { %5680 = vrcp.f32 %v1512_v10 }
 0x571   :  { %v5679_v11 = vpop.eup %5678 }
 0x572   :  { %v5681_v12 = vpop.eup %5680  ;;  %v1531_v16 = vmul.f32 %v5679_v11, %v6137_v29 }
 0x573   :  { %v1530_v17 = vmul.f32 %v5681_v12, %v6135_v20 }
 0x574   :  { %v1539_v61 = vpack.c.bf16 %v1531_v16, %v1531_v16 }
 0x575   :  { %v1538_v62 = vpack.c.bf16 %v1530_v17, %v1530_v17 }
 0x576   :  { %5384 = vmatmul.mubr.msk.bf16.vlgmr.msra.gmra.mrb[28].mxu0 %vm1075_vm2, %v1539_v61 }
 0x577   :  { %5378 = vmatmul.mubr.msk.bf16.vlgmr.msra.gmra.mrb[32].mxu1 %vm1075_vm2, %v1538_v62  ;;  %5399 = vmatprep.mubr.msk.bf16.mxu0 %vm5765_vm1, %v5764_v15 }
 0x578   :  { %5391 = vmatprep.mubr.msk.bf16.mxu1 %vm5765_vm1, %v5764_v15 }
 0x600   :  { %v1627_v18 = vpop.f32.mrb[16].mxu0 }
 0x601   :  { %v1581_v19 = vpop.f32.mrb[20].mxu1  ;;  %v5349_v21 = vpop.f32.mrb[17].mxu0 }
 0x602   :  { %v5343_v22 = vpop.f32.mrb[21].mxu1  ;;  %v1630_v23 = vpop.f32.mrb[18].mxu0 }
 0x603   :  { %v1584_v29 = vpop.f32.mrb[22].mxu1  ;;  %v5350_v27 = vpop.f32.mrb[19].mxu0 }
 0x604   :  { %v5344_v20 = vpop.f32.mrb[23].mxu1 }
 0x609   :  { %v1673_v28 = vpop.f32.mrb[24].mxu1 }
 0x60a   :  { %v1909_v25 = vcombine.low %v1581_v19, %v1673_v28  ;;  %v1910_v30 = vcombine.high %v1581_v19, %v1673_v28  ;;  %v5355_v31 = vpop.f32.mrb[25].mxu1 }
 0x60b   :  { %v1676_v41 = vpop.f32.mrb[26].mxu1 }
 0x60c   :  { %v5356_v7 = vpop.f32.mrb[27].mxu1  ;;  %v1719_v40 = vpop.f32.mrb[20].mxu0  ;;  %v1917_v37 = vrot.slane %v1909_v25, %v5900_v55  ;;  %v1924_v42 = vrot.slane %v1910_v30, %v5900_v55 }
 0x60d   :  { %v1925_v8 = vcombine.low %v1627_v18, %v1719_v40  ;;  %v1926_v36 = vcombine.high %v1627_v18, %v1719_v40  ;;  %v5361_v35 = vpop.f32.mrb[21].mxu0 }
 0x60e   :  { %v1722_v13 = vpop.f32.mrb[22].mxu0 }
 0x60f   :  { %v1933_v47 = vrot.slane %v1925_v8, %v5900_v55  ;;  %v1940_v33 = vrot.slane %v1926_v36, %v5900_v55  ;;  %v5362_v34 = vpop.f32.mrb[23].mxu0 }
 0x611   :  { %v1941_v46 = vcombine.low %v1917_v37, %v1933_v47  ;;  %v1942_v49 = vcombine.high %v1917_v37, %v1933_v47  ;;  %v1957_v48 = vcombine.low %v1924_v42, %v1940_v33  ;;  %v1958_v50 = vcombine.high %v1924_v42, %v1940_v33 }
 0x613   :  { %v1949_v24 = vrot.slane %v1941_v46, %v5911_v63  ;;  %v1956_v26 = vrot.slane %v1942_v49, %v5911_v63  ;;  %v1965_v52 = vrot.slane %v1957_v48, %v5911_v63  ;;  %v1972_v54 = vrot.slane %v1958_v50, %v5911_v63 }
 0x615   :  { %v2045_v56 = vcombine.low %v1949_v24, %v1956_v26  ;;  %v5058_v57 = vcombine.high %v1949_v24, %v1956_v26  ;;  %v2061_v58 = vcombine.low %v1965_v52, %v1972_v54  ;;  %v5059_v59 = vcombine.high %v1965_v52, %v1972_v54  ;;  %v5618_v24 = vld [vmem:[%s6970_s2] sm:$0xff]  }
 0x616   :  { %5388 = vmatpush3.bf16.msra.mxu1 %v5618_v24 }
 0x617   :  { %v2052_v60 = vrot.slane %v2045_v56, %v5900_v55  ;;  %v2060_v0 = vrot.slane %v5058_v57, %v5900_v55  ;;  %v2068_v1 = vrot.slane %v2061_v58, %v5900_v55  ;;  %v2076_v2 = vrot.slane %v5059_v59, %v5900_v55  ;;  %5389 = vmatprep.subr.bf16.mxu1 %v5764_v15 }
 0x619   :  { %v2078_v44 = vcombine.high %v2052_v60, %v2060_v0  ;;  %v2094_v3 = vcombine.high %v2068_v1, %v2076_v2  ;;  %v2077_v4 = vcombine.low %v2052_v60, %v2060_v0  ;;  %v2093_v43 = vcombine.low %v2068_v1, %v2076_v2  ;;  %v5619_v0 = vld [vmem:[%s6970_s2 + $0x8] sm:$0xff]  }
 0x61a   :  { %5390 = vmatpush3.bf16.msra.mxu1 %v5619_v0 }
 0x61b   :  { %v6228_v5 = vrot.slane %v2078_v44, %v5911_v63  ;;  %v6231_v45 = vrot.slane %v2094_v3, %v5911_v63  ;;  %v6234_v6 = vrot.slane %v2077_v4, %v5911_v63  ;;  %v6237_v38 = vrot.slane %v2093_v43, %v5911_v63  ;;  %5403 = vmatprep.subr.bf16.mxu1 %v5764_v15 }
 0x61d   :  { %v2111_v14 = vcombine.low %v6228_v5, %v6231_v45  ;;  %v2109_v39 = vcombine.low %v6234_v6, %v6237_v38  ;;  %v2110_v51 = vcombine.high %v6234_v6, %v6237_v38  ;;  %v2112_v53 = vcombine.high %v6228_v5, %v6231_v45  ;;  %v5019_v6 = vld [vmem:[%s6971_s3 + $0x20] sm:$0xff] }
 0x622   :  { %v1765_v9 = vpop.f32.mrb[28].mxu1  ;;  %v1811_v10 = vpop.f32.mrb[24].mxu0 }
 0x623   :  { %v5367_v11 = vpop.f32.mrb[29].mxu1  ;;  %v5373_v12 = vpop.f32.mrb[25].mxu0 }
 0x624   :  { %v1768_v16 = vpop.f32.mrb[30].mxu1  ;;  %v1814_v17 = vpop.f32.mrb[26].mxu0 }
 0x625   :  { %v5368_v61 = vpop.f32.mrb[31].mxu1  ;;  %v5374_v62 = vpop.f32.mrb[27].mxu0 }
 0x649   :  { %v1903_v18 = vpop.f32.mrb[28].mxu0 }
 0x64a   :  { %v1857_v19 = vpop.f32.mrb[32].mxu1  ;;  %v1993_v21 = vcombine.low %v1811_v10, %v1903_v18  ;;  %v1994_v22 = vcombine.high %v1811_v10, %v1903_v18  ;;  %v5385_v23 = vpop.f32.mrb[29].mxu0 }
 0x64b   :  { %v1977_v29 = vcombine.low %v1765_v9, %v1857_v19  ;;  %v1978_v27 = vcombine.high %v1765_v9, %v1857_v19  ;;  %v5379_v20 = vpop.f32.mrb[33].mxu1  ;;  %v1906_v28 = vpop.f32.mrb[30].mxu0 }
 0x64c   :  { %v2001_v25 = vrot.slane %v1993_v21, %v5900_v55  ;;  %v2008_v30 = vrot.slane %v1994_v22, %v5900_v55  ;;  %v1860_v31 = vpop.f32.mrb[34].mxu1  ;;  %v5386_v41 = vpop.f32.mrb[31].mxu0 }
 0x64d   :  { %v1985_v7 = vrot.slane %v1977_v29, %v5900_v55  ;;  %v1992_v40 = vrot.slane %v1978_v27, %v5900_v55  ;;  %v5380_v8 = vpop.f32.mrb[35].mxu1 }
 0x64f   :  { %v2009_v36 = vcombine.low %v1985_v7, %v2001_v25  ;;  %v2010_v35 = vcombine.high %v1985_v7, %v2001_v25  ;;  %v2025_v13 = vcombine.low %v1992_v40, %v2008_v30  ;;  %v2026_v37 = vcombine.high %v1992_v40, %v2008_v30  ;;  %v5020_v30 = vld [vmem:[%s6971_s3 + $0x28] sm:$0xff] }
 0x650   :  { %v5739_v7 = vld [vmem:[%s6968_s0 + $0x8] sm:$0xff] }
 0x651   :  { %v2017_v42 = vrot.slane %v2009_v36, %v5911_v63  ;;  %v2024_v47 = vrot.slane %v2010_v35, %v5911_v63  ;;  %v2033_v33 = vrot.slane %v2025_v13, %v5911_v63  ;;  %v2040_v34 = vrot.slane %v2026_v37, %v5911_v63 }
 0x653   :  { %v2113_v46 = vcombine.low %v2017_v42, %v2024_v47  ;;  %v5060_v49 = vcombine.high %v2017_v42, %v2024_v47  ;;  %v2129_v48 = vcombine.low %v2033_v33, %v2040_v34  ;;  %v5061_v50 = vcombine.high %v2033_v33, %v2040_v34 }
 0x655   :  { %v2120_v26 = vrot.slane %v2113_v46, %v5900_v55  ;;  %v2128_v52 = vrot.slane %v5060_v49, %v5900_v55  ;;  %v2136_v54 = vrot.slane %v2129_v48, %v5900_v55  ;;  %v2144_v56 = vrot.slane %v5061_v50, %v5900_v55 }
 0x657   :  { %v2146_v57 = vcombine.high %v2120_v26, %v2128_v52  ;;  %v2162_v58 = vcombine.high %v2136_v54, %v2144_v56  ;;  %v2145_v59 = vcombine.low %v2120_v26, %v2128_v52  ;;  %v2161_v60 = vcombine.low %v2136_v54, %v2144_v56  ;;  %v5620_v26 = vld [vmem:[%s6969_s1 + $0x10] sm:$0xff]   ;;  %v5621_v52 = vld [vmem:[%s6969_s1 + $0x18] sm:$0xff]  }
 0x658   :  { %5396 = vmatpush3.bf16.msra.mxu0 %v5620_v26  ;;  %v5622_v54 = vld [vmem:[%s6970_s2 + $0x10] sm:$0xff]   ;;  %v5623_v56 = vld [vmem:[%s6970_s2 + $0x18] sm:$0xff]  }
 0x659   :  { %v2160_v1 = vrot.slane %v2146_v57, %v5911_v63  ;;  %v2176_v2 = vrot.slane %v2162_v58, %v5911_v63  ;;  %v2153_v44 = vrot.slane %v2145_v59, %v5911_v63  ;;  %v2169_v3 = vrot.slane %v2161_v60, %v5911_v63  ;;  %5397 = vmatprep.subr.bf16.mxu0 %v5764_v15 }
 0x65b   :  { %v2179_v4 = vcombine.low %v2160_v1, %v2176_v2  ;;  %v2178_v43 = vcombine.high %v2153_v44, %v2169_v3  ;;  %v2177_v5 = vcombine.low %v2153_v44, %v2169_v3  ;;  %v2180_v45 = vcombine.high %v2160_v1, %v2176_v2  ;;  %v5021_v3 = vld [vmem:[%s6971_s3 + $0x30] sm:$0xff] }
 0x65c   :  { %5398 = vmatpush3.bf16.msra.mxu0 %v5621_v52 }
 0x65d   :  { %v5591_v9 = vpack.i.bf16 %v2179_v4, %v2111_v14  ;;  %v5586_v10 = vpack.i.bf16 %v2178_v43, %v2110_v51  ;;  %v5596_v11 = vpack.i.bf16 %v2180_v45, %v2112_v53  ;;  %5423 = vmatprep.subr.bf16.mxu0 %v5764_v15  ;;  %v5022_v43 = vld [vmem:[%s6971_s3 + $0x38] sm:$0xff] }
 0x65f   :  { %5592 = vrot.lane.b32.xlu1 %v5591_v9, %s5774_s18  ;;  %5587 = vrot.lane.b32.xlu0 %v5586_v10, %s5775_s19  ;;  %v5023_v9 = vld [vmem:[%s6971_s3 + $0x40] sm:$0xff]  ;;  %v5024_v10 = vld [vmem:[%s6971_s3 + $0x48] sm:$0xff] }
 0x663   :  { %5597 = vrot.lane.b32.xlu0 %v5596_v11, %s5776_s20 }
 0x6d1   :  { %v5593_v12 = vpop.permute.xlu1 %5592  ;;  %v5588_v16 = vpop.permute.xlu0 %5587 }
 0x6d2   :  { %v5590_v17 = vunpack.i.h.bf16 %v5588_v16  ;;  %v5589_v61 = vunpack.i.l.bf16 %v5588_v16  ;;  %v5595_v62 = vunpack.i.h.bf16 %v5593_v12  ;;  %v5594_v18 = vunpack.i.l.bf16 %v5593_v12 }
 0x6d4   :  { %v2205_v14 = vsel %vm1075_vm2, %v2109_v39, %v5589_v61  ;;  %v2206_v51 = vsel %vm1075_vm2, %v2177_v5, %v5590_v17  ;;  %v5738_v39 = vld [vmem:[%s6968_s0] sm:$0xff] }
 0x6d5   :  { %v5598_v53 = vpop.permute.xlu0 %5597  ;;  %v2208_v22 = vsel %vm2207_vm5, %v2205_v14, %v5594_v18  ;;  %v2209_v23 = vsel %vm2207_vm5, %v2206_v51, %v5595_v62  ;;  %v5624_v61 = vld [vmem:[%s6970_s2 + $0x20] sm:$0xff]   ;;  %v5625_v62 = vld [vmem:[%s6970_s2 + $0x28] sm:$0xff]   ;;  %v5626_v18 = vld [vmem:[%s6970_s2 + $0x30] sm:$0xff]  }
 0x6d6   :  { %v5600_v19 = vunpack.i.h.bf16 %v5598_v53  ;;  %v5599_v21 = vunpack.i.l.bf16 %v5598_v53  ;;  %v5627_v14 = vld [vmem:[%s6970_s2 + $0x38] sm:$0xff]   ;;  %v5628_v51 = vld [vmem:[%s6970_s2 + $0x40] sm:$0xff]   ;;  %v5629_v53 = vld [vmem:[%s6970_s2 + $0x48] sm:$0xff]  }
 0x6d8   :  { %v2211_v29 = vsel %vm2210_vm6, %v2208_v22, %v5599_v21  ;;  %v2212_v27 = vsel %vm2210_vm6, %v2209_v23, %v5600_v19  ;;  %v76_v19 = vld [vmem:[%s6972_s4] sm:$0xff]  ;;  %v77_v22 = vld [vmem:[%s6972_s4 + $0x8] sm:$0xff] }
 0x6d9   :  { %v2213_v20 = vpack.c.bf16 %v2212_v27, %v2211_v29 }
 0x6db   :  { %5392 = vmatmul.mubr.msk.bf16.vlgmr.msra.gmra.mrb[36].mxu1 %vm78_vm0, %v2213_v20 }
 0x6dc   :  { %5419 = vmatprep.mubr.msk.bf16.mxu1 %vm5765_vm1, %v5764_v15  ;;  %5404 = vmatpush3.bf16.msra.mxu1 %v5622_v54 }
 0x6dd   :  { %5405 = vmatprep.subr.bf16.mxu1 %v5764_v15 }
 0x6e0   :  { %5406 = vmatpush3.bf16.msra.mxu1 %v5623_v56 }
 0x6e1   :  { %5407 = vmatprep.subr.bf16.mxu1 %v5764_v15 }
 0x6e4   :  { %5408 = vmatpush3.bf16.msra.mxu1 %v5624_v61 }
 0x6e5   :  { %5409 = vmatprep.subr.bf16.mxu1 %v5764_v15 }
 0x6e8   :  { %5410 = vmatpush3.bf16.msra.mxu1 %v5625_v62 }
 0x6e9   :  { %5411 = vmatprep.subr.bf16.mxu1 %v5764_v15 }
 0x6ec   :  { %5412 = vmatpush3.bf16.msra.mxu1 %v5626_v18  ;;  %v5106_v18 = vld [vmem:[%s6971_s3 + $0x70] sm:$0xff] }
 0x6ed   :  { %5413 = vmatprep.subr.bf16.mxu1 %v5764_v15 }
 0x6f0   :  { %5414 = vmatpush3.bf16.msra.mxu1 %v5627_v14  ;;  %v5107_v14 = vld [vmem:[%s6971_s3 + $0x78] sm:$0xff] }
 0x6f1   :  { %5415 = vmatprep.subr.bf16.mxu1 %v5764_v15 }
 0x6f4   :  { %5416 = vmatpush3.bf16.msra.mxu1 %v5628_v51 }
 0x6f5   :  { %5417 = vmatprep.subr.bf16.mxu1 %v5764_v15 }
 0x6f8   :  { %5418 = vmatpush3.bf16.msra.mxu1 %v5629_v53 }
 0x6f9   :  { %5449 = vmatprep.subr.bf16.mxu1 %v5764_v15 }
 0x7ae   :  { %v2263_v38 = vpop.f32.mrb[36].mxu1 }
 0x7af   :  { %v2270_v28 = vadd.f32 %v5738_v39, %v2263_v38  ;;  %v5393_v25 = vpop.f32.mrb[37].mxu1 }
 0x7b0   :  { %v2266_v31 = vpop.f32.mrb[38].mxu1 }
 0x7b1   :  { %v6295_v41 = vadd.f32 %v5019_v6, %v2270_v28  ;;  %v2271_v40 = vadd.f32 %v5739_v7, %v2266_v31  ;;  %v5394_v8 = vpop.f32.mrb[39].mxu1 }
 0x7b3   :  { %v6300_v36 = vadd.f32 %v5020_v30, %v2271_v40  ;;  %v2274_v35 = vsel %vm78_vm0, %v6295_v41, 0.0 }
 0x7b4   :  { %2275 = vadd.xlane.f32.xlu1 %v2274_v35 }
 0x7b5   :  { %v2277_v13 = vsel %vm78_vm0, %v6300_v36, 0.0 }
 0x7b6   :  { %2278 = vadd.xlane.f32.xlu0 %v2277_v13 }
 0x841   :  { %v2276_v37 = vpop.xlane.xlu1 %2275 }
 0x842   :  { %v2280_v42 = vmul.f32 0.03125, %v2276_v37  ;;  %v5025_v37 = vld [vmem:[%s6971_s3 + $0x50] sm:$0xff] }
 0x843   :  { %v2279_v47 = vpop.xlane.xlu0 %2278 }
 0x844   :  { %v2282_v33 = vsub.f32 %v6295_v41, %v2280_v42  ;;  %v2281_v34 = vmul.f32 0.03125, %v2279_v47  ;;  %v5026_v47 = vld [vmem:[%s6971_s3 + $0x58] sm:$0xff] }
 0x846   :  { %v2283_v46 = vsub.f32 %v6300_v36, %v2281_v34  ;;  %v2284_v49 = vmul.f32 %v2282_v33, %v2282_v33 }
 0x848   :  { %v2286_v48 = vsel %vm78_vm0, %v2284_v49, 0.0  ;;  %v2285_v50 = vmul.f32 %v2283_v46, %v2283_v46 }
 0x849   :  { %2287 = vadd.xlane.f32.xlu0 %v2286_v48 }
 0x84a   :  { %v2289_v24 = vsel %vm78_vm0, %v2285_v50, 0.0 }
 0x84d   :  { %2290 = vadd.xlane.f32.xlu0 %v2289_v24 }
 0x8d6   :  { %v2288_v57 = vpop.xlane.xlu0 %2287 }
 0x8d7   :  { %v2292_v58 = vmul.f32 0.03125, %v2288_v57 }
 0x8d9   :  { %v2294_v59 = vadd.f32 1e-05, %v2292_v58 }
 0x8da   :  { %v2291_v60 = vpop.xlane.xlu0 %2290 }
 0x8db   :  { %5682 = vrsqrt.f32 %v2294_v59  ;;  %v2293_v0 = vmul.f32 0.03125, %v2291_v60 }
 0x8dd   :  { %v2295_v1 = vadd.f32 1e-05, %v2293_v0 }
 0x8df   :  { %5684 = vrsqrt.f32 %v2295_v1 }
 0x8e5   :  { %v5683_v2 = vpop.eup %5682 }
 0x8e6   :  { %v2298_v44 = vmul.f32 %v5683_v2, %v2282_v33  ;;  %v5630_v2 = vld [vmem:[%s6969_s1 + $0x20] sm:$0xff]  }
 0x8e8   :  { %v2300_v5 = vmul.f32 %v5021_v3, %v2298_v44  ;;  %v5631_v44 = vld [vmem:[%s6969_s1 + $0x28] sm:$0xff]  }
 0x8e9   :  { %v5685_v4 = vpop.eup %5684 }
 0x8ea   :  { %v2299_v45 = vmul.f32 %v5685_v4, %v2283_v46  ;;  %v2302_v12 = vadd.f32 %v5023_v9, %v2300_v5 }
 0x8ec   :  { %v2301_v11 = vmul.f32 %v5022_v43, %v2299_v45 }
 0x8ee   :  { %v2303_v16 = vadd.f32 %v5024_v10, %v2301_v11  ;;  %v5104_v11 = vld [vmem:[%s6971_s3 + $0x60] sm:$0xff] }
 0x8f0   :  { %v2304_v17 = vpack.c.bf16 %v2303_v16, %v2302_v12 }
 0x8f2   :  { %5400 = vmatmul.mubr.msk.bf16.vlgmr.msra.gmra.mrb[32].mxu0 %vm78_vm0, %v2304_v17  ;;  %v5105_v17 = vld [vmem:[%s6971_s3 + $0x68] sm:$0xff] }
 0x8f3   :  { %5427 = vmatprep.mubr.msk.bf16.mxu0 %vm5765_vm1, %v5764_v15  ;;  %5424 = vmatpush3.bf16.msra.mxu0 %v5630_v2 }
 0x8f4   :  { %5425 = vmatprep.subr.bf16.mxu0 %v5764_v15 }
 0x8f7   :  { %5426 = vmatpush3.bf16.msra.mxu0 %v5631_v44 }
 0x8f8   :  { %5431 = vmatprep.subr.bf16.mxu0 %v5764_v15 }
 0x9c5   :  { %v2354_v21 = vpop.f32.mrb[32].mxu0 }
 0x9c6   :  { %v2355_v23 = vadd.f32 %v2354_v21, %v76_v19  ;;  %v5401_v29 = vpop.f32.mrb[33].mxu0 }
 0x9c7   :  { %v2357_v27 = vpop.f32.mrb[34].mxu0 }
 0x9c8   :  { %v2363_v20 = vmul.f32 0.70710677, %v2355_v23  ;;  %v2358_v6 = vadd.f32 %v2357_v27, %v77_v22  ;;  %v5402_v38 = vpop.f32.mrb[35].mxu0  ;;  %v2361_v31 = vmul.f32 0.5, %v2355_v23 }
 0x9ca   :  { %5686 = verf.f32 %v2363_v20  ;;  %v2364_v39 = vmul.f32 0.70710677, %v2358_v6  ;;  %v2362_v7 = vmul.f32 0.5, %v2358_v6 }
 0x9cc   :  { %5688 = verf.f32 %v2364_v39 }
 0x9d4   :  { %v5687_v28 = vpop.eup %5686 }
 0x9d5   :  { %v2367_v25 = vadd.f32 1.0, %v5687_v28 }
 0x9d6   :  { %v5689_v30 = vpop.eup %5688 }
 0x9d7   :  { %v2368_v40 = vadd.f32 1.0, %v5689_v30  ;;  %v2369_v8 = vmul.f32 %v2367_v25, %v2361_v31 }
 0x9d9   :  { %v2370_v35 = vmul.f32 %v2368_v40, %v2362_v7 }
 0x9db   :  { %v2371_v13 = vpack.c.bf16 %v2370_v35, %v2369_v8 }
 0x9dd   :  { %5420 = vmatmul.mubr.bf16.vlgmr.msra.gmra.mrb[40].mxu1 %v2371_v13 }
 0x9de   :  { %5451 = vmatprep.mubr.msk.bf16.mxu1 %vm5765_vm1, %v5764_v15 }
 0xab0   :  { %v2454_v42 = vpop.f32.mrb[40].mxu1 }
 0xab1   :  { %v2455_v33 = vadd.f32 %v5025_v37, %v2454_v42  ;;  %v5421_v34 = vpop.f32.mrb[41].mxu1 }
 0xab2   :  { %v2457_v46 = vpop.f32.mrb[42].mxu1 }
 0xab3   :  { %v6380_v49 = vadd.f32 %v2455_v33, %v6295_v41  ;;  %v2458_v48 = vadd.f32 %v5026_v47, %v2457_v46  ;;  %v5422_v50 = vpop.f32.mrb[43].mxu1 }
 0xab5   :  { %v6383_v24 = vadd.f32 %v2458_v48, %v6300_v36  ;;  %v2515_v26 = vsel %vm78_vm0, %v6380_v49, 0.0 }
 0xab6   :  { %2516 = vadd.xlane.f32.xlu1 %v2515_v26 }
 0xab7   :  { %v2518_v52 = vsel %vm78_vm0, %v6383_v24, 0.0 }
 0xab8   :  { %2519 = vadd.xlane.f32.xlu0 %v2518_v52 }
 0xb43   :  { %v2517_v54 = vpop.xlane.xlu1 %2516 }
 0xb44   :  { %v2521_v56 = vmul.f32 0.03125, %v2517_v54 }
 0xb45   :  { %v2520_v57 = vpop.xlane.xlu0 %2519 }
 0xb46   :  { %v2523_v58 = vsub.f32 %v6380_v49, %v2521_v56  ;;  %v2522_v41 = vmul.f32 0.03125, %v2520_v57 }
 0xb48   :  { %v2524_v59 = vsub.f32 %v6383_v24, %v2522_v41  ;;  %v2525_v60 = vmul.f32 %v2523_v58, %v2523_v58 }
 0xb4a   :  { %v2527_v36 = vsel %vm78_vm0, %v2525_v60, 0.0  ;;  %v2526_v0 = vmul.f32 %v2524_v59, %v2524_v59 }
 0xb4b   :  { %2528 = vadd.xlane.f32.xlu1 %v2527_v36 }
 0xb4c   :  { %v2530_v1 = vsel %vm78_vm0, %v2526_v0, 0.0 }
 0xb4d   :  { %2531 = vadd.xlane.f32.xlu0 %v2530_v1 }
 0xbd8   :  { %v2529_v3 = vpop.xlane.xlu1 %2528 }
 0xbd9   :  { %v2533_v4 = vmul.f32 0.03125, %v2529_v3 }
 0xbda   :  { %v2532_v43 = vpop.xlane.xlu0 %2531 }
 0xbdb   :  { %v2535_v5 = vadd.f32 1e-05, %v2533_v4  ;;  %v2534_v45 = vmul.f32 0.03125, %v2532_v43 }
 0xbdd   :  { %5690 = vrsqrt.f32 %v2535_v5  ;;  %v2536_v9 = vadd.f32 1e-05, %v2534_v45 }
 0xbdf   :  { %5692 = vrsqrt.f32 %v2536_v9 }
 0xbe7   :  { %v5691_v10 = vpop.eup %5690 }
 0xbe8   :  { %v2539_v12 = vmul.f32 %v5691_v10, %v2523_v58 }
 0xbe9   :  { %v5693_v16 = vpop.eup %5692 }
 0xbea   :  { %v2541_v61 = vmul.f32 %v5104_v11, %v2539_v12  ;;  %v2540_v62 = vmul.f32 %v5693_v16, %v2524_v59 }
 0xbec   :  { %v2542_v51 = vmul.f32 %v5105_v17, %v2540_v62  ;;  %v2543_v53 = vadd.f32 %v5106_v18, %v2541_v61 }
 0xbee   :  { %v2544_v19 = vadd.f32 %v5107_v14, %v2542_v51 }
 0xbf0   :  { %v2545_v21 = vpack.c.bf16 %v2544_v19, %v2543_v53 }
 0xbf2   :  { %5428 = vmatmul.mubr.msk.bf16.vlgmr.msra.gmra.mrb[36].mxu0 %vm78_vm0, %v2545_v21 }
 0xbf3   :  { %5433 = vmatprep.mubr.msk.bf16.mxu0 %vm5765_vm1, %v5764_v15 }
 0xcc5   :  { %v2595_v22 = vpop.f32.mrb[36].mxu0 }
 0xcc6   :  { %2610 = vrot.lane.b32.xlu0 %v2595_v22, %s5766_s9  ;;  %2604 = vrot.lane.b32.xlu1 %v2595_v22, %s5767_s10  ;;  %v5429_v23 = vpop.f32.mrb[37].mxu0 }
 0xcc7   :  { %v6418_v29 = vpop.f32.mrb[38].mxu0 }
 0xcc8   :  { %v5430_v27 = vpop.f32.mrb[39].mxu0 }
 0xcca   :  { %2616 = vrot.lane.b32.xlu1 %v2595_v22, %s5768_s11  ;;  %2618 = vrot.lane.b32.xlu0 %v6418_v29, %s5768_s11 }
 0xcce   :  { %2606 = vrot.lane.b32.xlu1 %v6418_v29, %s5767_s10 }
 0xcd2   :  { %2612 = vrot.lane.b32.xlu1 %v6418_v29, %s5766_s9 }
 0xcd6   :  { %2902 = vrot.lane.b32.xlu1 %v2595_v22, %s5769_s12 }
 0xd38   :  { %v6428_v20 = vpop.permute.xlu0 %2610  ;;  %v6430_v6 = vpop.permute.xlu1 %2604 }
 0xd39   :  { %2906 = vrot.lane.b32.xlu0 %v6430_v6, %s5769_s12  ;;  %2910 = vrot.lane.b32.xlu1 %v6428_v20, %s5769_s12  ;;  %v2622_v7 = vcombine.low %v2595_v22, %v6428_v20  ;;  %v2623_v40 = vcombine.high %v2595_v22, %v6428_v20 }
 0xd3b   :  { %v2630_v13 = vrot.slane %v2622_v7, %v5900_v55  ;;  %v2637_v37 = vrot.slane %v2623_v40, %v5900_v55 }
 0xd3c   :  { %v6436_v38 = vpop.permute.xlu1 %2616  ;;  %v6446_v28 = vpop.permute.xlu0 %2618 }
 0xd3d   :  { %2914 = vrot.lane.b32.xlu0 %v6436_v38, %s5769_s12  ;;  %2904 = vrot.lane.b32.xlu1 %v6418_v29, %s5769_s12  ;;  %v2638_v30 = vcombine.low %v6430_v6, %v6436_v38  ;;  %v2639_v31 = vcombine.high %v6430_v6, %v6436_v38 }
 0xd3f   :  { %v2646_v8 = vrot.slane %v2638_v30, %v5900_v55  ;;  %v2653_v35 = vrot.slane %v2639_v31, %v5900_v55 }
 0xd40   :  { %v6442_v39 = vpop.permute.xlu1 %2606 }
 0xd41   :  { %2908 = vrot.lane.b32.xlu0 %v6442_v39, %s5769_s12  ;;  %v2654_v42 = vcombine.low %v2630_v13, %v2646_v8  ;;  %v2655_v47 = vcombine.high %v2630_v13, %v2646_v8  ;;  %v2670_v33 = vcombine.low %v2637_v37, %v2653_v35  ;;  %v2671_v34 = vcombine.high %v2637_v37, %v2653_v35 }
 0xd42   :  { %v2706_v57 = vcombine.low %v6442_v39, %v6446_v28  ;;  %v2707_v58 = vcombine.high %v6442_v39, %v6446_v28 }
 0xd43   :  { %v2662_v46 = vrot.slane %v2654_v42, %v5911_v63  ;;  %v2669_v48 = vrot.slane %v2655_v47, %v5911_v63  ;;  %v2678_v50 = vrot.slane %v2670_v33, %v5911_v63  ;;  %v2685_v26 = vrot.slane %v2671_v34, %v5911_v63 }
 0xd44   :  { %v6448_v25 = vpop.permute.xlu1 %2612  ;;  %v2714_v3 = vrot.slane %v2706_v57, %v5900_v55  ;;  %v2721_v4 = vrot.slane %v2707_v58, %v5900_v55 }
 0xd45   :  { %2916 = vrot.lane.b32.xlu0 %v6446_v28, %s5769_s12  ;;  %2912 = vrot.lane.b32.xlu1 %v6448_v25, %s5769_s12  ;;  %v2690_v52 = vcombine.low %v6418_v29, %v6448_v25  ;;  %v2691_v54 = vcombine.high %v6418_v29, %v6448_v25  ;;  %v2758_v41 = vcombine.low %v2662_v46, %v2669_v48 }
 0xd46   :  { %v5121_v59 = vcombine.high %v2662_v46, %v2669_v48  ;;  %v2774_v60 = vcombine.low %v2678_v50, %v2685_v26  ;;  %v5122_v36 = vcombine.high %v2678_v50, %v2685_v26 }
 0xd47   :  { %v2698_v0 = vrot.slane %v2690_v52, %v5900_v55  ;;  %v2705_v1 = vrot.slane %v2691_v54, %v5900_v55  ;;  %v2765_v43 = vrot.slane %v2758_v41, %v5900_v55 }
 0xd48   :  { %v2903_v56 = vpop.permute.xlu1 %2902  ;;  %v2773_v5 = vrot.slane %v5121_v59, %v5900_v55  ;;  %v2781_v45 = vrot.slane %v2774_v60, %v5900_v55  ;;  %v2789_v9 = vrot.slane %v5122_v36, %v5900_v55 }
 0xd49   :  { %3206 = vrot.lane.b32.xlu1 %v2595_v22, %s5773_s13  ;;  %v2722_v12 = vcombine.low %v2698_v0, %v2714_v3  ;;  %v2723_v16 = vcombine.high %v2698_v0, %v2714_v3  ;;  %v2738_v17 = vcombine.low %v2705_v1, %v2721_v4  ;;  %v2739_v61 = vcombine.high %v2705_v1, %v2721_v4 }
 0xd4a   :  { %v2790_v51 = vcombine.low %v2765_v43, %v2773_v5  ;;  %v2806_v53 = vcombine.low %v2781_v45, %v2789_v9  ;;  %v2791_v19 = vcombine.high %v2765_v43, %v2773_v5  ;;  %v2807_v21 = vcombine.high %v2781_v45, %v2789_v9 }
 0xd4b   :  { %v2730_v31 = vrot.slane %v2722_v12, %v5911_v63  ;;  %v2737_v7 = vrot.slane %v2723_v16, %v5911_v63  ;;  %v6492_v40 = vrot.slane %v2738_v17, %v5911_v63  ;;  %v6495_v8 = vrot.slane %v2739_v61, %v5911_v63 }
 0xd4c   :  { %v6498_v34 = vrot.slane %v2790_v51, %v5911_v63  ;;  %v6501_v46 = vrot.slane %v2806_v53, %v5911_v63  ;;  %v6504_v48 = vrot.slane %v2791_v19, %v5911_v63  ;;  %v6507_v50 = vrot.slane %v2807_v21, %v5911_v63 }
 0xd4d   :  { %v2826_v57 = vcombine.low %v2730_v31, %v2737_v7  ;;  %v5123_v58 = vcombine.high %v2730_v31, %v2737_v7  ;;  %v2842_v41 = vcombine.low %v6492_v40, %v6495_v8  ;;  %v5124_v59 = vcombine.high %v6492_v40, %v6495_v8 }
 0xdab   :  { %v2907_v2 = vpop.permute.xlu0 %2906  ;;  %v2911_v44 = vpop.permute.xlu1 %2910 }
 0xdac   :  { %v2926_v10 = vcombine.low %v2903_v56, %v2911_v44  ;;  %v2927_v11 = vcombine.high %v2903_v56, %v2911_v44 }
 0xdae   :  { %v2934_v22 = vrot.slane %v2926_v10, %v5900_v55  ;;  %v2941_v23 = vrot.slane %v2927_v11, %v5900_v55 }
 0xdaf   :  { %v2915_v62 = vpop.permute.xlu0 %2914  ;;  %v2905_v33 = vpop.permute.xlu1 %2904 }
 0xdb0   :  { %v2942_v18 = vcombine.low %v2907_v2, %v2915_v62  ;;  %v2943_v14 = vcombine.high %v2907_v2, %v2915_v62 }
 0xdb2   :  { %v2950_v27 = vrot.slane %v2942_v18, %v5900_v55  ;;  %v2957_v30 = vrot.slane %v2943_v14, %v5900_v55 }
 0xdb3   :  { %v2909_v35 = vpop.permute.xlu0 %2908 }
 0xdb4   :  { %v2958_v13 = vcombine.low %v2934_v22, %v2950_v27  ;;  %v2959_v37 = vcombine.high %v2934_v22, %v2950_v27  ;;  %v2974_v42 = vcombine.low %v2941_v23, %v2957_v30  ;;  %v2975_v47 = vcombine.high %v2941_v23, %v2957_v30 }
 0xdb6   :  { %v2966_v26 = vrot.slane %v2958_v13, %v5911_v63  ;;  %v2973_v52 = vrot.slane %v2959_v37, %v5911_v63  ;;  %v2982_v54 = vrot.slane %v2974_v42, %v5911_v63  ;;  %v2989_v56 = vrot.slane %v2975_v47, %v5911_v63 }
 0xdb7   :  { %v2917_v60 = vpop.permute.xlu0 %2916  ;;  %v2913_v44 = vpop.permute.xlu1 %2912  ;;  %v6534_v13 = vrot.slane %v2826_v57, %v5900_v55  ;;  %v2841_v37 = vrot.slane %v5123_v58, %v5900_v55 }
 0xdb8   :  { %v3062_v36 = vcombine.low %v2966_v26, %v2973_v52  ;;  %v5125_v0 = vcombine.high %v2966_v26, %v2973_v52  ;;  %v3078_v1 = vcombine.low %v2982_v54, %v2989_v56  ;;  %v5126_v2 = vcombine.high %v2982_v54, %v2989_v56 }
 0xdb9   :  { %v3010_v3 = vcombine.low %v2909_v35, %v2917_v60  ;;  %v3011_v4 = vcombine.high %v2909_v35, %v2917_v60  ;;  %v2994_v43 = vcombine.low %v2905_v33, %v2913_v44  ;;  %v2995_v5 = vcombine.high %v2905_v33, %v2913_v44 }
 0xdba   :  { %v3069_v45 = vrot.slane %v3062_v36, %v5900_v55  ;;  %v3077_v9 = vrot.slane %v5125_v0, %v5900_v55  ;;  %v3085_v10 = vrot.slane %v3078_v1, %v5900_v55  ;;  %v3093_v11 = vrot.slane %v5126_v2, %v5900_v55 }
 0xdbb   :  { %v3018_v12 = vrot.slane %v3010_v3, %v5900_v55  ;;  %v3025_v16 = vrot.slane %v3011_v4, %v5900_v55  ;;  %v3002_v17 = vrot.slane %v2994_v43, %v5900_v55  ;;  %v3009_v61 = vrot.slane %v2995_v5, %v5900_v55 }
 0xdbc   :  { %v3094_v62 = vcombine.low %v3069_v45, %v3077_v9  ;;  %v3110_v18 = vcombine.low %v3085_v10, %v3093_v11  ;;  %v3095_v14 = vcombine.high %v3069_v45, %v3077_v9  ;;  %v3111_v51 = vcombine.high %v3085_v10, %v3093_v11 }
 0xdbd   :  { %v3026_v53 = vcombine.low %v3002_v17, %v3018_v12  ;;  %v3027_v19 = vcombine.high %v3002_v17, %v3018_v12  ;;  %v3042_v21 = vcombine.low %v3009_v61, %v3025_v16  ;;  %v3043_v22 = vcombine.high %v3009_v61, %v3025_v16 }
 0xdbe   :  { %v3102_v23 = vrot.slane %v3094_v62, %v5911_v63  ;;  %v3118_v27 = vrot.slane %v3110_v18, %v5911_v63  ;;  %v3109_v30 = vrot.slane %v3095_v14, %v5911_v63  ;;  %v3125_v31 = vrot.slane %v3111_v51, %v5911_v63 }
 0xdbf   :  { %v3034_v7 = vrot.slane %v3026_v53, %v5911_v63  ;;  %v3041_v40 = vrot.slane %v3027_v19, %v5911_v63  ;;  %v3050_v8 = vrot.slane %v3042_v21, %v5911_v63  ;;  %v3057_v35 = vrot.slane %v3043_v22, %v5911_v63 }
 0xdc0   :  { %v3126_v42 = vcombine.low %v3102_v23, %v3118_v27  ;;  %v3129_v47 = vcombine.high %v3109_v30, %v3125_v31  ;;  %v2849_v56 = vrot.slane %v2842_v41, %v5900_v55  ;;  %v2857_v60 = vrot.slane %v5124_v59, %v5900_v55 }
 0xdc1   :  { %v3130_v33 = vcombine.low %v3034_v7, %v3041_v40  ;;  %v5127_v26 = vcombine.high %v3034_v7, %v3041_v40  ;;  %v3146_v52 = vcombine.low %v3050_v8, %v3057_v35  ;;  %v5128_v54 = vcombine.high %v3050_v8, %v3057_v35 }
 0xdc2   :  { %v3198_v36 = vpack.c.bf16 %v3126_v42, %v3126_v42  ;;  %v3201_v0 = vpack.c.bf16 %v3129_v47, %v3129_v47  ;;  %v3127_v4 = vcombine.high %v3102_v23, %v3118_v27  ;;  %v2822_v5 = vcombine.low %v6498_v34, %v6501_v46 }
 0xdc3   :  { %v3137_v1 = vrot.slane %v3130_v33, %v5900_v55  ;;  %v3145_v2 = vrot.slane %v5127_v26, %v5900_v55  ;;  %v3153_v57 = vrot.slane %v3146_v52, %v5900_v55  ;;  %v3161_v58 = vrot.slane %v5128_v54, %v5900_v55 }
 0xdc4   :  { %v3514_v44 = vsel %vm1075_vm2, %v3198_v36, 0  ;;  %v3652_v3 = vsel %vm1075_vm2, %v3201_v0, 0  ;;  %v2825_v45 = vcombine.high %v6504_v48, %v6507_v50  ;;  %v2858_v12 = vcombine.low %v6534_v13, %v2841_v37 }
 0xdc5   :  { %5432 = vmatpush3.bf16.xpose.msra.mxu0 %v3514_v44  ;;  %5450 = vmatpush3.bf16.xpose.msra.mxu1 %v3652_v3  ;;  %v3162_v41 = vcombine.low %v3137_v1, %v3145_v2  ;;  %v3178_v43 = vcombine.low %v3153_v57, %v3161_v58  ;;  %v3163_v59 = vcombine.high %v3137_v1, %v3145_v2 }
 0xdc6   :  { %5437 = vmatprep.subr.bf16.mxu0 %v5764_v15  ;;  %5461 = vmatprep.subr.bf16.mxu1 %v5764_v15  ;;  %v3179_v9 = vcombine.high %v3153_v57, %v3161_v58  ;;  %v2874_v16 = vcombine.low %v2849_v56, %v2857_v60  ;;  %v3199_v17 = vpack.c.bf16 %v3127_v4, %v3127_v4 }
 0xdc7   :  { %v3170_v10 = vrot.slane %v3162_v41, %v5911_v63  ;;  %v3186_v11 = vrot.slane %v3178_v43, %v5911_v63  ;;  %v3177_v62 = vrot.slane %v3163_v59, %v5911_v63  ;;  %v2894_v14 = vpack.c.bf16 %v2822_v5, %v2822_v5 }
 0xdc8   :  { %v3193_v18 = vrot.slane %v3179_v9, %v5911_v63  ;;  %v2897_v51 = vpack.c.bf16 %v2825_v45, %v2825_v45  ;;  %v2866_v19 = vrot.slane %v2858_v12, %v5911_v63  ;;  %v2882_v21 = vrot.slane %v2874_v16, %v5911_v63 }
 0xdc9   :  { %v3195_v61 = vcombine.high %v3170_v10, %v3186_v11  ;;  %v3560_v22 = vsel %vm1075_vm2, %v3199_v17, 0  ;;  %v3128_v23 = vcombine.low %v3109_v30, %v3125_v31  ;;  %v2823_v40 = vcombine.high %v6498_v34, %v6501_v46 }
 0xdca   :  { %v3197_v7 = vcombine.high %v3177_v62, %v3193_v18  ;;  %v2891_v8 = vcombine.high %v2866_v19, %v2882_v21  ;;  %v2859_v30 = vcombine.high %v6534_v13, %v2841_v37  ;;  %v2875_v31 = vcombine.high %v2849_v56, %v2857_v60 }
 0xdcb   :  { %v3203_v53 = vpack.c.bf16 %v3195_v61, %v3195_v61  ;;  %v3200_v35 = vpack.c.bf16 %v3128_v23, %v3128_v23  ;;  %v2895_v47 = vpack.c.bf16 %v2823_v40, %v2823_v40  ;;  %v3194_v46 = vcombine.low %v3170_v10, %v3186_v11 }
 0xdcc   :  { %5434 = vmatmul.mubr.msk.bf16.vlgmr.msra.gmra.mrb[40].mxu0 %vm1075_vm2, %v2894_v14  ;;  %5452 = vmatmul.mubr.msk.bf16.vlgmr.msra.gmra.mrb[44].mxu1 %vm1075_vm2, %v2897_v51  ;;  %v3205_v42 = vpack.c.bf16 %v3197_v7, %v3197_v7  ;;  %v2899_v33 = vpack.c.bf16 %v2891_v8, %v2891_v8  ;;  %v2873_v26 = vrot.slane %v2859_v30, %v5911_v63 }
 0xdcd   :  { %5438 = vmatpush3.bf16.xpose.msra.mxu0 %v3560_v22  ;;  %v3744_v27 = vsel %vm1075_vm2, %v3203_v53, 0  ;;  %5439 = vmatprep.mubr.msk.bf16.mxu0 %vm5765_vm1, %v5764_v15  ;;  %v2889_v52 = vrot.slane %v2875_v31, %v5911_v63  ;;  %v3606_v34 = vsel %vm1075_vm2, %v3200_v35, 0  ;;  %v2824_v13 = vcombine.low %v6504_v48, %v6507_v50 }
 0xdce   :  { %5462 = vmatpush3.bf16.xpose.msra.mxu1 %v3744_v27  ;;  %5463 = vmatprep.mubr.msk.bf16.mxu1 %vm5765_vm1, %v5764_v15  ;;  %v3836_v54 = vsel %vm1075_vm2, %v3205_v42, 0  ;;  %v3202_v56 = vpack.c.bf16 %v3194_v46, %v3194_v46  ;;  %v3196_v1 = vcombine.low %v3177_v62, %v3193_v18  ;;  %v2890_v48 = vcombine.low %v2866_v19, %v2882_v21 }
 0xdcf   :  { %5443 = vmatprep.subr.bf16.mxu0 %v5764_v15  ;;  %5473 = vmatprep.subr.bf16.mxu1 %v5764_v15  ;;  %v2893_v37 = vcombine.high %v2873_v26, %v2889_v52  ;;  %v2896_v60 = vpack.c.bf16 %v2824_v13, %v2824_v13  ;;  %v2892_v58 = vcombine.low %v2873_v26, %v2889_v52 }
 0xdd0   :  { %v3698_v0 = vsel %vm1075_vm2, %v3202_v56, 0  ;;  %v3204_v50 = vpack.c.bf16 %v3196_v1, %v3196_v1  ;;  %v2898_v2 = vpack.c.bf16 %v2890_v48, %v2890_v48 }
 0xdd1   :  { %v2901_v36 = vpack.c.bf16 %v2893_v37, %v2893_v37  ;;  %v2900_v44 = vpack.c.bf16 %v2892_v58, %v2892_v58 }
 0xdd2   :  { %v3790_v57 = vsel %vm1075_vm2, %v3204_v50, 0  ;;  %v3207_v50 = vpop.permute.xlu1 %3206 }
 0xdd4   :  { %5440 = vmatmul.mubr.msk.bf16.vlgmr.msra.gmra.mrb[44].mxu0 %vm1075_vm2, %v2895_v47 }
 0xdd5   :  { %5464 = vmatmul.mubr.msk.bf16.vlgmr.msra.gmra.mrb[48].mxu1 %vm1075_vm2, %v2899_v33  ;;  %5444 = vmatpush3.bf16.xpose.msra.mxu0 %v3606_v34 }
 0xdd6   :  { %5474 = vmatpush3.bf16.xpose.msra.mxu1 %v3836_v54  ;;  %5445 = vmatprep.mubr.msk.bf16.mxu0 %vm5765_vm1, %v5764_v15 }
 0xdd7   :  { %5475 = vmatprep.mubr.msk.bf16.mxu1 %vm5765_vm1, %v5764_v15  ;;  %5455 = vmatprep.subr.bf16.mxu0 %v5764_v15 }
 0xdd8   :  { %5485 = vmatprep.subr.bf16.mxu1 %v5764_v15 }
 0xddc   :  { %5446 = vmatmul.mubr.msk.bf16.vlgmr.msra.gmra.mrb[48].mxu0 %vm1075_vm2, %v2896_v60 }
 0xddd   :  { %5476 = vmatmul.mubr.msk.bf16.vlgmr.msra.gmra.mrb[52].mxu1 %vm1075_vm2, %v2901_v36  ;;  %5456 = vmatpush3.bf16.xpose.msra.mxu0 %v3698_v0 }
 0xdde   :  { %5457 = vmatprep.mubr.msk.bf16.mxu0 %vm5765_vm1, %v5764_v15  ;;  %5467 = vmatprep.subr.bf16.mxu0 %v5764_v15 }
 0xddf   :  { %5487 = vmatprep.mubr.msk.bf16.mxu1 %vm5765_vm1, %v5764_v15 }
 0xde4   :  { %5458 = vmatmul.mubr.msk.bf16.vlgmr.msra.gmra.mrb[52].mxu0 %vm1075_vm2, %v2898_v2 }
 0xde5   :  { %5468 = vmatpush3.bf16.xpose.msra.mxu0 %v3790_v57  ;;  %5469 = vmatprep.mubr.msk.bf16.mxu0 %vm5765_vm1, %v5764_v15 }
 0xde6   :  { %5479 = vmatprep.subr.bf16.mxu0 %v5764_v15 }
 0xdec   :  { %5470 = vmatmul.mubr.msk.bf16.vlgmr.msra.gmra.mrb[56].mxu0 %vm1075_vm2, %v2900_v44 }
 0xded   :  { %5481 = vmatprep.mubr.msk.bf16.mxu0 %vm5765_vm1, %v5764_v15 }
 0xe9f   :  { %v3550_v3 = vpop.f32.mrb[40].mxu0  ;;  %v3688_v4 = vpop.f32.mrb[44].mxu1 }
 0xea0   :  { %v6602_v41 = vadd.f32 %v3550_v3, %v6061_v32  ;;  %v6605_v43 = vadd.f32 %v3688_v4, %v6061_v32  ;;  %v5435_v59 = vpop.f32.mrb[41].mxu0  ;;  %v5453_v5 = vpop.f32.mrb[45].mxu1 }
 0xea1   :  { %v3553_v45 = vpop.f32.mrb[42].mxu0  ;;  %v3691_v9 = vpop.f32.mrb[46].mxu1 }
 0xea2   :  { %v5436_v10 = vpop.f32.mrb[43].mxu0  ;;  %v5454_v11 = vpop.f32.mrb[47].mxu1  ;;  %v3878_v12 = vsel %vm1075_vm2, %v6602_v41, -inf  ;;  %v3887_v16 = vsel %vm1075_vm2, %v6605_v43, -inf }
 0xea3   :  { %3879 = vmax.xlane.f32.xlu1 %v3878_v12  ;;  %3888 = vmax.xlane.f32.xlu0 %v3887_v16 }
 0xea7   :  { %v3596_v17 = vpop.f32.mrb[44].mxu0 }
 0xea8   :  { %v3597_v61 = vadd.f32 %v3596_v17, %v6061_v32  ;;  %v3780_v62 = vpop.f32.mrb[48].mxu1  ;;  %v5441_v18 = vpop.f32.mrb[45].mxu0 }
 0xea9   :  { %v5465_v14 = vpop.f32.mrb[49].mxu1  ;;  %v3599_v51 = vpop.f32.mrb[46].mxu0  ;;  %v3781_v53 = vadd.f32 %v3780_v62, %v6061_v32 }
 0xeaa   :  { %v3783_v19 = vpop.f32.mrb[50].mxu1  ;;  %v5442_v21 = vpop.f32.mrb[47].mxu0  ;;  %v3881_v22 = vsel %vm1075_vm2, %v3597_v61, -inf }
 0xeab   :  { %v5466_v23 = vpop.f32.mrb[51].mxu1  ;;  %3882 = vmax.xlane.f32.xlu0 %v3881_v22  ;;  %v3893_v27 = vsel %vm1075_vm2, %v3781_v53, -inf }
 0xeaf   :  { %v3642_v7 = vpop.f32.mrb[48].mxu0  ;;  %3894 = vmax.xlane.f32.xlu0 %v3893_v27 }
 0xeb0   :  { %v3643_v40 = vadd.f32 %v3642_v7, %v6061_v32  ;;  %v3872_v8 = vpop.f32.mrb[52].mxu1  ;;  %v5447_v30 = vpop.f32.mrb[49].mxu0 }
 0xeb1   :  { %v5477_v31 = vpop.f32.mrb[53].mxu1  ;;  %v3645_v35 = vpop.f32.mrb[50].mxu0  ;;  %v6617_v42 = vadd.f32 %v3872_v8, %v6061_v32 }
 0xeb2   :  { %v3875_v47 = vpop.f32.mrb[54].mxu1  ;;  %v5448_v33 = vpop.f32.mrb[51].mxu0  ;;  %v3884_v26 = vsel %vm1075_vm2, %v3643_v40, -inf }
 0xeb3   :  { %v5478_v52 = vpop.f32.mrb[55].mxu1  ;;  %3885 = vmax.xlane.f32.xlu0 %v3884_v26  ;;  %v3899_v34 = vsel %vm1075_vm2, %v6617_v42, -inf }
 0xeb4   :  { %3214 = vrot.lane.b32.xlu1 %v6428_v20, %s5773_s13 }
 0xeb7   :  { %v3734_v46 = vpop.f32.mrb[52].mxu0  ;;  %3900 = vmax.xlane.f32.xlu0 %v3899_v34 }
 0xeb8   :  { %3218 = vrot.lane.b32.xlu1 %v6436_v38, %s5773_s13  ;;  %v5459_v54 = vpop.f32.mrb[53].mxu0  ;;  %v6629_v20 = vadd.f32 %v3734_v46, %v6061_v32 }
 0xeb9   :  { %v3737_v13 = vpop.f32.mrb[54].mxu0 }
 0xeba   :  { %v5460_v37 = vpop.f32.mrb[55].mxu0  ;;  %v3890_v48 = vsel %vm1075_vm2, %v6629_v20, -inf }
 0xebf   :  { %v3826_v56 = vpop.f32.mrb[56].mxu0 }
 0xec0   :  { %v5471_v60 = vpop.f32.mrb[57].mxu0  ;;  %v6632_v1 = vadd.f32 %v3826_v56, %v6061_v32 }
 0xec1   :  { %v3829_v36 = vpop.f32.mrb[58].mxu0 }
 0xec2   :  { %v5472_v0 = vpop.f32.mrb[59].mxu0  ;;  %v3896_v38 = vsel %vm1075_vm2, %v6632_v1, -inf }
 0xecd   :  { %3210 = vrot.lane.b32.xlu0 %v6430_v6, %s5773_s13 }
 0xedc   :  { %3891 = vmax.xlane.f32.xlu1 %v3890_v48 }
 0xee0   :  { %3897 = vmax.xlane.f32.xlu1 %v3896_v38 }
 0xef1   :  { %3208 = vrot.lane.b32.xlu1 %v6418_v29, %s5773_s13 }
 0xf30   :  { %v3880_v2 = vpop.xlane.xlu1 %3879  ;;  %v3889_v6 = vpop.xlane.xlu0 %3888 }
 0xf31   :  { %v3902_v57 = vsub.f32 %v6602_v41, %v3880_v2  ;;  %v3905_v58 = vsub.f32 %v6605_v43, %v3889_v6 }
 0xf33   :  { %v3910_v32 = vmul.f32 1.442695, %v3902_v57  ;;  %v3916_v44 = vmul.f32 1.442695, %v3905_v58 }
 0xf34   :  { %v3215_v16 = vpop.permute.xlu1 %3214 }
 0xf35   :  { %5694 = vpow2.f32 %v3910_v32  ;;  %v3230_v18 = vcombine.low %v3207_v50, %v3215_v16  ;;  %v3231_v14 = vcombine.high %v3207_v50, %v3215_v16 }
 0xf36   :  { %5696 = vpow2.f32 %v3916_v44 }
 0xf37   :  { %v3238_v27 = vrot.slane %v3230_v18, %v5900_v55  ;;  %v3245_v7 = vrot.slane %v3231_v14, %v5900_v55 }
 0xf38   :  { %v3883_v3 = vpop.xlane.xlu0 %3882  ;;  %v3219_v51 = vpop.permute.xlu1 %3218 }
 0xf39   :  { %v3903_v4 = vsub.f32 %v3597_v61, %v3883_v3 }
 0xf3b   :  { %v3912_v59 = vmul.f32 1.442695, %v3903_v4 }
 0xf3c   :  { %v3895_v5 = vpop.xlane.xlu0 %3894 }
 0xf3d   :  { %5698 = vpow2.f32 %v3912_v59  ;;  %v3907_v45 = vsub.f32 %v3781_v53, %v3895_v5 }
 0xf3f   :  { %v6642_v9 = vpop.eup %5694  ;;  %v3920_v29 = vmul.f32 1.442695, %v3907_v45 }
 0xf40   :  { %v6644_v10 = vpop.eup %5696  ;;  %v3886_v11 = vpop.xlane.xlu0 %3885  ;;  %v3926_v41 = vsel %vm1075_vm2, %v6642_v9, 0.0 }
 0xf41   :  { %5700 = vpow2.f32 %v3920_v29  ;;  %v3904_v43 = vsub.f32 %v3643_v40, %v3886_v11  ;;  %3927 = vadd.xlane.f32.xlu1 %v3926_v41  ;;  %v3935_v12 = vsel %vm1075_vm2, %v6644_v10, 0.0 }
 0xf42   :  { %3936 = vadd.xlane.f32.xlu0 %v3935_v12 }
 0xf43   :  { %v3914_v17 = vmul.f32 1.442695, %v3904_v43 }
 0xf44   :  { %v6650_v61 = vpop.xlane.xlu0 %3900 }
 0xf45   :  { %5702 = vpow2.f32 %v3914_v17 }
 0xf47   :  { %v6652_v62 = vpop.eup %5698 }
 0xf48   :  { %v3211_v53 = vpop.permute.xlu0 %3210  ;;  %v3929_v19 = vsel %vm1075_vm2, %v6652_v62, 0.0 }
 0xf49   :  { %v3246_v21 = vcombine.low %v3211_v53, %v3219_v51  ;;  %v3247_v22 = vcombine.high %v3211_v53, %v3219_v51  ;;  %3930 = vadd.xlane.f32.xlu0 %v3929_v19 }
 0xf4b   :  { %v6656_v23 = vpop.eup %5700  ;;  %v3254_v40 = vrot.slane %v3246_v21, %v5900_v55  ;;  %v3261_v8 = vrot.slane %v3247_v22, %v5900_v55 }
 0xf4c   :  { %v3941_v30 = vsel %vm1075_vm2, %v6656_v23, 0.0 }
 0xf4d   :  { %v3262_v31 = vcombine.low %v3238_v27, %v3254_v40  ;;  %v3263_v35 = vcombine.high %v3238_v27, %v3254_v40  ;;  %v3278_v47 = vcombine.low %v3245_v7, %v3261_v8  ;;  %v3279_v33 = vcombine.high %v3245_v7, %v3261_v8  ;;  %3942 = vadd.xlane.f32.xlu0 %v3941_v30 }
 0xf4f   :  { %v6664_v26 = vpop.eup %5702  ;;  %v3270_v52 = vrot.slane %v3262_v31, %v5911_v63  ;;  %v3277_v34 = vrot.slane %v3263_v35, %v5911_v63  ;;  %v3286_v46 = vrot.slane %v3278_v47, %v5911_v63  ;;  %v3293_v54 = vrot.slane %v3279_v33, %v5911_v63 }
 0xf50   :  { %v3932_v13 = vsel %vm1075_vm2, %v6664_v26, 0.0 }
 0xf51   :  { %v3366_v37 = vcombine.low %v3270_v52, %v3277_v34  ;;  %v5129_v56 = vcombine.high %v3270_v52, %v3277_v34  ;;  %v3382_v60 = vcombine.low %v3286_v46, %v3293_v54  ;;  %v5130_v36 = vcombine.high %v3286_v46, %v3293_v54  ;;  %3933 = vadd.xlane.f32.xlu1 %v3932_v13 }
 0xf53   :  { %v3373_v0 = vrot.slane %v3366_v37, %v5900_v55  ;;  %v3381_v48 = vrot.slane %v5129_v56, %v5900_v55  ;;  %v3389_v38 = vrot.slane %v3382_v60, %v5900_v55  ;;  %v3397_v50 = vrot.slane %v5130_v36, %v5900_v55 }
 0xf55   :  { %v3398_v2 = vcombine.low %v3373_v0, %v3381_v48  ;;  %v3414_v6 = vcombine.low %v3389_v38, %v3397_v50  ;;  %v3399_v57 = vcombine.high %v3373_v0, %v3381_v48  ;;  %v3415_v58 = vcombine.high %v3389_v38, %v3397_v50 }
 0xf57   :  { %v3406_v32 = vrot.slane %v3398_v2, %v5911_v63  ;;  %v3422_v44 = vrot.slane %v3414_v6, %v5911_v63  ;;  %v3413_v3 = vrot.slane %v3399_v57, %v5911_v63  ;;  %v3429_v4 = vrot.slane %v3415_v58, %v5911_v63 }
 0xf59   :  { %v3430_v59 = vcombine.low %v3406_v32, %v3422_v44  ;;  %v3431_v5 = vcombine.high %v3406_v32, %v3422_v44  ;;  %v3432_v45 = vcombine.low %v3413_v3, %v3429_v4  ;;  %v3433_v29 = vcombine.high %v3413_v3, %v3429_v4 }
 0xf5b   :  { %v3502_v11 = vpack.c.bf16 %v3430_v59, %v3430_v59  ;;  %v3503_v41 = vpack.c.bf16 %v3431_v5, %v3431_v5  ;;  %v3504_v35 = vpack.c.bf16 %v3432_v45, %v3432_v45  ;;  %v3505_v34 = vpack.c.bf16 %v3433_v29, %v3433_v29 }
 0xf5d   :  { %v3978_v43 = vsel %vm1543_vm4, %v3502_v11, 0  ;;  %v4024_v12 = vsel %vm1543_vm4, %v3503_v41, 0  ;;  %v4070_v47 = vsel %vm1543_vm4, %v3504_v35, 0  ;;  %v4116_v54 = vsel %vm1543_vm4, %v3505_v34, 0 }
 0xf5e   :  { %5480 = vmatpush3.bf16.msra.mxu0 %v3978_v43  ;;  %5486 = vmatpush3.bf16.msra.mxu1 %v4024_v12 }
 0xf5f   :  { %5491 = vmatprep.subr.bf16.mxu0 %v5764_v15  ;;  %5497 = vmatprep.subr.bf16.mxu1 %v5764_v15 }
 0xf62   :  { %3216 = vrot.lane.b32.xlu1 %v6448_v25, %s5773_s13 }
 0xf66   :  { %3220 = vrot.lane.b32.xlu1 %v6446_v28, %s5773_s13 }
 0xf69   :  { %v3892_v16 = vpop.xlane.xlu1 %3891 }
 0xf6a   :  { %v3906_v17 = vsub.f32 %v6629_v20, %v3892_v16  ;;  %v3909_v20 = vsub.f32 %v6617_v42, %v6650_v61 }
 0xf6c   :  { %v3918_v18 = vmul.f32 1.442695, %v3906_v17 }
 0xf6d   :  { %v3898_v14 = vpop.xlane.xlu1 %3897 }
 0xf6e   :  { %5704 = vpow2.f32 %v3918_v18  ;;  %v3908_v51 = vsub.f32 %v6632_v1, %v3898_v14  ;;  %v3924_v1 = vmul.f32 1.442695, %v3909_v20 }
 0xf70   :  { %v3922_v19 = vmul.f32 1.442695, %v3908_v51 }
 0xf71   :  { %v3209_v7 = vpop.permute.xlu1 %3208 }
 0xf72   :  { %5706 = vpow2.f32 %v3922_v19 }
 0xf73   :  { %5708 = vpow2.f32 %v3924_v1 }
 0xf78   :  { %v6690_v53 = vpop.eup %5704 }
 0xf79   :  { %v3938_v21 = vsel %vm1075_vm2, %v6690_v53, 0.0 }
 0xf7a   :  { %3939 = vadd.xlane.f32.xlu0 %v3938_v21 }
 0xf7c   :  { %v6694_v25 = vpop.eup %5706 }
 0xf7d   :  { %v3944_v28 = vsel %vm1075_vm2, %v6694_v25, 0.0  ;;  %v6702_v22 = vpop.eup %5708 }
 0xf7e   :  { %v3947_v27 = vsel %vm1075_vm2, %v6702_v22, 0.0 }
 0xf8a   :  { %3945 = vadd.xlane.f32.xlu1 %v3944_v28 }
 0xf90   :  { %3212 = vrot.lane.b32.xlu0 %v6442_v39, %s5773_s13 }
 0xfaf   :  { %3948 = vadd.xlane.f32.xlu0 %v3947_v27 }
 0xfce   :  { %v3928_v40 = vpop.xlane.xlu1 %3927 }
 0xfcf   :  { %5710 = vrcp.f32 %v3928_v40  ;;  %v3937_v8 = vpop.xlane.xlu0 %3936 }
 0xfd6   :  { %v3931_v30 = vpop.xlane.xlu0 %3930 }
 0xfd7   :  { %5712 = vrcp.f32 %v3931_v30 }
 0xfd8   :  { %5714 = vrcp.f32 %v3937_v8 }
 0xfd9   :  { %v5711_v31 = vpop.eup %5710 }
 0xfda   :  { %v3958_v39 = vmul.f32 %v5711_v31, %v6642_v9  ;;  %v3943_v36 = vpop.xlane.xlu0 %3942 }
 0xfdc   :  { %v3966_v42 = vpack.c.bf16 %v3958_v39, %v3958_v39 }
 0xfde   :  { %v3934_v61 = vpop.xlane.xlu1 %3933  ;;  %5482 = vmatmul.mubr.msk.bf16.vlgmr.msra.gmra.mrb[60].mxu0 %vm1075_vm2, %v3966_v42 }
 0xfdf   :  { %5716 = vrcp.f32 %v3934_v61  ;;  %5492 = vmatpush3.bf16.msra.mxu0 %v4070_v47  ;;  %5493 = vmatprep.mubr.msk.bf16.mxu0 %vm5765_vm1, %v5764_v15 }
 0xfe0   :  { %5503 = vmatprep.subr.bf16.mxu0 %v5764_v15  ;;  %5718 = vrcp.f32 %v3943_v36 }
 0xfe1   :  { %v5713_v33 = vpop.eup %5712 }
 0xfe2   :  { %v3959_v52 = vmul.f32 %v5713_v33, %v6652_v62  ;;  %v5715_v46 = vpop.eup %5714  ;;  %v3217_v0 = vpop.permute.xlu1 %3216 }
 0xfe3   :  { %v3961_v13 = vmul.f32 %v5715_v46, %v6644_v10  ;;  %v3298_v48 = vcombine.low %v3209_v7, %v3217_v0  ;;  %v3299_v38 = vcombine.high %v3209_v7, %v3217_v0 }
 0xfe4   :  { %v3967_v9 = vpack.c.bf16 %v3959_v52, %v3959_v52 }
 0xfe5   :  { %v3969_v62 = vpack.c.bf16 %v3961_v13, %v3961_v13  ;;  %v3306_v57 = vrot.slane %v3298_v48, %v5900_v55  ;;  %v3313_v58 = vrot.slane %v3299_v38, %v5900_v55 }
 0xfe6   :  { %5488 = vmatmul.mubr.msk.bf16.vlgmr.msra.gmra.mrb[56].mxu1 %vm1075_vm2, %v3967_v9  ;;  %v3221_v50 = vpop.permute.xlu1 %3220 }
 0xfe7   :  { %5498 = vmatpush3.bf16.msra.mxu1 %v4116_v54  ;;  %5499 = vmatprep.mubr.msk.bf16.mxu1 %vm5765_vm1, %v5764_v15 }
 0xfe8   :  { %5509 = vmatprep.subr.bf16.mxu1 %v5764_v15 }
 0xfe9   :  { %v5717_v37 = vpop.eup %5716 }
 0xfea   :  { %v3960_v56 = vmul.f32 %v5717_v37, %v6664_v26  ;;  %v5719_v27 = vpop.eup %5718 }
 0xfeb   :  { %v3963_v33 = vmul.f32 %v5719_v27, %v6656_v23 }
 0xfec   :  { %v3968_v60 = vpack.c.bf16 %v3960_v56, %v3960_v56 }
 0xfee   :  { %5494 = vmatmul.mubr.msk.bf16.vlgmr.msra.gmra.mrb[64].mxu0 %vm1075_vm2, %v3968_v60  ;;  %5500 = vmatmul.mubr.msk.bf16.vlgmr.msra.gmra.mrb[60].mxu1 %vm1075_vm2, %v3969_v62  ;;  %v3971_v60 = vpack.c.bf16 %v3963_v33, %v3963_v33 }
 0xfef   :  { %5505 = vmatprep.mubr.msk.bf16.mxu0 %vm5765_vm1, %v5764_v15  ;;  %5511 = vmatprep.mubr.msk.bf16.mxu1 %vm5765_vm1, %v5764_v15 }
0x1007   :  { %v3940_v10 = vpop.xlane.xlu0 %3939 }
0x1008   :  { %5720 = vrcp.f32 %v3940_v10 }
0x100b   :  { %v3213_v2 = vpop.permute.xlu0 %3212 }
0x100c   :  { %v3314_v26 = vcombine.low %v3213_v2, %v3221_v50  ;;  %v3315_v6 = vcombine.high %v3213_v2, %v3221_v50 }
0x100e   :  { %v3322_v32 = vrot.slane %v3314_v26, %v5900_v55  ;;  %v3329_v44 = vrot.slane %v3315_v6, %v5900_v55 }
0x1010   :  { %v3330_v3 = vcombine.low %v3306_v57, %v3322_v32  ;;  %v3331_v4 = vcombine.high %v3306_v57, %v3322_v32  ;;  %v3346_v59 = vcombine.low %v3313_v58, %v3329_v44  ;;  %v3347_v5 = vcombine.high %v3313_v58, %v3329_v44 }
0x1012   :  { %v3338_v45 = vrot.slane %v3330_v3, %v5911_v63  ;;  %v3345_v29 = vrot.slane %v3331_v4, %v5911_v63  ;;  %v3354_v11 = vrot.slane %v3346_v59, %v5911_v63  ;;  %v3361_v41 = vrot.slane %v3347_v5, %v5911_v63  ;;  %v5721_v31 = vpop.eup %5720 }
0x1013   :  { %v3962_v52 = vmul.f32 %v5721_v31, %v6690_v53 }
0x1014   :  { %v3434_v43 = vcombine.low %v3338_v45, %v3345_v29  ;;  %v5131_v12 = vcombine.high %v3338_v45, %v3345_v29  ;;  %v3450_v16 = vcombine.low %v3354_v11, %v3361_v41  ;;  %v5132_v17 = vcombine.high %v3354_v11, %v3361_v41 }
0x1015   :  { %v3970_v56 = vpack.c.bf16 %v3962_v52, %v3962_v52 }
0x1016   :  { %v3441_v18 = vrot.slane %v3434_v43, %v5900_v55  ;;  %v3449_v14 = vrot.slane %v5131_v12, %v5900_v55  ;;  %v3457_v51 = vrot.slane %v3450_v16, %v5900_v55  ;;  %v3465_v19 = vrot.slane %v5132_v17, %v5900_v55 }
0x1017   :  { %v3946_v21 = vpop.xlane.xlu1 %3945 }
0x1018   :  { %v3466_v28 = vcombine.low %v3441_v18, %v3449_v14  ;;  %v3482_v20 = vcombine.low %v3457_v51, %v3465_v19  ;;  %v3467_v1 = vcombine.high %v3441_v18, %v3449_v14  ;;  %5722 = vrcp.f32 %v3946_v21 }
0x1019   :  { %v3483_v7 = vcombine.high %v3457_v51, %v3465_v19 }
0x101a   :  { %v3474_v40 = vrot.slane %v3466_v28, %v5911_v63  ;;  %v3490_v8 = vrot.slane %v3482_v20, %v5911_v63  ;;  %v3481_v30 = vrot.slane %v3467_v1, %v5911_v63 }
0x101b   :  { %v3497_v39 = vrot.slane %v3483_v7, %v5911_v63 }
0x101c   :  { %v3498_v35 = vcombine.low %v3474_v40, %v3490_v8  ;;  %v3499_v42 = vcombine.high %v3474_v40, %v3490_v8 }
0x101d   :  { %v3500_v61 = vcombine.low %v3481_v30, %v3497_v39  ;;  %v3501_v47 = vcombine.high %v3481_v30, %v3497_v39 }
0x101e   :  { %v3506_v34 = vpack.c.bf16 %v3498_v35, %v3498_v35  ;;  %v3507_v9 = vpack.c.bf16 %v3499_v42, %v3499_v42 }
0x101f   :  { %v3508_v13 = vpack.c.bf16 %v3500_v61, %v3500_v61  ;;  %v3509_v37 = vpack.c.bf16 %v3501_v47, %v3501_v47 }
0x1020   :  { %v4162_v46 = vsel %vm1543_vm4, %v3506_v34, 0  ;;  %v4208_v54 = vsel %vm1543_vm4, %v3507_v9, 0 }
0x1021   :  { %5504 = vmatpush3.bf16.msra.mxu0 %v4162_v46  ;;  %5510 = vmatpush3.bf16.msra.mxu1 %v4208_v54  ;;  %v4254_v23 = vsel %vm1543_vm4, %v3508_v13, 0  ;;  %v4300_v53 = vsel %vm1543_vm4, %v3509_v37, 0 }
0x1022   :  { %5515 = vmatprep.subr.bf16.mxu0 %v5764_v15  ;;  %5521 = vmatprep.subr.bf16.mxu1 %v5764_v15  ;;  %v5723_v62 = vpop.eup %5722 }
0x1023   :  { %v3964_v36 = vmul.f32 %v5723_v62, %v6694_v25 }
0x1024   :  { %5506 = vmatmul.mubr.msk.bf16.vlgmr.msra.gmra.mrb[68].mxu0 %vm1075_vm2, %v3970_v56  ;;  %5512 = vmatmul.mubr.msk.bf16.vlgmr.msra.gmra.mrb[64].mxu1 %vm1075_vm2, %v3971_v60 }
0x1025   :  { %5516 = vmatpush3.bf16.msra.mxu0 %v4254_v23  ;;  %5522 = vmatpush3.bf16.msra.mxu1 %v4300_v53  ;;  %v3972_v0 = vpack.c.bf16 %v3964_v36, %v3964_v36 }
0x1026   :  { %5517 = vmatprep.mubr.msk.bf16.mxu0 %vm5765_vm1, %v5764_v15  ;;  %5523 = vmatprep.mubr.msk.bf16.mxu1 %vm5765_vm1, %v5764_v15 }
0x1027   :  { %5527 = vmatprep.subr.bf16.mxu0 %v5764_v15  ;;  %5535 = vmatprep.subr.bf16.mxu1 %v5764_v15 }
0x102c   :  { %5518 = vmatmul.mubr.msk.bf16.vlgmr.msra.gmra.mrb[72].mxu0 %vm1075_vm2, %v3972_v0 }
0x102d   :  { %5531 = vmatprep.mubr.msk.bf16.mxu0 %vm5765_vm1, %v5764_v15 }
0x103c   :  { %v3949_v10 = vpop.xlane.xlu0 %3948 }
0x103d   :  { %5724 = vrcp.f32 %v3949_v10 }
0x1047   :  { %v5725_v48 = vpop.eup %5724 }
0x1048   :  { %v3965_v25 = vmul.f32 %v5725_v48, %v6702_v22 }
0x104a   :  { %v3973_v38 = vpack.c.bf16 %v3965_v25, %v3965_v25 }
0x104c   :  { %5524 = vmatmul.mubr.msk.bf16.vlgmr.msra.gmra.mrb[68].mxu1 %vm1075_vm2, %v3973_v38 }
0x104d   :  { %5539 = vmatprep.mubr.msk.bf16.mxu1 %vm5765_vm1, %v5764_v15 }
0x10b1   :  { %v4014_v50 = vpop.f32.mrb[60].mxu0 }
0x10b2   :  { %v5483_v2 = vpop.f32.mrb[61].mxu0 }
0x10b3   :  { %v4017_v26 = vpop.f32.mrb[62].mxu0 }
0x10b4   :  { %v5484_v6 = vpop.f32.mrb[63].mxu0 }
0x10b9   :  { %v4060_v57 = vpop.f32.mrb[56].mxu1 }
0x10ba   :  { %v5489_v58 = vpop.f32.mrb[57].mxu1 }
0x10bb   :  { %v4063_v32 = vpop.f32.mrb[58].mxu1 }
0x10bc   :  { %v5490_v44 = vpop.f32.mrb[59].mxu1 }
0x10c1   :  { %v4106_v3 = vpop.f32.mrb[64].mxu0  ;;  %v4152_v4 = vpop.f32.mrb[60].mxu1 }
0x10c2   :  { %v4342_v59 = vcombine.low %v4014_v50, %v4106_v3  ;;  %v4343_v5 = vcombine.high %v4014_v50, %v4106_v3  ;;  %v4358_v45 = vcombine.low %v4060_v57, %v4152_v4  ;;  %v4359_v22 = vcombine.high %v4060_v57, %v4152_v4  ;;  %v5495_v29 = vpop.f32.mrb[65].mxu0  ;;  %v5501_v11 = vpop.f32.mrb[61].mxu1 }
0x10c3   :  { %v4109_v41 = vpop.f32.mrb[66].mxu0  ;;  %v4155_v43 = vpop.f32.mrb[62].mxu1 }
0x10c4   :  { %v4350_v12 = vrot.slane %v4342_v59, %v5900_v55  ;;  %v4357_v16 = vrot.slane %v4343_v5, %v5900_v55  ;;  %v4366_v17 = vrot.slane %v4358_v45, %v5900_v55  ;;  %v4373_v18 = vrot.slane %v4359_v22, %v5900_v55  ;;  %v5496_v14 = vpop.f32.mrb[67].mxu0  ;;  %v5502_v51 = vpop.f32.mrb[63].mxu1 }
0x10c6   :  { %v4374_v19 = vcombine.low %v4350_v12, %v4366_v17  ;;  %v4375_v21 = vcombine.high %v4350_v12, %v4366_v17  ;;  %v4390_v28 = vcombine.low %v4357_v16, %v4373_v18  ;;  %v4391_v20 = vcombine.high %v4357_v16, %v4373_v18 }
0x10c8   :  { %v4382_v1 = vrot.slane %v4374_v19, %v5911_v63  ;;  %v4389_v27 = vrot.slane %v4375_v21, %v5911_v63  ;;  %v4398_v7 = vrot.slane %v4390_v28, %v5911_v63  ;;  %v4405_v40 = vrot.slane %v4391_v20, %v5911_v63 }
0x10ca   :  { %v4478_v8 = vcombine.low %v4382_v1, %v4389_v27  ;;  %v5149_v30 = vcombine.high %v4382_v1, %v4389_v27  ;;  %v4494_v31 = vcombine.low %v4398_v7, %v4405_v40  ;;  %v5150_v39 = vcombine.high %v4398_v7, %v4405_v40  ;;  %v5632_v27 = vld [vmem:[%s6970_s2 + $0x50] sm:$0xff]  }
0x10cb   :  { %5528 = vmatpush3.bf16.msra.mxu0 %v5632_v27 }
0x10cc   :  { %v4485_v35 = vrot.slane %v4478_v8, %v5900_v55  ;;  %v4493_v42 = vrot.slane %v5149_v30, %v5900_v55  ;;  %v4501_v61 = vrot.slane %v4494_v31, %v5900_v55  ;;  %v4509_v47 = vrot.slane %v5150_v39, %v5900_v55  ;;  %5529 = vmatprep.subr.bf16.mxu0 %v5764_v15 }
0x10ce   :  { %v4511_v33 = vcombine.high %v4485_v35, %v4493_v42  ;;  %v4527_v52 = vcombine.high %v4501_v61, %v4509_v47  ;;  %v4510_v34 = vcombine.low %v4485_v35, %v4493_v42  ;;  %v4526_v9 = vcombine.low %v4501_v61, %v4509_v47  ;;  %v5633_v61 = vld [vmem:[%s6970_s2 + $0x58] sm:$0xff]  }
0x10cf   :  { %5530 = vmatpush3.bf16.msra.mxu0 %v5633_v61 }
0x10d0   :  { %v6779_v46 = vrot.slane %v4511_v33, %v5911_v63  ;;  %v6782_v54 = vrot.slane %v4527_v52, %v5911_v63  ;;  %v6785_v13 = vrot.slane %v4510_v34, %v5911_v63  ;;  %v6788_v37 = vrot.slane %v4526_v9, %v5911_v63  ;;  %5543 = vmatprep.subr.bf16.mxu0 %v5764_v15 }
0x10d2   :  { %v4544_v56 = vcombine.low %v6779_v46, %v6782_v54  ;;  %v4542_v60 = vcombine.low %v6785_v13, %v6788_v37  ;;  %v4543_v62 = vcombine.high %v6785_v13, %v6788_v37  ;;  %v4545_v23 = vcombine.high %v6779_v46, %v6782_v54  ;;  %v5108_v13 = vld [vmem:[%s6971_s3 + $0x80] sm:$0xff] }
0x10f7   :  { %v4198_v53 = vpop.f32.mrb[68].mxu0  ;;  %v4244_v36 = vpop.f32.mrb[64].mxu1 }
0x10f8   :  { %v5507_v0 = vpop.f32.mrb[69].mxu0  ;;  %v5513_v10 = vpop.f32.mrb[65].mxu1 }
0x10f9   :  { %v4201_v48 = vpop.f32.mrb[70].mxu0  ;;  %v4247_v25 = vpop.f32.mrb[66].mxu1 }
0x10fa   :  { %v5508_v38 = vpop.f32.mrb[71].mxu0  ;;  %v5514_v50 = vpop.f32.mrb[67].mxu1 }
0x10ff   :  { %v4290_v2 = vpop.f32.mrb[72].mxu0 }
0x1100   :  { %v4410_v26 = vcombine.low %v4198_v53, %v4290_v2  ;;  %v4411_v6 = vcombine.high %v4198_v53, %v4290_v2  ;;  %v5519_v57 = vpop.f32.mrb[73].mxu0 }
0x1101   :  { %v4293_v58 = vpop.f32.mrb[74].mxu0 }
0x1102   :  { %v5520_v32 = vpop.f32.mrb[75].mxu0  ;;  %v4418_v45 = vrot.slane %v4410_v26, %v5900_v55  ;;  %v4425_v22 = vrot.slane %v4411_v6, %v5900_v55 }
0x111f   :  { %v4336_v44 = vpop.f32.mrb[68].mxu1 }
0x1120   :  { %v4426_v3 = vcombine.low %v4244_v36, %v4336_v44  ;;  %v4427_v4 = vcombine.high %v4244_v36, %v4336_v44  ;;  %v5525_v59 = vpop.f32.mrb[69].mxu1 }
0x1121   :  { %v4339_v5 = vpop.f32.mrb[70].mxu1 }
0x1122   :  { %v4434_v29 = vrot.slane %v4426_v3, %v5900_v55  ;;  %v4441_v11 = vrot.slane %v4427_v4, %v5900_v55  ;;  %v5526_v41 = vpop.f32.mrb[71].mxu1  ;;  %v5109_v4 = vld [vmem:[%s6971_s3 + $0x88] sm:$0xff] }
0x1124   :  { %v4442_v43 = vcombine.low %v4418_v45, %v4434_v29  ;;  %v4443_v12 = vcombine.high %v4418_v45, %v4434_v29  ;;  %v4458_v16 = vcombine.low %v4425_v22, %v4441_v11  ;;  %v4459_v17 = vcombine.high %v4425_v22, %v4441_v11 }
0x1126   :  { %v4450_v18 = vrot.slane %v4442_v43, %v5911_v63  ;;  %v4457_v14 = vrot.slane %v4443_v12, %v5911_v63  ;;  %v4466_v51 = vrot.slane %v4458_v16, %v5911_v63  ;;  %v4473_v19 = vrot.slane %v4459_v17, %v5911_v63 }
0x1128   :  { %v4546_v21 = vcombine.low %v4450_v18, %v4457_v14  ;;  %v5151_v28 = vcombine.high %v4450_v18, %v4457_v14  ;;  %v4562_v20 = vcombine.low %v4466_v51, %v4473_v19  ;;  %v5152_v1 = vcombine.high %v4466_v51, %v4473_v19 }
0x112a   :  { %v4553_v7 = vrot.slane %v4546_v21, %v5900_v55  ;;  %v4561_v40 = vrot.slane %v5151_v28, %v5900_v55  ;;  %v4569_v8 = vrot.slane %v4562_v20, %v5900_v55  ;;  %v4577_v30 = vrot.slane %v5152_v1, %v5900_v55  ;;  %v5634_v21 = vld [vmem:[%s6969_s1 + $0x30] sm:$0xff]   ;;  %v5635_v28 = vld [vmem:[%s6969_s1 + $0x38] sm:$0xff]   ;;  %v5636_v20 = vld [vmem:[%s6970_s2 + $0x60] sm:$0xff]  }
0x112b   :  { %5536 = vmatpush3.bf16.msra.mxu1 %v5634_v21  ;;  %v5637_v1 = vld [vmem:[%s6970_s2 + $0x68] sm:$0xff]  }
0x112c   :  { %v4579_v31 = vcombine.high %v4553_v7, %v4561_v40  ;;  %v4595_v39 = vcombine.high %v4569_v8, %v4577_v30  ;;  %v4578_v35 = vcombine.low %v4553_v7, %v4561_v40  ;;  %v4594_v42 = vcombine.low %v4569_v8, %v4577_v30  ;;  %5537 = vmatprep.subr.bf16.mxu1 %v5764_v15 }
0x112e   :  { %v4593_v47 = vrot.slane %v4579_v31, %v5911_v63  ;;  %v4609_v33 = vrot.slane %v4595_v39, %v5911_v63  ;;  %v4586_v52 = vrot.slane %v4578_v35, %v5911_v63  ;;  %v4602_v34 = vrot.slane %v4594_v42, %v5911_v63  ;;  %v5110_v42 = vld [vmem:[%s6971_s3 + $0x90] sm:$0xff] }
0x112f   :  { %5538 = vmatpush3.bf16.msra.mxu1 %v5635_v28 }
0x1130   :  { %v4612_v55 = vcombine.low %v4593_v47, %v4609_v33  ;;  %v4611_v9 = vcombine.high %v4586_v52, %v4602_v34  ;;  %v4610_v46 = vcombine.low %v4586_v52, %v4602_v34  ;;  %v4613_v54 = vcombine.high %v4593_v47, %v4609_v33  ;;  %5563 = vmatprep.subr.bf16.mxu1 %v5764_v15  ;;  %v5111_v47 = vld [vmem:[%s6971_s3 + $0x98] sm:$0xff]  ;;  %v5112_v34 = vld [vmem:[%s6971_s3 + $0xa0] sm:$0xff] }
0x1132   :  { %v5606_v53 = vpack.i.bf16 %v4612_v55, %v4544_v56  ;;  %v5601_v36 = vpack.i.bf16 %v4611_v9, %v4543_v62  ;;  %v5611_v0 = vpack.i.bf16 %v4613_v54, %v4545_v23  ;;  %v5113_v55 = vld [vmem:[%s6971_s3 + $0xa8] sm:$0xff] }
0x1134   :  { %5607 = vrot.lane.b32.xlu1 %v5606_v53, %s5774_s18  ;;  %5602 = vrot.lane.b32.xlu0 %v5601_v36, %s5775_s19  ;;  %v5638_v36 = vld [vmem:[%s6970_s2 + $0x70] sm:$0xff]  }
0x1138   :  { %5612 = vrot.lane.b32.xlu1 %v5611_v0, %s5776_s20  ;;  %v5639_v0 = vld [vmem:[%s6970_s2 + $0x78] sm:$0xff]  }
0x11a6   :  { %v5608_v10 = vpop.permute.xlu1 %5607  ;;  %v5603_v48 = vpop.permute.xlu0 %5602 }
0x11a7   :  { %v5605_v25 = vunpack.i.h.bf16 %v5603_v48  ;;  %v5604_v63 = vunpack.i.l.bf16 %v5603_v48  ;;  %v5610_v38 = vunpack.i.h.bf16 %v5608_v10  ;;  %v5609_v50 = vunpack.i.l.bf16 %v5608_v10  ;;  %v5640_v10 = vld [vmem:[%s6970_s2 + $0x80] sm:$0xff]   ;;  %v5641_v48 = vld [vmem:[%s6970_s2 + $0x88] sm:$0xff]  }
0x11a9   :  { %v4638_v2 = vsel %vm1075_vm2, %v4542_v60, %v5604_v63  ;;  %v4639_v56 = vsel %vm1075_vm2, %v4610_v46, %v5605_v25  ;;  %v5642_v25 = vld [vmem:[%s6970_s2 + $0x90] sm:$0xff]   ;;  %v5643_v63 = vld [vmem:[%s6970_s2 + $0x98] sm:$0xff]  }
0x11aa   :  { %v5613_v62 = vpop.permute.xlu1 %5612  ;;  %v4640_v6 = vsel %vm2207_vm5, %v4638_v2, %v5609_v50  ;;  %v4641_v57 = vsel %vm2207_vm5, %v4639_v56, %v5610_v38  ;;  %v5116_v38 = vld [vmem:[%s6972_s4 + $0x10] sm:$0xff]  ;;  %v5117_v2 = vld [vmem:[%s6972_s4 + $0x18] sm:$0xff] }
0x11ab   :  { %v5615_v23 = vunpack.i.h.bf16 %v5613_v62  ;;  %v5614_v26 = vunpack.i.l.bf16 %v5613_v62 }
0x11ad   :  { %v4642_v58 = vsel %vm2210_vm6, %v4640_v6, %v5614_v26  ;;  %v4643_v32 = vsel %vm2210_vm6, %v4641_v57, %v5615_v23 }
0x11ae   :  { %v4644_v44 = vpack.c.bf16 %v4643_v32, %v4642_v58 }
0x11b0   :  { %5532 = vmatmul.mubr.msk.bf16.vlgmr.msra.gmra.mrb[76].mxu0 %vm78_vm0, %v4644_v44 }
0x11b1   :  { %5559 = vmatprep.mubr.msk.bf16.mxu0 %vm5765_vm1, %v5764_v15  ;;  %5544 = vmatpush3.bf16.msra.mxu0 %v5636_v20 }
0x11b2   :  { %5545 = vmatprep.subr.bf16.mxu0 %v5764_v15 }
0x11b5   :  { %5546 = vmatpush3.bf16.msra.mxu0 %v5637_v1 }
0x11b6   :  { %5547 = vmatprep.subr.bf16.mxu0 %v5764_v15 }
0x11b9   :  { %5548 = vmatpush3.bf16.msra.mxu0 %v5638_v36 }
0x11ba   :  { %5549 = vmatprep.subr.bf16.mxu0 %v5764_v15 }
0x11bd   :  { %5550 = vmatpush3.bf16.msra.mxu0 %v5639_v0 }
0x11be   :  { %5551 = vmatprep.subr.bf16.mxu0 %v5764_v15 }
0x11c1   :  { %5552 = vmatpush3.bf16.msra.mxu0 %v5640_v10 }
0x11c2   :  { %5553 = vmatprep.subr.bf16.mxu0 %v5764_v15 }
0x11c5   :  { %5554 = vmatpush3.bf16.msra.mxu0 %v5641_v48 }
0x11c6   :  { %5555 = vmatprep.subr.bf16.mxu0 %v5764_v15 }
0x11c9   :  { %5556 = vmatpush3.bf16.msra.mxu0 %v5642_v25  ;;  %v5171_v25 = vld [vmem:[%s6972_s4 + $0x20] sm:$0xff] }
0x11ca   :  { %5557 = vmatprep.subr.bf16.mxu0 %v5764_v15 }
0x11cd   :  { %5558 = vmatpush3.bf16.msra.mxu0 %v5643_v63 }
0x1283   :  { %v4694_v37 = vpop.f32.mrb[76].mxu0 }
0x1284   :  { %v4701_v60 = vadd.f32 %v4694_v37, %v6380_v49  ;;  %v5533_v3 = vpop.f32.mrb[77].mxu0 }
0x1285   :  { %v4697_v59 = vpop.f32.mrb[78].mxu0 }
0x1286   :  { %v6844_v5 = vadd.f32 %v5108_v13, %v4701_v60  ;;  %v4702_v45 = vadd.f32 %v4697_v59, %v6383_v24  ;;  %v5534_v22 = vpop.f32.mrb[79].mxu0 }
0x1287   :  { %v5114_v22 = vld [vmem:[%s6971_s3 + $0xb0] sm:$0xff] }
0x1288   :  { %v6847_v29 = vadd.f32 %v5109_v4, %v4702_v45  ;;  %v4705_v11 = vsel %vm78_vm0, %v6844_v5, 0.0 }
0x1289   :  { %4706 = vadd.xlane.f32.xlu0 %v4705_v11 }
0x128a   :  { %v4708_v49 = vsel %vm78_vm0, %v6847_v29, 0.0 }
0x128b   :  { %4709 = vadd.xlane.f32.xlu1 %v4708_v49  ;;  %v5115_v49 = vld [vmem:[%s6971_s3 + $0xb8] sm:$0xff] }
0x1316   :  { %v4707_v41 = vpop.xlane.xlu0 %4706 }
0x1317   :  { %v4711_v43 = vmul.f32 0.03125, %v4707_v41 }
0x1318   :  { %v4710_v12 = vpop.xlane.xlu1 %4709 }
0x1319   :  { %v4713_v16 = vsub.f32 %v6844_v5, %v4711_v43  ;;  %v4712_v17 = vmul.f32 0.03125, %v4710_v12 }
0x131b   :  { %v4714_v18 = vsub.f32 %v6847_v29, %v4712_v17  ;;  %v4715_v24 = vmul.f32 %v4713_v16, %v4713_v16 }
0x131d   :  { %v4717_v14 = vsel %vm78_vm0, %v4715_v24, 0.0  ;;  %v4716_v51 = vmul.f32 %v4714_v18, %v4714_v18 }
0x131e   :  { %4718 = vadd.xlane.f32.xlu0 %v4717_v14 }
0x131f   :  { %v4720_v19 = vsel %vm78_vm0, %v4716_v51, 0.0 }
0x1322   :  { %4721 = vadd.xlane.f32.xlu0 %v4720_v19 }
0x13ab   :  { %v4719_v27 = vpop.xlane.xlu0 %4718 }
0x13ac   :  { %v4723_v7 = vmul.f32 0.03125, %v4719_v27 }
0x13ae   :  { %v4725_v40 = vadd.f32 1e-05, %v4723_v7 }
0x13af   :  { %v4722_v8 = vpop.xlane.xlu0 %4721 }
0x13b0   :  { %5726 = vrsqrt.f32 %v4725_v40  ;;  %v4724_v30 = vmul.f32 0.03125, %v4722_v8 }
0x13b2   :  { %v4726_v31 = vadd.f32 1e-05, %v4724_v30  ;;  %v5645_v30 = vld [vmem:[%s6969_s1 + $0x48] sm:$0xff]  }
0x13b4   :  { %5728 = vrsqrt.f32 %v4726_v31 }
0x13ba   :  { %v5727_v39 = vpop.eup %5726 }
0x13bb   :  { %v4729_v35 = vmul.f32 %v5727_v39, %v4713_v16 }
0x13bd   :  { %v4731_v33 = vmul.f32 %v5110_v42, %v4729_v35 }
0x13be   :  { %v5729_v61 = vpop.eup %5728 }
0x13bf   :  { %v4730_v52 = vmul.f32 %v5729_v61, %v4714_v18  ;;  %v4733_v46 = vadd.f32 %v5112_v34, %v4731_v33 }
0x13c1   :  { %v4732_v9 = vmul.f32 %v5111_v47, %v4730_v52  ;;  %v5167_v52 = vld [vmem:[%s6971_s3 + $0xc0] sm:$0xff] }
0x13c3   :  { %v4734_v54 = vadd.f32 %v5113_v55, %v4732_v9 }
0x13c5   :  { %v4735_v53 = vpack.c.bf16 %v4734_v54, %v4733_v46  ;;  %v5169_v54 = vld [vmem:[%s6971_s3 + $0xd0] sm:$0xff] }
0x13c7   :  { %5540 = vmatmul.mubr.msk.bf16.vlgmr.msra.gmra.mrb[72].mxu1 %vm78_vm0, %v4735_v53  ;;  %v5170_v53 = vld [vmem:[%s6971_s3 + $0xd8] sm:$0xff] }
0x13c8   :  { %5567 = vmatprep.mubr.msk.bf16.mxu1 %vm5765_vm1, %v5764_v15 }
0x149a   :  { %v4785_v50 = vpop.f32.mrb[72].mxu1 }
0x149b   :  { %v4786_v56 = vadd.f32 %v5116_v38, %v4785_v50  ;;  %v5541_v62 = vpop.f32.mrb[73].mxu1  ;;  %v5172_v38 = vld [vmem:[%s6972_s4 + $0x28] sm:$0xff] }
0x149c   :  { %v4788_v23 = vpop.f32.mrb[74].mxu1 }
0x149d   :  { %v4794_v26 = vmul.f32 0.70710677, %v4786_v56  ;;  %v4789_v6 = vadd.f32 %v5117_v2, %v4788_v23  ;;  %v5542_v57 = vpop.f32.mrb[75].mxu1  ;;  %v4792_v37 = vmul.f32 0.5, %v4786_v56 }
0x149f   :  { %5730 = verf.f32 %v4794_v26  ;;  %v4795_v58 = vmul.f32 0.70710677, %v4789_v6  ;;  %v4793_v60 = vmul.f32 0.5, %v4789_v6 }
0x14a1   :  { %5732 = verf.f32 %v4795_v58 }
0x14a9   :  { %v5731_v32 = vpop.eup %5730 }
0x14aa   :  { %v4798_v44 = vadd.f32 1.0, %v5731_v32 }
0x14ab   :  { %v5733_v13 = vpop.eup %5732 }
0x14ac   :  { %v4799_v3 = vadd.f32 1.0, %v5733_v13  ;;  %v4800_v4 = vmul.f32 %v4798_v44, %v4792_v37 }
0x14ae   :  { %v4801_v59 = vmul.f32 %v4799_v3, %v4793_v60 }
0x14b0   :  { %v4802_v45 = vpack.c.bf16 %v4801_v59, %v4800_v4 }
0x14b2   :  { %5560 = vmatmul.mubr.bf16.vlgmr.msra.gmra.mrb[80].mxu0 %v4802_v45 }
0x1585   :  { %v4885_v11 = vpop.f32.mrb[80].mxu0 }
0x1586   :  { %v4886_v41 = vadd.f32 %v5114_v22, %v4885_v11  ;;  %v5561_v43 = vpop.f32.mrb[81].mxu0 }
0x1587   :  { %v4888_v12 = vpop.f32.mrb[82].mxu0 }
0x1588   :  { %v4892_v16 = vadd.f32 %v4886_v41, %v6844_v5  ;;  %v4889_v17 = vadd.f32 %v5115_v49, %v4888_v12  ;;  %v5562_v18 = vpop.f32.mrb[83].mxu0 }
0x158a   :  { %v4893_v24 = vadd.f32 %v4889_v17, %v6847_v29  ;;  %v4908_v14 = vsel %vm78_vm0, %v4892_v16, 0.0  ;;  %v5644_v29 = vld [vmem:[%s6969_s1 + $0x40] sm:$0xff]  }
0x158b   :  { %4909 = vadd.xlane.f32.xlu0 %v4908_v14  ;;  %5564 = vmatpush3.bf16.msra.mxu1 %v5644_v29 }
0x158c   :  { %v4911_v51 = vsel %vm78_vm0, %v4893_v24, 0.0  ;;  %5565 = vmatprep.subr.bf16.mxu1 %v5764_v15  ;;  %v5168_v15 = vld [vmem:[%s6971_s3 + $0xc8] sm:$0xff]  ;;  %s5740_s3 = scalar_lea.vmem %s5003_s25, 256 }
0x158d   :  { %4912 = vadd.xlane.f32.xlu1 %v4911_v51  ;;  %p5741_p0 = scmp.ne.s32.totalorder %s5003_s25, %s5740_s3  ;;  %p5746_p2 = scmp.lt.s32.totalorder %s5740_s3, %s5740_s3 }
0x158f   :  { %5566 = vmatpush3.bf16.msra.mxu1 %v5645_v30  ;;  %p5747_p3 = por %p5746_p2, %p5745_p1 }
0x1591   :  { %p5748_p4 = pnand %p5747_p3, %p5741_p0 }
0x1618   :  { %v4910_v19 = vpop.xlane.xlu0 %4909 }
0x1619   :  { %v4914_v21 = vmul.f32 0.03125, %v4910_v19 }
0x161a   :  { %v4913_v28 = vpop.xlane.xlu1 %4912 }
0x161b   :  { %v4916_v20 = vsub.f32 %v4892_v16, %v4914_v21  ;;  %v4915_v1 = vmul.f32 0.03125, %v4913_v28 }
0x161d   :  { %v4917_v27 = vsub.f32 %v4893_v24, %v4915_v1  ;;  %v4918_v7 = vmul.f32 %v4916_v20, %v4916_v20 }
0x161f   :  { %v4920_v40 = vsel %vm78_vm0, %v4918_v7, 0.0  ;;  %v4919_v5 = vmul.f32 %v4917_v27, %v4917_v27 }
0x1620   :  { %4921 = vadd.xlane.f32.xlu0 %v4920_v40 }
0x1621   :  { %v4923_v8 = vsel %vm78_vm0, %v4919_v5, 0.0 }
0x1622   :  { %4924 = vadd.xlane.f32.xlu1 %v4923_v8 }
0x16ad   :  { %v4922_v31 = vpop.xlane.xlu0 %4921 }
0x16ae   :  { %v4926_v39 = vmul.f32 0.03125, %v4922_v31 }
0x16af   :  { %v4925_v35 = vpop.xlane.xlu1 %4924 }
0x16b0   :  { %v4928_v42 = vadd.f32 1e-05, %v4926_v39  ;;  %v4927_v61 = vmul.f32 0.03125, %v4925_v35 }
0x16b2   :  { %5734 = vrsqrt.f32 %v4928_v42  ;;  %v4929_v47 = vadd.f32 1e-05, %v4927_v61 }
0x16b4   :  { %5736 = vrsqrt.f32 %v4929_v47 }
0x16bc   :  { %v5735_v33 = vpop.eup %5734 }
0x16bd   :  { %v4932_v34 = vmul.f32 %v5735_v33, %v4916_v20 }
0x16be   :  { %v5737_v55 = vpop.eup %5736 }
0x16bf   :  { %v4934_v9 = vmul.f32 %v5167_v52, %v4932_v34  ;;  %v4933_v46 = vmul.f32 %v5737_v55, %v4917_v27 }
0x16c1   :  { %v4935_v36 = vmul.f32 %v5168_v15, %v4933_v46  ;;  %v4936_v0 = vadd.f32 %v5169_v54, %v4934_v9 }
0x16c3   :  { %v4937_v10 = vadd.f32 %v5170_v53, %v4935_v36 }
0x16c5   :  { %v4938_v48 = vpack.c.bf16 %v4937_v10, %v4936_v0 }
0x16c7   :  { %5568 = vmatmul.mubr.msk.bf16.vlgmr.msra.gmra.mrb[76].mxu1 %vm78_vm0, %v4938_v48 }
0x179a   :  { %v4988_v63 = vpop.f32.mrb[76].mxu1 }
0x179b   :  { %v4989_v50 = vadd.f32 %v5171_v25, %v4988_v63  ;;  %v5569_v2 = vpop.f32.mrb[77].mxu1 }
0x179c   :  { %v4991_v56 = vpop.f32.mrb[78].mxu1 }
0x179d   :  { %4995 = vst [vmem:[#allocation2] sm:$0xff] %v4989_v50  ;;  %v4992_v62 = vadd.f32 %v5172_v38, %v4991_v56  ;;  %v5570_v23 = vpop.f32.mrb[79].mxu1 }
0x179f   :  { %4996 = vst [vmem:[#allocation2 + $0x8] sm:$0xff] %v4992_v62 }
0x17a0   :  { %5751 = shalt.err (!%p5748_p4)
}
0x17a1   :  { %s5752_s4 = scalar_lea.hbm %s6973_s5, 256 }
0x17a2   :  { %p5753_p5 = scmp.ne.s32.totalorder %s6973_s5, %s5752_s4  ;;  %p5756_p6 = scmp.lt.u32.totalorder %s5752_s4, %s6973_s5 }
0x17a4   :  { %p5758_p7 = pnand %p5756_p6, %p5753_p5 }
0x17a6   :  { %5761 = shalt.err (!%p5758_p7)
}
0x17a7   :  { %s5778_s30 = smov 128  }
0x17a8   :  { %5008 = dma.vmem_to_hbm [thread:$0]  %s5003_s25, 256, %s6973_s5, [#allocation3], %s5778_s30, %s5778_s30, %s5775_s19  }
0x17a9   :  { %5762 = dma.done.wait [#allocation3], 256  }
0x17aa   :  { %5763 = vsyncadd [#allocation3], 4294967040 }
0x17ab   :  { %5012 = vsyncpa [#allocation3], 1 }

</bundles_post_ra>
